<compile_context>
chip_gen: v7x
topology: tpu7x:2x2x1
jax: 0.10.0
libtpu: 0.0.40
codegen_flags: <defaults>
</compile_context>

<pallas_src>
import functools

import numpy as np
import jax
import jax.numpy as jnp
from jax.experimental import pallas as pl
from jax.experimental.pallas import tpu as pltpu


# ----------------------------- fused kernel ---------------------------------
def fused_forward_kernel(*refs, num_cnn, lstm_layers, hidden):
    f32 = jnp.float32
    bf16 = jnp.bfloat16
    H = hidden

    xw_ref, xs_ref = refs[0], refs[1]
    o_ref = refs[-1]
    pos = 2
    cnn_refs = refs[pos:pos + 4 * num_cnn]
    pos += 4 * num_cnn
    lstm_refs = refs[pos:pos + 2 * lstm_layers]
    pos += 2 * lstm_layers
    (w1a, w1b, b1, s1, t1, w2, b2, s2, t2, w3, b3, w4, b4) = refs[pos:-1]

    def mm(a, w_ref):
        return jnp.dot(a.astype(bf16), w_ref[...], preferred_element_type=f32)

    # ---- CNN stack: per block, 2 banded matmuls (even/odd pooled positions),
    #      folded-BN affine, pairwise max (== MaxPool1d(2)), ReLU.  Activation
    #      stays in flat (B, L*C) layout throughout -> zero relayout work. ----
    h = xw_ref[...]                                       # (B, W*F) f32
    for blk in range(num_cnn):
        a_even, a_odd, sc, sh = cnn_refs[4 * blk:4 * blk + 4]
        ye = mm(h, a_even) * sc[...] + sh[...]            # conv@even pos + BN
        yo = mm(h, a_odd) * sc[...] + sh[...]             # conv@odd  pos + BN
        h = jnp.maximum(jnp.maximum(ye, yo), 0.0)         # MaxPool(2) + ReLU
        # Dropout(0.2) is identity in eval mode.

    # After the last block the flat layout (B, 1*C_last) equals PyTorch's
    # flatten of the (B, C_last, 1) CNN output.
    # TODO(synk): if window_size changes so the CNN output length > 1, a true
    # multi-timestep LSTM (with W_hh and the f-gate) would be required.

    # ---- 3-layer bidirectional LSTM, single timestep, zero (h0, c0) --------
    for layer in range(lstm_layers):
        w_ref, b_ref = lstm_refs[2 * layer:2 * layer + 2]
        gates = mm(h, w_ref) + b_ref[...]                 # (B, 6H)
        sg = jax.nn.sigmoid(gates[:, :4 * H])             # [i_f|i_b|o_f|o_b]
        gg = jnp.tanh(gates[:, 4 * H:])                   # [g_f|g_b]
        i_g = sg[:, :2 * H]
        o_g = sg[:, 2 * H:]
        h = o_g * jnp.tanh(i_g * gg)                      # (B, 2H) = [h_f|h_b]
        # Inter-layer dropout is identity in eval mode.

    # ---- classifier head: concat(lstm, stats) split into two dots ----------
    c = mm(h, w1a) + mm(xs_ref[...], w1b) + b1[...]
    c = jnp.maximum(c * s1[...] + t1[...], 0.0)           # BN(512, eval)+ReLU
    c = mm(c, w2) + b2[...]
    c = jnp.maximum(c * s2[...] + t2[...], 0.0)           # BN(256, eval)+ReLU
    c = mm(c, w3) + b3[...]
    c = jnp.maximum(c, 0.0)                               # ReLU
    o_ref[...] = mm(c, w4) + b4[...]                      # lane-dense (B, 128)


# ----------------------------- parameters -----------------------------------
def init_params(key, num_features, window_size, stat_feature_dim, num_classes,
                cnn_channels, lstm_hidden, lstm_layers, out_pad=128):
    eps = 1e-5
    keys = iter(jax.random.split(key, 64))

    def rnd(shape, scale=0.1):
        return np.asarray(scale * jax.random.normal(next(keys), shape,
                                                    dtype=jnp.float32))

    params = {}

    # CNN blocks -> banded (L*Cin, (L/2)*Cout) matrices for even/odd pooled
    # positions; BN + conv bias folded into a tiled per-lane affine.
    ksizes = (7, 5, 5, 3)
    pads = (3, 2, 2, 1)
    chans = [num_features] + list(cnn_channels)
    L = window_size
    cnn = []
    for i in range(len(cnn_channels)):
        cin, cout, K, P = chans[i], chans[i + 1], ksizes[i], pads[i]
        w = rnd((K, cin, cout))                # conv weight, (K, Cin, Cout)
        b_conv = rnd((cout,))
        gamma = 1.0 + rnd((cout,))
        beta = rnd((cout,))
        r_mean = rnd((cout,))
        r_var = 1.0 + np.abs(rnd((cout,)))

        Lp = L // 2
        a_even = np.zeros((L * cin, Lp * cout), np.float32)
        a_odd = np.zeros((L * cin, Lp * cout), np.float32)
        for p_out in range(Lp):
            for parity, A in ((0, a_even), (1, a_odd)):
                t = 2 * p_out + parity                    # conv output pos
                for k in range(K):
                    l_in = t + k - P                      # input position
                    if 0 <= l_in < L:                     # 'same' zero-pad
                        A[l_in * cin:(l_in + 1) * cin,
                          p_out * cout:(p_out + 1) * cout] = w[k]

        scale = gamma / np.sqrt(r_var + eps)
        shift = beta - r_mean * scale + b_conv * scale
        sc_t = np.tile(scale, Lp)[None, :]                # (1, Lp*Cout)
        sh_t = np.tile(shift, Lp)[None, :]
        cnn.append((jnp.asarray(a_even, jnp.bfloat16),
                    jnp.asarray(a_odd, jnp.bfloat16),
                    jnp.asarray(sc_t, jnp.float32),
                    jnp.asarray(sh_t, jnp.float32)))
        L = Lp
    params["cnn"] = cnn
    params["cnn_len"] = L                                  # must be 1

    # LSTM: per layer, fused (D_in, 6H) weight with columns
    # [i_fwd | i_bwd | o_fwd | o_bwd | g_fwd | g_bwd]; f-gate and W_hh dropped
    # (dead because seq_len == 1 and (h0, c0) == 0).  Bias = b_ih + b_hh.
    H = lstm_hidden
    d_in0 = cnn_channels[-1] * L
    lstm = []
    for layer in range(lstm_layers):
        din = d_in0 if layer == 0 else 2 * H
        w = rnd((din, 6 * H))
        b = rnd((1, 6 * H))
        lstm.append((jnp.asarray(w, jnp.bfloat16), jnp.asarray(b, jnp.float32)))
    params["lstm"] = lstm

    # Classifier: first Linear split into lstm-part and stats-part; final
    # Linear padded to out_pad lanes (zeros beyond num_classes).
    w1a = rnd((2 * H, 512))
    w1b = rnd((stat_feature_dim, 512))
    b1 = rnd((1, 512))
    gamma = 1.0 + rnd((512,)); beta = rnd((512,))
    r_mean = rnd((512,)); r_var = 1.0 + np.abs(rnd((512,)))
    s1 = gamma / np.sqrt(r_var + eps); t1 = beta - r_mean * s1

    w2 = rnd((512, 256)); b2 = rnd((1, 256))
    gamma = 1.0 + rnd((256,)); beta = rnd((256,))
    r_mean = rnd((256,)); r_var = 1.0 + np.abs(rnd((256,)))
    s2 = gamma / np.sqrt(r_var + eps); t2 = beta - r_mean * s2

    w3 = rnd((256, 128)); b3 = rnd((1, 128))
    w4 = np.zeros((128, out_pad), np.float32)
    w4[:, :num_classes] = rnd((128, num_classes))
    b4 = np.zeros((1, out_pad), np.float32)
    b4[:, :num_classes] = rnd((1, num_classes))

    params["clf"] = [
        jnp.asarray(w1a, jnp.bfloat16), jnp.asarray(w1b, jnp.bfloat16),
        jnp.asarray(b1, jnp.float32),
        jnp.asarray(s1[None, :], jnp.float32), jnp.asarray(t1[None, :], jnp.float32),
        jnp.asarray(w2, jnp.bfloat16), jnp.asarray(b2, jnp.float32),
        jnp.asarray(s2[None, :], jnp.float32), jnp.asarray(t2[None, :], jnp.float32),
        jnp.asarray(w3, jnp.bfloat16), jnp.asarray(b3, jnp.float32),
        jnp.asarray(w4, jnp.bfloat16), jnp.asarray(b4, jnp.float32),
    ]
    params["num_classes"] = num_classes
    params["out_pad"] = out_pad
    return params


# ----------------------------- forward wrapper -------------------------------
def forward(params, x_windows, x_stats, *, lstm_hidden, lstm_layers,
            batch_tile=128):
    B, W, F = x_windows.shape
    assert params["cnn_len"] == 1, (
        "kernel assumes the CNN output has seq_len == 1 (window_size == 16)")
    out_pad = params["out_pad"]
    nc = params["num_classes"]

    # Flatten the window input to (B, W*F) (position-major) to match the
    # banded conv matrices; done once in the wrapper, not inside the kernel.
    xw = x_windows.reshape(B, W * F)

    # Pad batch to a sublane-friendly multiple (bf16 packs 16 rows per vreg)
    # and tile it across the grid for large batches.
    SUB = 16
    b_pad = ((B + SUB - 1) // SUB) * SUB
    tile = min(b_pad, batch_tile)
    b_pad = ((b_pad + tile - 1) // tile) * tile
    if b_pad != B:
        xw = jnp.pad(xw, ((0, b_pad - B), (0, 0)))
        xs = jnp.pad(x_stats, ((0, b_pad - B), (0, 0)))
    else:
        xs = x_stats
    grid = (b_pad // tile,)

    args = [xw, xs]
    for t4 in params["cnn"]:
        args += list(t4)
    for t2 in params["lstm"]:
        args += list(t2)
    args += list(params["clf"])

    def batched_spec(a):
        return pl.BlockSpec((tile, a.shape[1]), lambda i: (i, 0))

    def const_spec(a):
        nd = a.ndim
        # Full-array block, constant index_map -> weight DMA'd once, resident.
        return pl.BlockSpec(a.shape, lambda i: (0,) * nd)

    in_specs = ([batched_spec(xw), batched_spec(xs)]
                + [const_spec(a) for a in args[2:]])

    kernel = functools.partial(
        fused_forward_kernel,
        num_cnn=len(params["cnn"]), lstm_layers=lstm_layers,
        hidden=lstm_hidden)

    out = pl.pallas_call(
        kernel,
        out_shape=jax.ShapeDtypeStruct((b_pad, out_pad), jnp.float32),
        grid=grid,
        in_specs=in_specs,
        out_specs=pl.BlockSpec((tile, out_pad), lambda i: (i, 0)),
        compiler_params=pltpu.CompilerParams(
            dimension_semantics=("parallel",),
            vmem_limit_bytes=32 * 1024 * 1024),
    )(*args)
    return out[:B, :nc]


if __name__ == "__main__":
    # Small, module-consistent configuration (seq_len after CNN == 1).
    B = 2
    num_features = 4
    window_size = 16
    stat_feature_dim = 8
    num_classes = 5
    cnn_channels = [16, 32, 64, 128]
    lstm_hidden = 128
    lstm_layers = 3

    key = jax.random.PRNGKey(0)
    kx, ks, kp = jax.random.split(key, 3)
    x_windows = jax.random.normal(kx, (B, window_size, num_features),
                                  jnp.float32)
    x_stats = jax.random.normal(ks, (B, stat_feature_dim), jnp.float32)

    params = init_params(kp, num_features, window_size, stat_feature_dim,
                         num_classes, cnn_channels, lstm_hidden, lstm_layers)

    out = forward(params, x_windows, x_stats,
                  lstm_hidden=lstm_hidden, lstm_layers=lstm_layers)
    out = jax.block_until_ready(out)
    assert out.shape == (B, num_classes), out.shape
    assert bool(jnp.all(jnp.isfinite(out)))
    print("KERNEL_OK")
</pallas_src>

<mosaic_0001>
module attributes {stable_mosaic.version = 11 : i64} {
  func.func @fused_forward_kernel(%arg0: i32, %arg1: memref<16x64xf32, #tpu.memory_space<vmem>>, %arg2: memref<16x8xf32, #tpu.memory_space<vmem>>, %arg3: memref<64x128xbf16, #tpu.memory_space<vmem>>, %arg4: memref<64x128xbf16, #tpu.memory_space<vmem>>, %arg5: memref<1x128xf32, #tpu.memory_space<vmem>>, %arg6: memref<1x128xf32, #tpu.memory_space<vmem>>, %arg7: memref<128x128xbf16, #tpu.memory_space<vmem>>, %arg8: memref<128x128xbf16, #tpu.memory_space<vmem>>, %arg9: memref<1x128xf32, #tpu.memory_space<vmem>>, %arg10: memref<1x128xf32, #tpu.memory_space<vmem>>, %arg11: memref<128x128xbf16, #tpu.memory_space<vmem>>, %arg12: memref<128x128xbf16, #tpu.memory_space<vmem>>, %arg13: memref<1x128xf32, #tpu.memory_space<vmem>>, %arg14: memref<1x128xf32, #tpu.memory_space<vmem>>, %arg15: memref<128x128xbf16, #tpu.memory_space<vmem>>, %arg16: memref<128x128xbf16, #tpu.memory_space<vmem>>, %arg17: memref<1x128xf32, #tpu.memory_space<vmem>>, %arg18: memref<1x128xf32, #tpu.memory_space<vmem>>, %arg19: memref<128x768xbf16, #tpu.memory_space<vmem>>, %arg20: memref<1x768xf32, #tpu.memory_space<vmem>>, %arg21: memref<256x768xbf16, #tpu.memory_space<vmem>>, %arg22: memref<1x768xf32, #tpu.memory_space<vmem>>, %arg23: memref<256x768xbf16, #tpu.memory_space<vmem>>, %arg24: memref<1x768xf32, #tpu.memory_space<vmem>>, %arg25: memref<256x512xbf16, #tpu.memory_space<vmem>>, %arg26: memref<8x512xbf16, #tpu.memory_space<vmem>>, %arg27: memref<1x512xf32, #tpu.memory_space<vmem>>, %arg28: memref<1x512xf32, #tpu.memory_space<vmem>>, %arg29: memref<1x512xf32, #tpu.memory_space<vmem>>, %arg30: memref<512x256xbf16, #tpu.memory_space<vmem>>, %arg31: memref<1x256xf32, #tpu.memory_space<vmem>>, %arg32: memref<1x256xf32, #tpu.memory_space<vmem>>, %arg33: memref<1x256xf32, #tpu.memory_space<vmem>>, %arg34: memref<256x128xbf16, #tpu.memory_space<vmem>>, %arg35: memref<1x128xf32, #tpu.memory_space<vmem>>, %arg36: memref<128x128xbf16, #tpu.memory_space<vmem>>, %arg37: memref<1x128xf32, #tpu.memory_space<vmem>>, %arg38: memref<16x128xf32, #tpu.memory_space<vmem>>) attributes {dimension_semantics = [#tpu.dimension_semantics<parallel>], iteration_bounds = array<i64: 1>, scalar_prefetch = 0 : i64, scratch_operands = 0 : i64, tpu.core_type = #tpu.core_type<tc>, window_params = [{transform_indices = @transform_0, window_bounds = array<i64: 16, 64>}, {transform_indices = @transform_1, window_bounds = array<i64: 16, 8>}, {pipeline_mode = #tpu.pipeline_mode<synchronous>, transform_indices = @transform_2, window_bounds = array<i64: 64, 128>}, {pipeline_mode = #tpu.pipeline_mode<synchronous>, transform_indices = @transform_3, window_bounds = array<i64: 64, 128>}, {pipeline_mode = #tpu.pipeline_mode<synchronous>, transform_indices = @transform_4, window_bounds = array<i64: 1, 128>}, {pipeline_mode = #tpu.pipeline_mode<synchronous>, transform_indices = @transform_5, window_bounds = array<i64: 1, 128>}, {pipeline_mode = #tpu.pipeline_mode<synchronous>, transform_indices = @transform_6, window_bounds = array<i64: 128, 128>}, {pipeline_mode = #tpu.pipeline_mode<synchronous>, transform_indices = @transform_7, window_bounds = array<i64: 128, 128>}, {pipeline_mode = #tpu.pipeline_mode<synchronous>, transform_indices = @transform_8, window_bounds = array<i64: 1, 128>}, {pipeline_mode = #tpu.pipeline_mode<synchronous>, transform_indices = @transform_9, window_bounds = array<i64: 1, 128>}, {pipeline_mode = #tpu.pipeline_mode<synchronous>, transform_indices = @transform_10, window_bounds = array<i64: 128, 128>}, {pipeline_mode = #tpu.pipeline_mode<synchronous>, transform_indices = @transform_11, window_bounds = array<i64: 128, 128>}, {pipeline_mode = #tpu.pipeline_mode<synchronous>, transform_indices = @transform_12, window_bounds = array<i64: 1, 128>}, {pipeline_mode = #tpu.pipeline_mode<synchronous>, transform_indices = @transform_13, window_bounds = array<i64: 1, 128>}, {pipeline_mode = #tpu.pipeline_mode<synchronous>, transform_indices = @transform_14, window_bounds = array<i64: 128, 128>}, {pipeline_mode = #tpu.pipeline_mode<synchronous>, transform_indices = @transform_15, window_bounds = array<i64: 128, 128>}, {pipeline_mode = #tpu.pipeline_mode<synchronous>, transform_indices = @transform_16, window_bounds = array<i64: 1, 128>}, {pipeline_mode = #tpu.pipeline_mode<synchronous>, transform_indices = @transform_17, window_bounds = array<i64: 1, 128>}, {pipeline_mode = #tpu.pipeline_mode<synchronous>, transform_indices = @transform_18, window_bounds = array<i64: 128, 768>}, {pipeline_mode = #tpu.pipeline_mode<synchronous>, transform_indices = @transform_19, window_bounds = array<i64: 1, 768>}, {pipeline_mode = #tpu.pipeline_mode<synchronous>, transform_indices = @transform_20, window_bounds = array<i64: 256, 768>}, {pipeline_mode = #tpu.pipeline_mode<synchronous>, transform_indices = @transform_21, window_bounds = array<i64: 1, 768>}, {pipeline_mode = #tpu.pipeline_mode<synchronous>, transform_indices = @transform_22, window_bounds = array<i64: 256, 768>}, {pipeline_mode = #tpu.pipeline_mode<synchronous>, transform_indices = @transform_23, window_bounds = array<i64: 1, 768>}, {pipeline_mode = #tpu.pipeline_mode<synchronous>, transform_indices = @transform_24, window_bounds = array<i64: 256, 512>}, {pipeline_mode = #tpu.pipeline_mode<synchronous>, transform_indices = @transform_25, window_bounds = array<i64: 8, 512>}, {pipeline_mode = #tpu.pipeline_mode<synchronous>, transform_indices = @transform_26, window_bounds = array<i64: 1, 512>}, {pipeline_mode = #tpu.pipeline_mode<synchronous>, transform_indices = @transform_27, window_bounds = array<i64: 1, 512>}, {pipeline_mode = #tpu.pipeline_mode<synchronous>, transform_indices = @transform_28, window_bounds = array<i64: 1, 512>}, {pipeline_mode = #tpu.pipeline_mode<synchronous>, transform_indices = @transform_29, window_bounds = array<i64: 512, 256>}, {pipeline_mode = #tpu.pipeline_mode<synchronous>, transform_indices = @transform_30, window_bounds = array<i64: 1, 256>}, {pipeline_mode = #tpu.pipeline_mode<synchronous>, transform_indices = @transform_31, window_bounds = array<i64: 1, 256>}, {pipeline_mode = #tpu.pipeline_mode<synchronous>, transform_indices = @transform_32, window_bounds = array<i64: 1, 256>}, {pipeline_mode = #tpu.pipeline_mode<synchronous>, transform_indices = @transform_33, window_bounds = array<i64: 256, 128>}, {pipeline_mode = #tpu.pipeline_mode<synchronous>, transform_indices = @transform_34, window_bounds = array<i64: 1, 128>}, {pipeline_mode = #tpu.pipeline_mode<synchronous>, transform_indices = @transform_35, window_bounds = array<i64: 128, 128>}, {pipeline_mode = #tpu.pipeline_mode<synchronous>, transform_indices = @transform_36, window_bounds = array<i64: 1, 128>}, {transform_indices = @transform_37, window_bounds = array<i64: 16, 128>}]} {
    %c0 = arith.constant 0 : index
    %c0_0 = arith.constant 0 : index
    %0 = vector.load %arg1[%c0, %c0_0] : memref<16x64xf32, #tpu.memory_space<vmem>>, vector<16x64xf32>
    %1 = arith.truncf %0 : vector<16x64xf32> to vector<16x64xbf16>
    %c0_1 = arith.constant 0 : index
    %c0_2 = arith.constant 0 : index
    %2 = vector.load %arg3[%c0_1, %c0_2] : memref<64x128xbf16, #tpu.memory_space<vmem>>, vector<64x128xbf16>
    %cst = arith.constant dense<0.000000e+00> : vector<16x128xf32>
    %3 = tpu.matmul %1, %2, %cst {dimension_numbers = #tpu.dot_dimension_numbers<[1], [0], [0], [1], [0, 0, 1, 1], [], []>} : vector<16x64xbf16>, vector<64x128xbf16>, vector<16x128xf32> -> vector<16x128xf32>
    %c0_3 = arith.constant 0 : index
    %c0_4 = arith.constant 0 : index
    %4 = vector.load %arg5[%c0_3, %c0_4] : memref<1x128xf32, #tpu.memory_space<vmem>>, vector<1x128xf32>
    %5 = vector.broadcast %4 : vector<1x128xf32> to vector<16x128xf32>
    %6 = arith.mulf %3, %5 : vector<16x128xf32>
    %c0_5 = arith.constant 0 : index
    %c0_6 = arith.constant 0 : index
    %7 = vector.load %arg6[%c0_5, %c0_6] : memref<1x128xf32, #tpu.memory_space<vmem>>, vector<1x128xf32>
    %8 = vector.broadcast %7 : vector<1x128xf32> to vector<16x128xf32>
    %9 = arith.addf %6, %8 : vector<16x128xf32>
    %10 = arith.truncf %0 : vector<16x64xf32> to vector<16x64xbf16>
    %c0_7 = arith.constant 0 : index
    %c0_8 = arith.constant 0 : index
    %11 = vector.load %arg4[%c0_7, %c0_8] : memref<64x128xbf16, #tpu.memory_space<vmem>>, vector<64x128xbf16>
    %cst_9 = arith.constant dense<0.000000e+00> : vector<16x128xf32>
    %12 = tpu.matmul %10, %11, %cst_9 {dimension_numbers = #tpu.dot_dimension_numbers<[1], [0], [0], [1], [0, 0, 1, 1], [], []>} : vector<16x64xbf16>, vector<64x128xbf16>, vector<16x128xf32> -> vector<16x128xf32>
    %c0_10 = arith.constant 0 : index
    %c0_11 = arith.constant 0 : index
    %13 = vector.load %arg5[%c0_10, %c0_11] : memref<1x128xf32, #tpu.memory_space<vmem>>, vector<1x128xf32>
    %14 = vector.broadcast %13 : vector<1x128xf32> to vector<16x128xf32>
    %15 = arith.mulf %12, %14 : vector<16x128xf32>
    %c0_12 = arith.constant 0 : index
    %c0_13 = arith.constant 0 : index
    %16 = vector.load %arg6[%c0_12, %c0_13] : memref<1x128xf32, #tpu.memory_space<vmem>>, vector<1x128xf32>
    %17 = vector.broadcast %16 : vector<1x128xf32> to vector<16x128xf32>
    %18 = arith.addf %15, %17 : vector<16x128xf32>
    %19 = arith.maximumf %9, %18 : vector<16x128xf32>
    %cst_14 = arith.constant 0.000000e+00 : f32
    %20 = vector.broadcast %cst_14 : f32 to vector<16x128xf32>
    %21 = arith.maximumf %19, %20 : vector<16x128xf32>
    %22 = arith.truncf %21 : vector<16x128xf32> to vector<16x128xbf16>
    %c0_15 = arith.constant 0 : index
    %c0_16 = arith.constant 0 : index
    %23 = vector.load %arg7[%c0_15, %c0_16] : memref<128x128xbf16, #tpu.memory_space<vmem>>, vector<128x128xbf16>
    %cst_17 = arith.constant dense<0.000000e+00> : vector<16x128xf32>
    %24 = tpu.matmul %22, %23, %cst_17 {dimension_numbers = #tpu.dot_dimension_numbers<[1], [0], [0], [1], [0, 0, 1, 1], [], []>} : vector<16x128xbf16>, vector<128x128xbf16>, vector<16x128xf32> -> vector<16x128xf32>
    %c0_18 = arith.constant 0 : index
    %c0_19 = arith.constant 0 : index
    %25 = vector.load %arg9[%c0_18, %c0_19] : memref<1x128xf32, #tpu.memory_space<vmem>>, vector<1x128xf32>
    %26 = vector.broadcast %25 : vector<1x128xf32> to vector<16x128xf32>
    %27 = arith.mulf %24, %26 : vector<16x128xf32>
    %c0_20 = arith.constant 0 : index
    %c0_21 = arith.constant 0 : index
    %28 = vector.load %arg10[%c0_20, %c0_21] : memref<1x128xf32, #tpu.memory_space<vmem>>, vector<1x128xf32>
    %29 = vector.broadcast %28 : vector<1x128xf32> to vector<16x128xf32>
    %30 = arith.addf %27, %29 : vector<16x128xf32>
    %31 = arith.truncf %21 : vector<16x128xf32> to vector<16x128xbf16>
    %c0_22 = arith.constant 0 : index
    %c0_23 = arith.constant 0 : index
    %32 = vector.load %arg8[%c0_22, %c0_23] : memref<128x128xbf16, #tpu.memory_space<vmem>>, vector<128x128xbf16>
    %cst_24 = arith.constant dense<0.000000e+00> : vector<16x128xf32>
    %33 = tpu.matmul %31, %32, %cst_24 {dimension_numbers = #tpu.dot_dimension_numbers<[1], [0], [0], [1], [0, 0, 1, 1], [], []>} : vector<16x128xbf16>, vector<128x128xbf16>, vector<16x128xf32> -> vector<16x128xf32>
    %c0_25 = arith.constant 0 : index
    %c0_26 = arith.constant 0 : index
    %34 = vector.load %arg9[%c0_25, %c0_26] : memref<1x128xf32, #tpu.memory_space<vmem>>, vector<1x128xf32>
    %35 = vector.broadcast %34 : vector<1x128xf32> to vector<16x128xf32>
    %36 = arith.mulf %33, %35 : vector<16x128xf32>
    %c0_27 = arith.constant 0 : index
    %c0_28 = arith.constant 0 : index
    %37 = vector.load %arg10[%c0_27, %c0_28] : memref<1x128xf32, #tpu.memory_space<vmem>>, vector<1x128xf32>
    %38 = vector.broadcast %37 : vector<1x128xf32> to vector<16x128xf32>
    %39 = arith.addf %36, %38 : vector<16x128xf32>
    %40 = arith.maximumf %30, %39 : vector<16x128xf32>
    %cst_29 = arith.constant 0.000000e+00 : f32
    %41 = vector.broadcast %cst_29 : f32 to vector<16x128xf32>
    %42 = arith.maximumf %40, %41 : vector<16x128xf32>
    %43 = arith.truncf %42 : vector<16x128xf32> to vector<16x128xbf16>
    %c0_30 = arith.constant 0 : index
    %c0_31 = arith.constant 0 : index
    %44 = vector.load %arg11[%c0_30, %c0_31] : memref<128x128xbf16, #tpu.memory_space<vmem>>, vector<128x128xbf16>
    %cst_32 = arith.constant dense<0.000000e+00> : vector<16x128xf32>
    %45 = tpu.matmul %43, %44, %cst_32 {dimension_numbers = #tpu.dot_dimension_numbers<[1], [0], [0], [1], [0, 0, 1, 1], [], []>} : vector<16x128xbf16>, vector<128x128xbf16>, vector<16x128xf32> -> vector<16x128xf32>
    %c0_33 = arith.constant 0 : index
    %c0_34 = arith.constant 0 : index
    %46 = vector.load %arg13[%c0_33, %c0_34] : memref<1x128xf32, #tpu.memory_space<vmem>>, vector<1x128xf32>
    %47 = vector.broadcast %46 : vector<1x128xf32> to vector<16x128xf32>
    %48 = arith.mulf %45, %47 : vector<16x128xf32>
    %c0_35 = arith.constant 0 : index
    %c0_36 = arith.constant 0 : index
    %49 = vector.load %arg14[%c0_35, %c0_36] : memref<1x128xf32, #tpu.memory_space<vmem>>, vector<1x128xf32>
    %50 = vector.broadcast %49 : vector<1x128xf32> to vector<16x128xf32>
    %51 = arith.addf %48, %50 : vector<16x128xf32>
    %52 = arith.truncf %42 : vector<16x128xf32> to vector<16x128xbf16>
    %c0_37 = arith.constant 0 : index
    %c0_38 = arith.constant 0 : index
    %53 = vector.load %arg12[%c0_37, %c0_38] : memref<128x128xbf16, #tpu.memory_space<vmem>>, vector<128x128xbf16>
    %cst_39 = arith.constant dense<0.000000e+00> : vector<16x128xf32>
    %54 = tpu.matmul %52, %53, %cst_39 {dimension_numbers = #tpu.dot_dimension_numbers<[1], [0], [0], [1], [0, 0, 1, 1], [], []>} : vector<16x128xbf16>, vector<128x128xbf16>, vector<16x128xf32> -> vector<16x128xf32>
    %c0_40 = arith.constant 0 : index
    %c0_41 = arith.constant 0 : index
    %55 = vector.load %arg13[%c0_40, %c0_41] : memref<1x128xf32, #tpu.memory_space<vmem>>, vector<1x128xf32>
    %56 = vector.broadcast %55 : vector<1x128xf32> to vector<16x128xf32>
    %57 = arith.mulf %54, %56 : vector<16x128xf32>
    %c0_42 = arith.constant 0 : index
    %c0_43 = arith.constant 0 : index
    %58 = vector.load %arg14[%c0_42, %c0_43] : memref<1x128xf32, #tpu.memory_space<vmem>>, vector<1x128xf32>
    %59 = vector.broadcast %58 : vector<1x128xf32> to vector<16x128xf32>
    %60 = arith.addf %57, %59 : vector<16x128xf32>
    %61 = arith.maximumf %51, %60 : vector<16x128xf32>
    %cst_44 = arith.constant 0.000000e+00 : f32
    %62 = vector.broadcast %cst_44 : f32 to vector<16x128xf32>
    %63 = arith.maximumf %61, %62 : vector<16x128xf32>
    %64 = arith.truncf %63 : vector<16x128xf32> to vector<16x128xbf16>
    %c0_45 = arith.constant 0 : index
    %c0_46 = arith.constant 0 : index
    %65 = vector.load %arg15[%c0_45, %c0_46] : memref<128x128xbf16, #tpu.memory_space<vmem>>, vector<128x128xbf16>
    %cst_47 = arith.constant dense<0.000000e+00> : vector<16x128xf32>
    %66 = tpu.matmul %64, %65, %cst_47 {dimension_numbers = #tpu.dot_dimension_numbers<[1], [0], [0], [1], [0, 0, 1, 1], [], []>} : vector<16x128xbf16>, vector<128x128xbf16>, vector<16x128xf32> -> vector<16x128xf32>
    %c0_48 = arith.constant 0 : index
    %c0_49 = arith.constant 0 : index
    %67 = vector.load %arg17[%c0_48, %c0_49] : memref<1x128xf32, #tpu.memory_space<vmem>>, vector<1x128xf32>
    %68 = vector.broadcast %67 : vector<1x128xf32> to vector<16x128xf32>
    %69 = arith.mulf %66, %68 : vector<16x128xf32>
    %c0_50 = arith.constant 0 : index
    %c0_51 = arith.constant 0 : index
    %70 = vector.load %arg18[%c0_50, %c0_51] : memref<1x128xf32, #tpu.memory_space<vmem>>, vector<1x128xf32>
    %71 = vector.broadcast %70 : vector<1x128xf32> to vector<16x128xf32>
    %72 = arith.addf %69, %71 : vector<16x128xf32>
    %73 = arith.truncf %63 : vector<16x128xf32> to vector<16x128xbf16>
    %c0_52 = arith.constant 0 : index
    %c0_53 = arith.constant 0 : index
    %74 = vector.load %arg16[%c0_52, %c0_53] : memref<128x128xbf16, #tpu.memory_space<vmem>>, vector<128x128xbf16>
    %cst_54 = arith.constant dense<0.000000e+00> : vector<16x128xf32>
    %75 = tpu.matmul %73, %74, %cst_54 {dimension_numbers = #tpu.dot_dimension_numbers<[1], [0], [0], [1], [0, 0, 1, 1], [], []>} : vector<16x128xbf16>, vector<128x128xbf16>, vector<16x128xf32> -> vector<16x128xf32>
    %c0_55 = arith.constant 0 : index
    %c0_56 = arith.constant 0 : index
    %76 = vector.load %arg17[%c0_55, %c0_56] : memref<1x128xf32, #tpu.memory_space<vmem>>, vector<1x128xf32>
    %77 = vector.broadcast %76 : vector<1x128xf32> to vector<16x128xf32>
    %78 = arith.mulf %75, %77 : vector<16x128xf32>
    %c0_57 = arith.constant 0 : index
    %c0_58 = arith.constant 0 : index
    %79 = vector.load %arg18[%c0_57, %c0_58] : memref<1x128xf32, #tpu.memory_space<vmem>>, vector<1x128xf32>
    %80 = vector.broadcast %79 : vector<1x128xf32> to vector<16x128xf32>
    %81 = arith.addf %78, %80 : vector<16x128xf32>
    %82 = arith.maximumf %72, %81 : vector<16x128xf32>
    %cst_59 = arith.constant 0.000000e+00 : f32
    %83 = vector.broadcast %cst_59 : f32 to vector<16x128xf32>
    %84 = arith.maximumf %82, %83 : vector<16x128xf32>
    %85 = arith.truncf %84 : vector<16x128xf32> to vector<16x128xbf16>
    %c0_60 = arith.constant 0 : index
    %c0_61 = arith.constant 0 : index
    %86 = vector.load %arg19[%c0_60, %c0_61] : memref<128x768xbf16, #tpu.memory_space<vmem>>, vector<128x768xbf16>
    %cst_62 = arith.constant dense<0.000000e+00> : vector<16x768xf32>
    %87 = tpu.matmul %85, %86, %cst_62 {dimension_numbers = #tpu.dot_dimension_numbers<[1], [0], [0], [1], [0, 0, 1, 1], [], []>} : vector<16x128xbf16>, vector<128x768xbf16>, vector<16x768xf32> -> vector<16x768xf32>
    %c0_63 = arith.constant 0 : index
    %c0_64 = arith.constant 0 : index
    %88 = vector.load %arg20[%c0_63, %c0_64] : memref<1x768xf32, #tpu.memory_space<vmem>>, vector<1x768xf32>
    %89 = vector.broadcast %88 : vector<1x768xf32> to vector<16x768xf32>
    %90 = arith.addf %87, %89 : vector<16x768xf32>
    %91 = vector.extract_strided_slice %90 {offsets = [0, 0], sizes = [16, 512], strides = [1, 1]} : vector<16x768xf32> to vector<16x512xf32>
    %92 = arith.negf %91 : vector<16x512xf32>
    %93 = math.exp %92 : vector<16x512xf32>
    %cst_65 = arith.constant 1.000000e+00 : f32
    %94 = vector.broadcast %cst_65 : f32 to vector<16x512xf32>
    %95 = arith.addf %94, %93 : vector<16x512xf32>
    %96 = arith.divf %94, %95 : vector<16x512xf32>
    %97 = vector.extract_strided_slice %90 {offsets = [0, 512], sizes = [16, 256], strides = [1, 1]} : vector<16x768xf32> to vector<16x256xf32>
    %98 = math.tanh %97 : vector<16x256xf32>
    %99 = vector.extract_strided_slice %96 {offsets = [0, 0], sizes = [16, 256], strides = [1, 1]} : vector<16x512xf32> to vector<16x256xf32>
    %100 = vector.extract_strided_slice %96 {offsets = [0, 256], sizes = [16, 256], strides = [1, 1]} : vector<16x512xf32> to vector<16x256xf32>
    %101 = arith.mulf %99, %98 : vector<16x256xf32>
    %102 = math.tanh %101 : vector<16x256xf32>
    %103 = arith.mulf %100, %102 : vector<16x256xf32>
    %104 = arith.truncf %103 : vector<16x256xf32> to vector<16x256xbf16>
    %c0_66 = arith.constant 0 : index
    %c0_67 = arith.constant 0 : index
    %105 = vector.load %arg21[%c0_66, %c0_67] : memref<256x768xbf16, #tpu.memory_space<vmem>>, vector<256x768xbf16>
    %cst_68 = arith.constant dense<0.000000e+00> : vector<16x768xf32>
    %106 = tpu.matmul %104, %105, %cst_68 {dimension_numbers = #tpu.dot_dimension_numbers<[1], [0], [0], [1], [0, 0, 1, 1], [], []>} : vector<16x256xbf16>, vector<256x768xbf16>, vector<16x768xf32> -> vector<16x768xf32>
    %c0_69 = arith.constant 0 : index
    %c0_70 = arith.constant 0 : index
    %107 = vector.load %arg22[%c0_69, %c0_70] : memref<1x768xf32, #tpu.memory_space<vmem>>, vector<1x768xf32>
    %108 = vector.broadcast %107 : vector<1x768xf32> to vector<16x768xf32>
    %109 = arith.addf %106, %108 : vector<16x768xf32>
    %110 = vector.extract_strided_slice %109 {offsets = [0, 0], sizes = [16, 512], strides = [1, 1]} : vector<16x768xf32> to vector<16x512xf32>
    %111 = arith.negf %110 : vector<16x512xf32>
    %112 = math.exp %111 : vector<16x512xf32>
    %cst_71 = arith.constant 1.000000e+00 : f32
    %113 = vector.broadcast %cst_71 : f32 to vector<16x512xf32>
    %114 = arith.addf %113, %112 : vector<16x512xf32>
    %115 = arith.divf %113, %114 : vector<16x512xf32>
    %116 = vector.extract_strided_slice %109 {offsets = [0, 512], sizes = [16, 256], strides = [1, 1]} : vector<16x768xf32> to vector<16x256xf32>
    %117 = math.tanh %116 : vector<16x256xf32>
    %118 = vector.extract_strided_slice %115 {offsets = [0, 0], sizes = [16, 256], strides = [1, 1]} : vector<16x512xf32> to vector<16x256xf32>
    %119 = vector.extract_strided_slice %115 {offsets = [0, 256], sizes = [16, 256], strides = [1, 1]} : vector<16x512xf32> to vector<16x256xf32>
    %120 = arith.mulf %118, %117 : vector<16x256xf32>
    %121 = math.tanh %120 : vector<16x256xf32>
    %122 = arith.mulf %119, %121 : vector<16x256xf32>
    %123 = arith.truncf %122 : vector<16x256xf32> to vector<16x256xbf16>
    %c0_72 = arith.constant 0 : index
    %c0_73 = arith.constant 0 : index
    %124 = vector.load %arg23[%c0_72, %c0_73] : memref<256x768xbf16, #tpu.memory_space<vmem>>, vector<256x768xbf16>
    %cst_74 = arith.constant dense<0.000000e+00> : vector<16x768xf32>
    %125 = tpu.matmul %123, %124, %cst_74 {dimension_numbers = #tpu.dot_dimension_numbers<[1], [0], [0], [1], [0, 0, 1, 1], [], []>} : vector<16x256xbf16>, vector<256x768xbf16>, vector<16x768xf32> -> vector<16x768xf32>
    %c0_75 = arith.constant 0 : index
    %c0_76 = arith.constant 0 : index
    %126 = vector.load %arg24[%c0_75, %c0_76] : memref<1x768xf32, #tpu.memory_space<vmem>>, vector<1x768xf32>
    %127 = vector.broadcast %126 : vector<1x768xf32> to vector<16x768xf32>
    %128 = arith.addf %125, %127 : vector<16x768xf32>
    %129 = vector.extract_strided_slice %128 {offsets = [0, 0], sizes = [16, 512], strides = [1, 1]} : vector<16x768xf32> to vector<16x512xf32>
    %130 = arith.negf %129 : vector<16x512xf32>
    %131 = math.exp %130 : vector<16x512xf32>
    %cst_77 = arith.constant 1.000000e+00 : f32
    %132 = vector.broadcast %cst_77 : f32 to vector<16x512xf32>
    %133 = arith.addf %132, %131 : vector<16x512xf32>
    %134 = arith.divf %132, %133 : vector<16x512xf32>
    %135 = vector.extract_strided_slice %128 {offsets = [0, 512], sizes = [16, 256], strides = [1, 1]} : vector<16x768xf32> to vector<16x256xf32>
    %136 = math.tanh %135 : vector<16x256xf32>
    %137 = vector.extract_strided_slice %134 {offsets = [0, 0], sizes = [16, 256], strides = [1, 1]} : vector<16x512xf32> to vector<16x256xf32>
    %138 = vector.extract_strided_slice %134 {offsets = [0, 256], sizes = [16, 256], strides = [1, 1]} : vector<16x512xf32> to vector<16x256xf32>
    %139 = arith.mulf %137, %136 : vector<16x256xf32>
    %140 = math.tanh %139 : vector<16x256xf32>
    %141 = arith.mulf %138, %140 : vector<16x256xf32>
    %142 = arith.truncf %141 : vector<16x256xf32> to vector<16x256xbf16>
    %c0_78 = arith.constant 0 : index
    %c0_79 = arith.constant 0 : index
    %143 = vector.load %arg25[%c0_78, %c0_79] : memref<256x512xbf16, #tpu.memory_space<vmem>>, vector<256x512xbf16>
    %cst_80 = arith.constant dense<0.000000e+00> : vector<16x512xf32>
    %144 = tpu.matmul %142, %143, %cst_80 {dimension_numbers = #tpu.dot_dimension_numbers<[1], [0], [0], [1], [0, 0, 1, 1], [], []>} : vector<16x256xbf16>, vector<256x512xbf16>, vector<16x512xf32> -> vector<16x512xf32>
    %c0_81 = arith.constant 0 : index
    %c0_82 = arith.constant 0 : index
    %145 = vector.load %arg2[%c0_81, %c0_82] : memref<16x8xf32, #tpu.memory_space<vmem>>, vector<16x8xf32>
    %146 = arith.truncf %145 : vector<16x8xf32> to vector<16x8xbf16>
    %c0_83 = arith.constant 0 : index
    %c0_84 = arith.constant 0 : index
    %147 = vector.load %arg26[%c0_83, %c0_84] : memref<8x512xbf16, #tpu.memory_space<vmem>>, vector<8x512xbf16>
    %cst_85 = arith.constant dense<0.000000e+00> : vector<16x512xf32>
    %148 = tpu.matmul %146, %147, %cst_85 {dimension_numbers = #tpu.dot_dimension_numbers<[1], [0], [0], [1], [0, 0, 1, 1], [], []>} : vector<16x8xbf16>, vector<8x512xbf16>, vector<16x512xf32> -> vector<16x512xf32>
    %149 = arith.addf %144, %148 : vector<16x512xf32>
    %c0_86 = arith.constant 0 : index
    %c0_87 = arith.constant 0 : index
    %150 = vector.load %arg27[%c0_86, %c0_87] : memref<1x512xf32, #tpu.memory_space<vmem>>, vector<1x512xf32>
    %151 = vector.broadcast %150 : vector<1x512xf32> to vector<16x512xf32>
    %152 = arith.addf %149, %151 : vector<16x512xf32>
    %c0_88 = arith.constant 0 : index
    %c0_89 = arith.constant 0 : index
    %153 = vector.load %arg28[%c0_88, %c0_89] : memref<1x512xf32, #tpu.memory_space<vmem>>, vector<1x512xf32>
    %154 = vector.broadcast %153 : vector<1x512xf32> to vector<16x512xf32>
    %155 = arith.mulf %152, %154 : vector<16x512xf32>
    %c0_90 = arith.constant 0 : index
    %c0_91 = arith.constant 0 : index
    %156 = vector.load %arg29[%c0_90, %c0_91] : memref<1x512xf32, #tpu.memory_space<vmem>>, vector<1x512xf32>
    %157 = vector.broadcast %156 : vector<1x512xf32> to vector<16x512xf32>
    %158 = arith.addf %155, %157 : vector<16x512xf32>
    %cst_92 = arith.constant 0.000000e+00 : f32
    %159 = vector.broadcast %cst_92 : f32 to vector<16x512xf32>
    %160 = arith.maximumf %158, %159 : vector<16x512xf32>
    %161 = arith.truncf %160 : vector<16x512xf32> to vector<16x512xbf16>
    %c0_93 = arith.constant 0 : index
    %c0_94 = arith.constant 0 : index
    %162 = vector.load %arg30[%c0_93, %c0_94] : memref<512x256xbf16, #tpu.memory_space<vmem>>, vector<512x256xbf16>
    %cst_95 = arith.constant dense<0.000000e+00> : vector<16x256xf32>
    %163 = tpu.matmul %161, %162, %cst_95 {dimension_numbers = #tpu.dot_dimension_numbers<[1], [0], [0], [1], [0, 0, 1, 1], [], []>} : vector<16x512xbf16>, vector<512x256xbf16>, vector<16x256xf32> -> vector<16x256xf32>
    %c0_96 = arith.constant 0 : index
    %c0_97 = arith.constant 0 : index
    %164 = vector.load %arg31[%c0_96, %c0_97] : memref<1x256xf32, #tpu.memory_space<vmem>>, vector<1x256xf32>
    %165 = vector.broadcast %164 : vector<1x256xf32> to vector<16x256xf32>
    %166 = arith.addf %163, %165 : vector<16x256xf32>
    %c0_98 = arith.constant 0 : index
    %c0_99 = arith.constant 0 : index
    %167 = vector.load %arg32[%c0_98, %c0_99] : memref<1x256xf32, #tpu.memory_space<vmem>>, vector<1x256xf32>
    %168 = vector.broadcast %167 : vector<1x256xf32> to vector<16x256xf32>
    %169 = arith.mulf %166, %168 : vector<16x256xf32>
    %c0_100 = arith.constant 0 : index
    %c0_101 = arith.constant 0 : index
    %170 = vector.load %arg33[%c0_100, %c0_101] : memref<1x256xf32, #tpu.memory_space<vmem>>, vector<1x256xf32>
    %171 = vector.broadcast %170 : vector<1x256xf32> to vector<16x256xf32>
    %172 = arith.addf %169, %171 : vector<16x256xf32>
    %cst_102 = arith.constant 0.000000e+00 : f32
    %173 = vector.broadcast %cst_102 : f32 to vector<16x256xf32>
    %174 = arith.maximumf %172, %173 : vector<16x256xf32>
    %175 = arith.truncf %174 : vector<16x256xf32> to vector<16x256xbf16>
    %c0_103 = arith.constant 0 : index
    %c0_104 = arith.constant 0 : index
    %176 = vector.load %arg34[%c0_103, %c0_104] : memref<256x128xbf16, #tpu.memory_space<vmem>>, vector<256x128xbf16>
    %cst_105 = arith.constant dense<0.000000e+00> : vector<16x128xf32>
    %177 = tpu.matmul %175, %176, %cst_105 {dimension_numbers = #tpu.dot_dimension_numbers<[1], [0], [0], [1], [0, 0, 1, 1], [], []>} : vector<16x256xbf16>, vector<256x128xbf16>, vector<16x128xf32> -> vector<16x128xf32>
    %c0_106 = arith.constant 0 : index
    %c0_107 = arith.constant 0 : index
    %178 = vector.load %arg35[%c0_106, %c0_107] : memref<1x128xf32, #tpu.memory_space<vmem>>, vector<1x128xf32>
    %179 = vector.broadcast %178 : vector<1x128xf32> to vector<16x128xf32>
    %180 = arith.addf %177, %179 : vector<16x128xf32>
    %cst_108 = arith.constant 0.000000e+00 : f32
    %181 = vector.broadcast %cst_108 : f32 to vector<16x128xf32>
    %182 = arith.maximumf %180, %181 : vector<16x128xf32>
    %183 = arith.truncf %182 : vector<16x128xf32> to vector<16x128xbf16>
    %c0_109 = arith.constant 0 : index
    %c0_110 = arith.constant 0 : index
    %184 = vector.load %arg36[%c0_109, %c0_110] : memref<128x128xbf16, #tpu.memory_space<vmem>>, vector<128x128xbf16>
    %cst_111 = arith.constant dense<0.000000e+00> : vector<16x128xf32>
    %185 = tpu.matmul %183, %184, %cst_111 {dimension_numbers = #tpu.dot_dimension_numbers<[1], [0], [0], [1], [0, 0, 1, 1], [], []>} : vector<16x128xbf16>, vector<128x128xbf16>, vector<16x128xf32> -> vector<16x128xf32>
    %c0_112 = arith.constant 0 : index
    %c0_113 = arith.constant 0 : index
    %186 = vector.load %arg37[%c0_112, %c0_113] : memref<1x128xf32, #tpu.memory_space<vmem>>, vector<1x128xf32>
    %187 = vector.broadcast %186 : vector<1x128xf32> to vector<16x128xf32>
    %188 = arith.addf %185, %187 : vector<16x128xf32>
    %c0_114 = arith.constant 0 : index
    %c0_115 = arith.constant 0 : index
    %189 = vector.load %arg38[%c0_114, %c0_115] : memref<16x128xf32, #tpu.memory_space<vmem>>, vector<16x128xf32>
    tpu.vector_store %arg38[%c0_114, %c0_115], %188 {strides = array<i32>} : memref<16x128xf32, #tpu.memory_space<vmem>>, vector<16x128xf32>,
    return
  }
  func.func @transform_0(%arg0: i32) -> (i32, i32) {
    %c0_i32 = arith.constant 0 : i32
    %c0_i32_0 = arith.constant 0 : i32
    return %arg0, %c0_i32 : i32, i32
  }
  func.func @transform_1(%arg0: i32) -> (i32, i32) {
    %c0_i32 = arith.constant 0 : i32
    %c0_i32_0 = arith.constant 0 : i32
    return %arg0, %c0_i32 : i32, i32
  }
  func.func @transform_2(%arg0: i32) -> (i32, i32) {
    %c0_i32 = arith.constant 0 : i32
    %c0_i32_0 = arith.constant 0 : i32
    %c0_i32_1 = arith.constant 0 : i32
    return %c0_i32, %c0_i32_0 : i32, i32
  }
  func.func @transform_3(%arg0: i32) -> (i32, i32) {
    %c0_i32 = arith.constant 0 : i32
    %c0_i32_0 = arith.constant 0 : i32
    %c0_i32_1 = arith.constant 0 : i32
    return %c0_i32, %c0_i32_0 : i32, i32
  }
  func.func @transform_4(%arg0: i32) -> (i32, i32) {
    %c0_i32 = arith.constant 0 : i32
    %c0_i32_0 = arith.constant 0 : i32
    %c0_i32_1 = arith.constant 0 : i32
    return %c0_i32, %c0_i32_0 : i32, i32
  }
  func.func @transform_5(%arg0: i32) -> (i32, i32) {
    %c0_i32 = arith.constant 0 : i32
    %c0_i32_0 = arith.constant 0 : i32
    %c0_i32_1 = arith.constant 0 : i32
    return %c0_i32, %c0_i32_0 : i32, i32
  }
  func.func @transform_6(%arg0: i32) -> (i32, i32) {
    %c0_i32 = arith.constant 0 : i32
    %c0_i32_0 = arith.constant 0 : i32
    %c0_i32_1 = arith.constant 0 : i32
    return %c0_i32, %c0_i32_0 : i32, i32
  }
  func.func @transform_7(%arg0: i32) -> (i32, i32) {
    %c0_i32 = arith.constant 0 : i32
    %c0_i32_0 = arith.constant 0 : i32
    %c0_i32_1 = arith.constant 0 : i32
    return %c0_i32, %c0_i32_0 : i32, i32
  }
  func.func @transform_8(%arg0: i32) -> (i32, i32) {
    %c0_i32 = arith.constant 0 : i32
    %c0_i32_0 = arith.constant 0 : i32
    %c0_i32_1 = arith.constant 0 : i32
    return %c0_i32, %c0_i32_0 : i32, i32
  }
  func.func @transform_9(%arg0: i32) -> (i32, i32) {
    %c0_i32 = arith.constant 0 : i32
    %c0_i32_0 = arith.constant 0 : i32
    %c0_i32_1 = arith.constant 0 : i32
    return %c0_i32, %c0_i32_0 : i32, i32
  }
  func.func @transform_10(%arg0: i32) -> (i32, i32) {
    %c0_i32 = arith.constant 0 : i32
    %c0_i32_0 = arith.constant 0 : i32
    %c0_i32_1 = arith.constant 0 : i32
    return %c0_i32, %c0_i32_0 : i32, i32
  }
  func.func @transform_11(%arg0: i32) -> (i32, i32) {
    %c0_i32 = arith.constant 0 : i32
    %c0_i32_0 = arith.constant 0 : i32
    %c0_i32_1 = arith.constant 0 : i32
    return %c0_i32, %c0_i32_0 : i32, i32
  }
  func.func @transform_12(%arg0: i32) -> (i32, i32) {
    %c0_i32 = arith.constant 0 : i32
    %c0_i32_0 = arith.constant 0 : i32
    %c0_i32_1 = arith.constant 0 : i32
    return %c0_i32, %c0_i32_0 : i32, i32
  }
  func.func @transform_13(%arg0: i32) -> (i32, i32) {
    %c0_i32 = arith.constant 0 : i32
    %c0_i32_0 = arith.constant 0 : i32
    %c0_i32_1 = arith.constant 0 : i32
    return %c0_i32, %c0_i32_0 : i32, i32
  }
  func.func @transform_14(%arg0: i32) -> (i32, i32) {
    %c0_i32 = arith.constant 0 : i32
    %c0_i32_0 = arith.constant 0 : i32
    %c0_i32_1 = arith.constant 0 : i32
    return %c0_i32, %c0_i32_0 : i32, i32
  }
  func.func @transform_15(%arg0: i32) -> (i32, i32) {
    %c0_i32 = arith.constant 0 : i32
    %c0_i32_0 = arith.constant 0 : i32
    %c0_i32_1 = arith.constant 0 : i32
    return %c0_i32, %c0_i32_0 : i32, i32
  }
  func.func @transform_16(%arg0: i32) -> (i32, i32) {
    %c0_i32 = arith.constant 0 : i32
    %c0_i32_0 = arith.constant 0 : i32
    %c0_i32_1 = arith.constant 0 : i32
    return %c0_i32, %c0_i32_0 : i32, i32
  }
  func.func @transform_17(%arg0: i32) -> (i32, i32) {
    %c0_i32 = arith.constant 0 : i32
    %c0_i32_0 = arith.constant 0 : i32
    %c0_i32_1 = arith.constant 0 : i32
    return %c0_i32, %c0_i32_0 : i32, i32
  }
  func.func @transform_18(%arg0: i32) -> (i32, i32) {
    %c0_i32 = arith.constant 0 : i32
    %c0_i32_0 = arith.constant 0 : i32
    %c0_i32_1 = arith.constant 0 : i32
    return %c0_i32, %c0_i32_0 : i32, i32
  }
  func.func @transform_19(%arg0: i32) -> (i32, i32) {
    %c0_i32 = arith.constant 0 : i32
    %c0_i32_0 = arith.constant 0 : i32
    %c0_i32_1 = arith.constant 0 : i32
    return %c0_i32, %c0_i32_0 : i32, i32
  }
  func.func @transform_20(%arg0: i32) -> (i32, i32) {
    %c0_i32 = arith.constant 0 : i32
    %c0_i32_0 = arith.constant 0 : i32
    %c0_i32_1 = arith.constant 0 : i32
    return %c0_i32, %c0_i32_0 : i32, i32
  }
  func.func @transform_21(%arg0: i32) -> (i32, i32) {
    %c0_i32 = arith.constant 0 : i32
    %c0_i32_0 = arith.constant 0 : i32
    %c0_i32_1 = arith.constant 0 : i32
    return %c0_i32, %c0_i32_0 : i32, i32
  }
  func.func @transform_22(%arg0: i32) -> (i32, i32) {
    %c0_i32 = arith.constant 0 : i32
    %c0_i32_0 = arith.constant 0 : i32
    %c0_i32_1 = arith.constant 0 : i32
    return %c0_i32, %c0_i32_0 : i32, i32
  }
  func.func @transform_23(%arg0: i32) -> (i32, i32) {
    %c0_i32 = arith.constant 0 : i32
    %c0_i32_0 = arith.constant 0 : i32
    %c0_i32_1 = arith.constant 0 : i32
    return %c0_i32, %c0_i32_0 : i32, i32
  }
  func.func @transform_24(%arg0: i32) -> (i32, i32) {
    %c0_i32 = arith.constant 0 : i32
    %c0_i32_0 = arith.constant 0 : i32
    %c0_i32_1 = arith.constant 0 : i32
    return %c0_i32, %c0_i32_0 : i32, i32
  }
  func.func @transform_25(%arg0: i32) -> (i32, i32) {
    %c0_i32 = arith.constant 0 : i32
    %c0_i32_0 = arith.constant 0 : i32
    %c0_i32_1 = arith.constant 0 : i32
    return %c0_i32, %c0_i32_0 : i32, i32
  }
  func.func @transform_26(%arg0: i32) -> (i32, i32) {
    %c0_i32 = arith.constant 0 : i32
    %c0_i32_0 = arith.constant 0 : i32
    %c0_i32_1 = arith.constant 0 : i32
    return %c0_i32, %c0_i32_0 : i32, i32
  }
  func.func @transform_27(%arg0: i32) -> (i32, i32) {
    %c0_i32 = arith.constant 0 : i32
    %c0_i32_0 = arith.constant 0 : i32
    %c0_i32_1 = arith.constant 0 : i32
    return %c0_i32, %c0_i32_0 : i32, i32
  }
  func.func @transform_28(%arg0: i32) -> (i32, i32) {
    %c0_i32 = arith.constant 0 : i32
    %c0_i32_0 = arith.constant 0 : i32
    %c0_i32_1 = arith.constant 0 : i32
    return %c0_i32, %c0_i32_0 : i32, i32
  }
  func.func @transform_29(%arg0: i32) -> (i32, i32) {
    %c0_i32 = arith.constant 0 : i32
    %c0_i32_0 = arith.constant 0 : i32
    %c0_i32_1 = arith.constant 0 : i32
    return %c0_i32, %c0_i32_0 : i32, i32
  }
  func.func @transform_30(%arg0: i32) -> (i32, i32) {
    %c0_i32 = arith.constant 0 : i32
    %c0_i32_0 = arith.constant 0 : i32
    %c0_i32_1 = arith.constant 0 : i32
    return %c0_i32, %c0_i32_0 : i32, i32
  }
  func.func @transform_31(%arg0: i32) -> (i32, i32) {
    %c0_i32 = arith.constant 0 : i32
    %c0_i32_0 = arith.constant 0 : i32
    %c0_i32_1 = arith.constant 0 : i32
    return %c0_i32, %c0_i32_0 : i32, i32
  }
  func.func @transform_32(%arg0: i32) -> (i32, i32) {
    %c0_i32 = arith.constant 0 : i32
    %c0_i32_0 = arith.constant 0 : i32
    %c0_i32_1 = arith.constant 0 : i32
    return %c0_i32, %c0_i32_0 : i32, i32
  }
  func.func @transform_33(%arg0: i32) -> (i32, i32) {
    %c0_i32 = arith.constant 0 : i32
    %c0_i32_0 = arith.constant 0 : i32
    %c0_i32_1 = arith.constant 0 : i32
    return %c0_i32, %c0_i32_0 : i32, i32
  }
  func.func @transform_34(%arg0: i32) -> (i32, i32) {
    %c0_i32 = arith.constant 0 : i32
    %c0_i32_0 = arith.constant 0 : i32
    %c0_i32_1 = arith.constant 0 : i32
    return %c0_i32, %c0_i32_0 : i32, i32
  }
  func.func @transform_35(%arg0: i32) -> (i32, i32) {
    %c0_i32 = arith.constant 0 : i32
    %c0_i32_0 = arith.constant 0 : i32
    %c0_i32_1 = arith.constant 0 : i32
    return %c0_i32, %c0_i32_0 : i32, i32
  }
  func.func @transform_36(%arg0: i32) -> (i32, i32) {
    %c0_i32 = arith.constant 0 : i32
    %c0_i32_0 = arith.constant 0 : i32
    %c0_i32_1 = arith.constant 0 : i32
    return %c0_i32, %c0_i32_0 : i32, i32
  }
  func.func @transform_37(%arg0: i32) -> (i32, i32) {
    %c0_i32 = arith.constant 0 : i32
    %c0_i32_0 = arith.constant 0 : i32
    return %arg0, %c0_i32 : i32, i32
  }
}

</mosaic_0001>

<bundles_post_ra>
// kernel: tpu_custom_call.1
= control target key start
LH: loop header
LB: loop body
LE: loop exit
PB: predicated region body
PF: predicated region fallthrough
CT: control target
= control target key end

     0   :  { %s7490_s6 = smov 1   ;;  %s7491_s10 = smov 2   ;;  %s8183_s0 = inlined_call_operand.smem [shape: u32[38], index: -1, kind: input, shape index: {}] }
   0x1   :  { %s7578_s5 = sld [smem:[%s8183_s0]]   ;;  %s7492_s14 = smov 3  }
   0x2   :  { %s7583_s9 = sld [smem:[%s8183_s0 + %s7490_s6]]   ;;  %s7493_s18 = smov 4  }
   0x3   :  { %s7588_s13 = sld [smem:[%s8183_s0 + %s7491_s10]]   ;;  %s7494_s22 = smov 5  }
   0x4   :  { %s7593_s17 = sld [smem:[%s8183_s0 + %s7492_s14]]   ;;  %s7495_s26 = smov 6  }
   0x5   :  { %s7598_s21 = sld [smem:[%s8183_s0 + %s7493_s18]]   ;;  %s7496_s30 = smov 7  }
   0x6   :  { %s7603_s25 = sld [smem:[%s8183_s0 + %s7494_s22]]   ;;  %s7497_s4 = smov 8  }
   0x7   :  { %8203 = sst [smem:[#allocation68_spill]] %s7578_s5  ;;  %s7498_s10 = smov 9  }
   0x8   :  { %8204 = sst [smem:[#allocation69_spill]] %s7583_s9  ;;  %s7499_s15 = smov 10  }
   0x9   :  { %8205 = sst [smem:[#allocation70_spill]] %s7588_s13  ;;  %s7500_s20 = smov 11  }
   0xa   :  { %s7608_s29 = sld [smem:[%s8183_s0 + %s7495_s26]]   ;;  %s7501_s26 = smov 12  }
   0xb   :  { %8206 = sst [smem:[#allocation71_spill]] %s7598_s21  ;;  %s7502_s1 = smov 13  }
   0xc   :  { %s7613_s3 = sld [smem:[%s8183_s0 + %s7496_s30]]   ;;  %s7503_s7 = smov 14  }
   0xd   :  { %s7618_s8 = sld [smem:[%s8183_s0 + %s7497_s4]]   ;;  %s7505_s22 = smov 16  }
   0xe   :  { %s7623_s14 = sld [smem:[%s8183_s0 + %s7498_s10]]   ;;  %s7506_s28 = smov 17  }
   0xf   :  { %s7628_s19 = sld [smem:[%s8183_s0 + %s7499_s15]]   ;;  %s7504_s15 = smov 15  }
  0x10   :  { %8207 = sst [smem:[#allocation72_spill]] %s7608_s29 }
  0x11   :  { %s7633_s24 = sld [smem:[%s8183_s0 + %s7500_s20]]  }
  0x12   :  { %s7638_s30 = sld [smem:[%s8183_s0 + %s7501_s26]]  }
  0x13   :  { %8208 = sst [smem:[#allocation73_spill]] %s7618_s8 }
  0x14   :  { %s7643_s6 = sld [smem:[%s8183_s0 + %s7502_s1]]  }
  0x15   :  { %8209 = sst [smem:[#allocation74_spill]] %s7628_s19 }
  0x16   :  { %s7648_s12 = sld [smem:[%s8183_s0 + %s7503_s7]]   ;;  %s7507_s7 = smov 18  }
  0x17   :  { %s7653_s20 = sld [smem:[%s8183_s0 + %s7504_s15]]   ;;  %s7508_s15 = smov 19  }
  0x18   :  { %8210 = sst [smem:[#allocation75_spill]] %s7638_s30 }
  0x19   :  { %s7658_s27 = sld [smem:[%s8183_s0 + %s7505_s22]]   ;;  %s7509_s22 = smov 20  }
  0x1a   :  { %s7663_s4 = sld [smem:[%s8183_s0 + %s7506_s28]]   ;;  %s7510_s28 = smov 21  }
  0x1b   :  { %s7668_s9 = sld [smem:[%s8183_s0 + %s7507_s7]]   ;;  %s7511_s7 = smov 22  }
  0x1c   :  { %8211 = sst [smem:[#allocation76_spill]] %s7648_s12 }
  0x1d   :  { %s7673_s5 = sld [smem:[%s8183_s0 + %s7508_s15]]   ;;  %s7512_s15 = smov 23  }
  0x1e   :  { %s7683_s12 = sld [smem:[%s8183_s0 + %s7510_s28]]   ;;  %s7514_s28 = smov 25  }
  0x1f   :  { %8212 = sst [smem:[#allocation77_spill]] %s7658_s27 }
  0x20   :  { %s7678_s27 = sld [smem:[%s8183_s0 + %s7509_s22]]   ;;  %s7513_s22 = smov 24  }
  0x21   :  { %8213 = sst [smem:[#allocation78_spill]] %s7668_s9 }
  0x22   :  { %s7688_s9 = sld [smem:[%s8183_s0 + %s7511_s7]]   ;;  %s7515_s7 = smov 26  }
  0x23   :  { %s7693_s30 = sld [smem:[%s8183_s0 + %s7512_s15]]   ;;  %s7516_s15 = smov 27  }
  0x24   :  { %s7703_s19 = sld [smem:[%s8183_s0 + %s7514_s28]]   ;;  %s7518_s28 = smov 29  }
  0x25   :  { %s7713_s8 = sld [smem:[%s8183_s0 + %s7516_s15]]   ;;  %s7520_s15 = smov 31  }
  0x26   :  { %8214 = sst [smem:[#allocation79_spill]] %s7678_s27 }
  0x27   :  { %s7698_s27 = sld [smem:[%s8183_s0 + %s7513_s22]]   ;;  %s7517_s22 = smov 28  }
  0x28   :  { %8215 = sst [smem:[#allocation80_spill]] %s7688_s9 }
  0x29   :  { %s7708_s9 = sld [smem:[%s8183_s0 + %s7515_s7]]   ;;  %s7519_s7 = smov 30  }
  0x2a   :  { %s7723_s29 = sld [smem:[%s8183_s0 + %s7518_s28]]   ;;  %s7522_s28 = smov 33  }
  0x2b   :  { %8218 = sst [smem:[#allocation83_spill]] %s7713_s8 }
  0x2c   :  { %s7733_s8 = sld [smem:[%s8183_s0 + %s7520_s15]]   ;;  %s7524_s15 = smov 35  }
  0x2d   :  { %8216 = sst [smem:[#allocation81_spill]] %s7698_s27 }
  0x2e   :  { %s7718_s27 = sld [smem:[%s8183_s0 + %s7517_s22]]   ;;  %s7521_s22 = smov 32  }
  0x2f   :  { %8217 = sst [smem:[#allocation82_spill]] %s7708_s9 }
  0x30   :  { %8219 = sst [smem:[#allocation84_spill]] %s7723_s29 }
  0x31   :  { %s7728_s9 = sld [smem:[%s8183_s0 + %s7519_s7]]   ;;  %s7523_s7 = smov 34  }
  0x32   :  { %8220 = sst [smem:[#allocation85_spill]] %s7733_s8 }
  0x33   :  { %s7738_s21 = sld [smem:[%s8183_s0 + %s7521_s22]]   ;;  %s7525_s22 = smov 36  }
  0x34   :  { %s7743_s29 = sld [smem:[%s8183_s0 + %s7522_s28]]   ;;  %s7526_s28 = smov 37  }
  0x35   :  { %s7748_s13 = sld [smem:[%s8183_s0 + %s7523_s7]]  }
  0x36   :  { %s7753_s8 = sld [smem:[%s8183_s0 + %s7524_s15]]  }
  0x39   :  { %8221 = sst [smem:[#allocation86_spill]] %s7738_s21 }
  0x3a   :  { %8222 = sst [smem:[#allocation87_spill]] %s7743_s29 }
  0x3b   :  { %s7758_s21 = sld [smem:[%s8183_s0 + %s7525_s22]]  }
  0x3c   :  { %s7763_s29 = sld [smem:[%s8183_s0 + %s7526_s28]]  }
  0x3d   :  { %80 = vsyncpa [#allocation3], 0 }
  0x3e   :  { %81 = vsyncpa [#allocation6], 0 }
  0x3f   :  { %82 = vsyncpa [#allocation9], 0 }
  0x40   :  { %83 = vsyncpa [#allocation12], 0 }
  0x41   :  { %84 = vsyncpa [#allocation15], 0 }
  0x42   :  { %85 = vsyncpa [#allocation18], 0 }
  0x43   :  { %86 = vsyncpa [#allocation21], 0 }
  0x44   :  { %87 = vsyncpa [#allocation24], 0 }
  0x45   :  { %88 = vsyncpa [#allocation27], 0 }
  0x46   :  { %89 = vsyncpa [#allocation30], 0 }
  0x47   :  { %90 = vsyncpa [#allocation33], 0 }
  0x48   :  { %91 = vsyncpa [#allocation36], 0 }
  0x49   :  { %92 = vsyncpa [#allocation39], 0 }
  0x4a   :  { %93 = vsyncpa [#allocation42], 0 }
  0x4b   :  { %94 = vsyncpa [#allocation45], 0 }
  0x4c   :  { %95 = vsyncpa [#allocation48], 0 }
  0x4d   :  { %96 = vsyncpa [#allocation4], 0  ;;  %s7527_s0 = smov [#allocation5]   ;;  %s7528_s10 = smov [#allocation8]  }
  0x4e   :  { %s118_s7 = sshll.u32 %s7527_s0, 4  ;;  %s141_s11 = sshll.u32 %s7528_s10, 4  ;;  %s119_s7 = int_to_ptr.vmem [resolvable:$true] %s118_s7  ;;  %s7765_s11 = int_to_ptr.vmem [resolvable:$true] %s141_s11 }
  0x4f   :  { %s6752_s15 = scalar_lea.hbm %s7593_s17, 512 }
  0x50   :  { %p6753_p0 = scmp.ne.s32.totalorder %s7593_s17, %s6752_s15  ;;  %p6756_p1 = scmp.lt.u32.totalorder %s6752_s15, %s7593_s17 }
  0x52   :  { %p6758_p2 = pnand %p6756_p1, %p6753_p0 }
  0x54   :  { %6761 = shalt.err (!%p6758_p2)
}
  0x55   :  { %s6762_s16 = scalar_lea.vmem %s119_s7, 512  ;;  %p6767_p4 = scmp.lt.s32.totalorder %s119_s7, %s119_s7 }
  0x56   :  { %p6763_p3 = scmp.ne.s32.totalorder %s119_s7, %s6762_s16  ;;  %p6768_p5 = scmp.lt.s32.totalorder %s6762_s16, %s6762_s16 }
  0x58   :  { %p6769_p6 = por %p6768_p5, %p6767_p4 }
  0x5a   :  { %p6770_p7 = pnand %p6769_p6, %p6763_p3 }
  0x5c   :  { %6773 = shalt.err (!%p6770_p7)
}
  0x5d   :  { %s7529_s18 = smov 64   ;;  %s7530_s22 = smov 4  }
  0x5e   :  { %124 = dma.hbm_to_vmem [thread:$0]  %s7593_s17, 512, %s119_s7, [#allocation6], %s7529_s18, %s7529_s18, %s7530_s22  }
  0x5f   :  { %s6774_s23 = scalar_lea.hbm %s7603_s25, 16 }
  0x60   :  { %p6775_p8 = scmp.ne.s32.totalorder %s7603_s25, %s6774_s23  ;;  %p6778_p9 = scmp.lt.u32.totalorder %s6774_s23, %s7603_s25 }
  0x62   :  { %p6780_p10 = pnand %p6778_p9, %p6775_p8 }
  0x64   :  { %6783 = shalt.err (!%p6780_p10)
}
  0x65   :  { %s6784_s26 = scalar_lea.vmem %s7765_s11, 16  ;;  %s6788_s28 = scalar_lea.vmem %s7765_s11, 32 }
  0x66   :  { %p6785_p11 = scmp.ne.s32.totalorder %s7765_s11, %s6784_s26  ;;  %p6789_p12 = scmp.lt.s32.totalorder %s7765_s11, %s7765_s11 }
  0x67   :  { %p6790_p13 = scmp.lt.s32.totalorder %s6788_s28, %s6784_s26 }
  0x69   :  { %p6791_p0 = por %p6790_p13, %p6789_p12 }
  0x6b   :  { %p6792_p1 = pnand %p6791_p0, %p6785_p11 }
  0x6d   :  { %6795 = shalt.err (!%p6792_p1)
}
  0x6e   :  { %144 = dma.hbm_to_vmem [thread:$0]  %s7603_s25, 16, %s7765_s11, [#allocation9]  }
  0x6f   :  { %s7531_s17 = smov [#allocation11]   ;;  %s7532_s2 = smov [#allocation14]  }
  0x70   :  { %s162_s1 = sshll.u32 %s7531_s17, 4  ;;  %s185_s0 = sshll.u32 %s7532_s2, 4  ;;  %s163_s1 = int_to_ptr.vmem [resolvable:$true] %s162_s1  ;;  %s186_s0 = int_to_ptr.vmem [resolvable:$true] %s185_s0 }
  0x71   :  { %s6796_s7 = scalar_lea.hbm %s7613_s3, 1024 }
  0x72   :  { %p6797_p2 = scmp.ne.s32.totalorder %s7613_s3, %s6796_s7  ;;  %p6800_p3 = scmp.lt.u32.totalorder %s6796_s7, %s7613_s3 }
  0x74   :  { %p6802_p4 = pnand %p6800_p3, %p6797_p2 }
  0x76   :  { %6805 = shalt.err (!%p6802_p4)
}
  0x77   :  { %s6806_s10 = scalar_lea.vmem %s163_s1, 1024  ;;  %p6811_p6 = scmp.lt.s32.totalorder %s163_s1, %s163_s1 }
  0x78   :  { %p6807_p5 = scmp.ne.s32.totalorder %s163_s1, %s6806_s10  ;;  %p6812_p7 = scmp.lt.s32.totalorder %s6806_s10, %s6806_s10 }
  0x7a   :  { %p6813_p8 = por %p6812_p7, %p6811_p6 }
  0x7c   :  { %p6814_p9 = pnand %p6813_p8, %p6807_p5 }
  0x7e   :  { %6817 = shalt.err (!%p6814_p9)
}
  0x7f   :  { %168 = dma.hbm_to_vmem [thread:$0]  %s7613_s3, 1024, %s163_s1, [#allocation12], %s7529_s18, %s7529_s18, %s7530_s22  }
  0x80   :  { %s6818_s25 = scalar_lea.hbm %s7623_s14, 16 }
  0x81   :  { %p6819_p10 = scmp.ne.s32.totalorder %s7623_s14, %s6818_s25  ;;  %p6822_p11 = scmp.lt.u32.totalorder %s6818_s25, %s7623_s14 }
  0x83   :  { %p6824_p12 = pnand %p6822_p11, %p6819_p10 }
  0x85   :  { %6827 = shalt.err (!%p6824_p12)
}
  0x86   :  { %s6828_s11 = scalar_lea.vmem %s186_s0, 16  ;;  %s6832_s15 = scalar_lea.vmem %s186_s0, 32 }
  0x87   :  { %p6829_p13 = scmp.ne.s32.totalorder %s186_s0, %s6828_s11  ;;  %p6833_p0 = scmp.lt.s32.totalorder %s186_s0, %s186_s0 }
  0x88   :  { %p6834_p1 = scmp.lt.s32.totalorder %s6832_s15, %s6828_s11 }
  0x8a   :  { %p6835_p2 = por %p6834_p1, %p6833_p0 }
  0x8c   :  { %p6836_p3 = pnand %p6835_p2, %p6829_p13 }
  0x8e   :  { %6839 = shalt.err (!%p6836_p3)
}
  0x8f   :  { %188 = dma.hbm_to_vmem [thread:$0]  %s7623_s14, 16, %s186_s0, [#allocation15]  }
  0x90   :  { %s7533_s16 = smov [#allocation17]   ;;  %s7534_s23 = smov [#allocation20]  }
  0x91   :  { %s206_s3 = sshll.u32 %s7533_s16, 4  ;;  %s229_s26 = sshll.u32 %s7534_s23, 4  ;;  %s207_s3 = int_to_ptr.vmem [resolvable:$true] %s206_s3  ;;  %s230_s26 = int_to_ptr.vmem [resolvable:$true] %s229_s26 }
  0x92   :  { %s6840_s28 = scalar_lea.hbm %s7633_s24, 1024 }
  0x93   :  { %p6841_p4 = scmp.ne.s32.totalorder %s7633_s24, %s6840_s28  ;;  %p6844_p5 = scmp.lt.u32.totalorder %s6840_s28, %s7633_s24 }
  0x95   :  { %p6846_p6 = pnand %p6844_p5, %p6841_p4 }
  0x97   :  { %6849 = shalt.err (!%p6846_p6)
}
  0x98   :  { %s6850_s17 = scalar_lea.vmem %s207_s3, 1024  ;;  %p6855_p8 = scmp.lt.s32.totalorder %s207_s3, %s207_s3 }
  0x99   :  { %p6851_p7 = scmp.ne.s32.totalorder %s207_s3, %s6850_s17  ;;  %p6856_p9 = scmp.lt.s32.totalorder %s6850_s17, %s6850_s17 }
  0x9b   :  { %p6857_p10 = por %p6856_p9, %p6855_p8 }
  0x9d   :  { %p6858_p11 = pnand %p6857_p10, %p6851_p7 }
  0x9f   :  { %6861 = shalt.err (!%p6858_p11)
}
  0xa0   :  { %212 = dma.hbm_to_vmem [thread:$0]  %s7633_s24, 1024, %s207_s3, [#allocation18], %s7529_s18, %s7529_s18, %s7530_s22  }
  0xa1   :  { %s6862_s14 = scalar_lea.hbm %s7643_s6, 16 }
  0xa2   :  { %p6863_p12 = scmp.ne.s32.totalorder %s7643_s6, %s6862_s14  ;;  %p6866_p13 = scmp.lt.u32.totalorder %s6862_s14, %s7643_s6 }
  0xa4   :  { %p6868_p0 = pnand %p6866_p13, %p6863_p12 }
  0xa6   :  { %6871 = shalt.err (!%p6868_p0)
}
  0xa7   :  { %s6872_s1 = scalar_lea.vmem %s230_s26, 16  ;;  %s6876_s2 = scalar_lea.vmem %s230_s26, 32 }
  0xa8   :  { %p6873_p1 = scmp.ne.s32.totalorder %s230_s26, %s6872_s1  ;;  %p6877_p2 = scmp.lt.s32.totalorder %s230_s26, %s230_s26 }
  0xa9   :  { %p6878_p3 = scmp.lt.s32.totalorder %s6876_s2, %s6872_s1 }
  0xab   :  { %p6879_p4 = por %p6878_p3, %p6877_p2 }
  0xad   :  { %p6880_p5 = pnand %p6879_p4, %p6873_p1 }
  0xaf   :  { %6883 = shalt.err (!%p6880_p5)
}
  0xb0   :  { %232 = dma.hbm_to_vmem [thread:$0]  %s7643_s6, 16, %s230_s26, [#allocation21]  }
  0xb1   :  { %s7535_s0 = smov [#allocation23]   ;;  %s7536_s7 = smov [#allocation26]  }
  0xb2   :  { %s250_s24 = sshll.u32 %s7535_s0, 4  ;;  %s273_s10 = sshll.u32 %s7536_s7, 4  ;;  %s251_s24 = int_to_ptr.vmem [resolvable:$true] %s250_s24  ;;  %s274_s10 = int_to_ptr.vmem [resolvable:$true] %s273_s10 }
  0xb3   :  { %s6884_s25 = scalar_lea.hbm %s7653_s20, 1024 }
  0xb4   :  { %p6885_p6 = scmp.ne.s32.totalorder %s7653_s20, %s6884_s25  ;;  %p6888_p7 = scmp.lt.u32.totalorder %s6884_s25, %s7653_s20 }
  0xb6   :  { %p6890_p8 = pnand %p6888_p7, %p6885_p6 }
  0xb8   :  { %6893 = shalt.err (!%p6890_p8)
}
  0xb9   :  { %s6894_s11 = scalar_lea.vmem %s251_s24, 1024  ;;  %p6899_p10 = scmp.lt.s32.totalorder %s251_s24, %s251_s24 }
  0xba   :  { %p6895_p9 = scmp.ne.s32.totalorder %s251_s24, %s6894_s11  ;;  %p6900_p11 = scmp.lt.s32.totalorder %s6894_s11, %s6894_s11 }
  0xbc   :  { %p6901_p12 = por %p6900_p11, %p6899_p10 }
  0xbe   :  { %p6902_p13 = pnand %p6901_p12, %p6895_p9 }
  0xc0   :  { %6905 = shalt.err (!%p6902_p13)
}
  0xc1   :  { %256 = dma.hbm_to_vmem [thread:$0]  %s7653_s20, 1024, %s251_s24, [#allocation24], %s7529_s18, %s7529_s18, %s7530_s22  }
  0xc2   :  { %s6906_s6 = scalar_lea.hbm %s7663_s4, 16 }
  0xc3   :  { %p6907_p0 = scmp.ne.s32.totalorder %s7663_s4, %s6906_s6  ;;  %p6910_p1 = scmp.lt.u32.totalorder %s6906_s6, %s7663_s4 }
  0xc5   :  { %p6912_p2 = pnand %p6910_p1, %p6907_p0 }
  0xc7   :  { %6915 = shalt.err (!%p6912_p2)
}
  0xc8   :  { %s6916_s15 = scalar_lea.vmem %s274_s10, 16  ;;  %s6920_s16 = scalar_lea.vmem %s274_s10, 32 }
  0xc9   :  { %p6917_p3 = scmp.ne.s32.totalorder %s274_s10, %s6916_s15  ;;  %p6921_p4 = scmp.lt.s32.totalorder %s274_s10, %s274_s10 }
  0xca   :  { %p6922_p5 = scmp.lt.s32.totalorder %s6920_s16, %s6916_s15 }
  0xcc   :  { %p6923_p6 = por %p6922_p5, %p6921_p4 }
  0xce   :  { %p6924_p7 = pnand %p6923_p6, %p6917_p3 }
  0xd0   :  { %6927 = shalt.err (!%p6924_p7)
}
  0xd1   :  { %276 = dma.hbm_to_vmem [thread:$0]  %s7663_s4, 16, %s274_s10, [#allocation27]  }
  0xd2   :  { %s7537_s3 = smov [#allocation29]   ;;  %s7538_s23 = smov [#allocation32]  }
  0xd3   :  { %s295_s20 = sshll.u32 %s7537_s3, 4  ;;  %s317_s26 = sshll.u32 %s7538_s23, 4  ;;  %s296_s20 = int_to_ptr.vmem [resolvable:$true] %s295_s20  ;;  %s318_s26 = int_to_ptr.vmem [resolvable:$true] %s317_s26 }
  0xd4   :  { %s6928_s28 = scalar_lea.hbm %s7673_s5, 96 }
  0xd5   :  { %p6929_p8 = scmp.ne.s32.totalorder %s7673_s5, %s6928_s28  ;;  %p6932_p9 = scmp.lt.u32.totalorder %s6928_s28, %s7673_s5 }
  0xd7   :  { %p6934_p10 = pnand %p6932_p9, %p6929_p8 }
  0xd9   :  { %6937 = shalt.err (!%p6934_p10)
}
  0xda   :  { %s6938_s17 = scalar_lea.vmem %s296_s20, 96  ;;  %p6943_p12 = scmp.lt.s32.totalorder %s296_s20, %s296_s20 }
  0xdb   :  { %p6939_p11 = scmp.ne.s32.totalorder %s296_s20, %s6938_s17  ;;  %p6944_p13 = scmp.lt.s32.totalorder %s6938_s17, %s6938_s17 }
  0xdd   :  { %p6945_p0 = por %p6944_p13, %p6943_p12 }
  0xdf   :  { %p6946_p1 = pnand %p6945_p0, %p6939_p11 }
  0xe1   :  { %6949 = shalt.err (!%p6946_p1)
}
  0xe2   :  { %298 = dma.hbm_to_vmem [thread:$0]  %s7673_s5, 96, %s296_s20, [#allocation30]  }
  0xe3   :  { %s6950_s4 = scalar_lea.hbm %s7683_s12, 96 }
  0xe4   :  { %p6951_p2 = scmp.ne.s32.totalorder %s7683_s12, %s6950_s4  ;;  %p6954_p3 = scmp.lt.u32.totalorder %s6950_s4, %s7683_s12 }
  0xe6   :  { %p6956_p4 = pnand %p6954_p3, %p6951_p2 }
  0xe8   :  { %6959 = shalt.err (!%p6956_p4)
}
  0xe9   :  { %s6960_s14 = scalar_lea.vmem %s318_s26, 96  ;;  %p6965_p6 = scmp.lt.s32.totalorder %s318_s26, %s318_s26 }
  0xea   :  { %p6961_p5 = scmp.ne.s32.totalorder %s318_s26, %s6960_s14  ;;  %p6966_p7 = scmp.lt.s32.totalorder %s6960_s14, %s6960_s14 }
  0xec   :  { %p6967_p8 = por %p6966_p7, %p6965_p6 }
  0xee   :  { %p6968_p9 = pnand %p6967_p8, %p6961_p5 }
  0xf0   :  { %6971 = shalt.err (!%p6968_p9)
}
  0xf1   :  { %320 = dma.hbm_to_vmem [thread:$0]  %s7683_s12, 96, %s318_s26, [#allocation33]  }
  0xf2   :  { %s7539_s1 = smov [#allocation35]   ;;  %s7540_s5 = smov [#allocation38]  }
  0xf3   :  { %s339_s2 = sshll.u32 %s7539_s1, 4  ;;  %s361_s0 = sshll.u32 %s7540_s5, 4  ;;  %s340_s2 = int_to_ptr.vmem [resolvable:$true] %s339_s2  ;;  %s362_s0 = int_to_ptr.vmem [resolvable:$true] %s361_s0 }
  0xf4   :  { %s6972_s24 = scalar_lea.hbm %s7693_s30, 96 }
  0xf5   :  { %p6973_p10 = scmp.ne.s32.totalorder %s7693_s30, %s6972_s24  ;;  %p6976_p11 = scmp.lt.u32.totalorder %s6972_s24, %s7693_s30 }
  0xf7   :  { %p6978_p12 = pnand %p6976_p11, %p6973_p10 }
  0xf9   :  { %6981 = shalt.err (!%p6978_p12)
}
  0xfa   :  { %s6982_s7 = scalar_lea.vmem %s340_s2, 96  ;;  %p6987_p0 = scmp.lt.s32.totalorder %s340_s2, %s340_s2 }
  0xfb   :  { %p6983_p13 = scmp.ne.s32.totalorder %s340_s2, %s6982_s7  ;;  %p6988_p1 = scmp.lt.s32.totalorder %s6982_s7, %s6982_s7 }
  0xfd   :  { %p6989_p2 = por %p6988_p1, %p6987_p0 }
  0xff   :  { %p6990_p3 = pnand %p6989_p2, %p6983_p13 }
 0x101   :  { %6993 = shalt.err (!%p6990_p3)
}
 0x102   :  { %342 = dma.hbm_to_vmem [thread:$0]  %s7693_s30, 96, %s340_s2, [#allocation36]  }
 0x103   :  { %s6994_s12 = scalar_lea.hbm %s7703_s19, 256 }
 0x104   :  { %p6995_p4 = scmp.ne.s32.totalorder %s7703_s19, %s6994_s12  ;;  %p6998_p5 = scmp.lt.u32.totalorder %s6994_s12, %s7703_s19 }
 0x106   :  { %p7000_p6 = pnand %p6998_p5, %p6995_p4 }
 0x108   :  { %7003 = shalt.err (!%p7000_p6)
}
 0x109   :  { %s7004_s10 = scalar_lea.vmem %s362_s0, 256  ;;  %p7009_p8 = scmp.lt.s32.totalorder %s362_s0, %s362_s0 }
 0x10a   :  { %p7005_p7 = scmp.ne.s32.totalorder %s362_s0, %s7004_s10  ;;  %p7010_p9 = scmp.lt.s32.totalorder %s7004_s10, %s7004_s10 }
 0x10c   :  { %p7011_p10 = por %p7010_p9, %p7009_p8 }
 0x10e   :  { %p7012_p11 = pnand %p7011_p10, %p7005_p7 }
 0x110   :  { %7015 = shalt.err (!%p7012_p11)
}
 0x111   :  { %364 = dma.hbm_to_vmem [thread:$0]  %s7703_s19, 256, %s362_s0, [#allocation39]  }
 0x112   :  { %s7541_s25 = smov [#allocation41]   ;;  %s7542_s30 = smov [#allocation44]  }
 0x113   :  { %s383_s11 = sshll.u32 %s7541_s25, 4  ;;  %s405_s6 = sshll.u32 %s7542_s30, 4  ;;  %s384_s11 = int_to_ptr.vmem [resolvable:$true] %s383_s11  ;;  %s406_s6 = int_to_ptr.vmem [resolvable:$true] %s405_s6 }
 0x114   :  { %s7016_s15 = scalar_lea.hbm %s7718_s27, 64 }
 0x115   :  { %p7017_p12 = scmp.ne.s32.totalorder %s7718_s27, %s7016_s15  ;;  %p7020_p13 = scmp.lt.u32.totalorder %s7016_s15, %s7718_s27 }
 0x117   :  { %p7022_p0 = pnand %p7020_p13, %p7017_p12 }
 0x119   :  { %7025 = shalt.err (!%p7022_p0)
}
 0x11a   :  { %s7026_s16 = scalar_lea.vmem %s384_s11, 64  ;;  %p7031_p2 = scmp.lt.s32.totalorder %s384_s11, %s384_s11 }
 0x11b   :  { %p7027_p1 = scmp.ne.s32.totalorder %s384_s11, %s7026_s16  ;;  %p7032_p3 = scmp.lt.s32.totalorder %s7026_s16, %s7026_s16 }
 0x11d   :  { %p7033_p4 = por %p7032_p3, %p7031_p2 }
 0x11f   :  { %p7034_p5 = pnand %p7033_p4, %p7027_p1 }
 0x121   :  { %7037 = shalt.err (!%p7034_p5)
}
 0x122   :  { %386 = dma.hbm_to_vmem [thread:$0]  %s7718_s27, 64, %s384_s11, [#allocation42]  }
 0x123   :  { %s7038_s19 = scalar_lea.hbm %s7728_s9, 32 }
 0x124   :  { %p7039_p6 = scmp.ne.s32.totalorder %s7728_s9, %s7038_s19  ;;  %p7042_p7 = scmp.lt.u32.totalorder %s7038_s19, %s7728_s9 }
 0x126   :  { %p7044_p8 = pnand %p7042_p7, %p7039_p6 }
 0x128   :  { %7047 = shalt.err (!%p7044_p8)
}
 0x129   :  { %s7048_s3 = scalar_lea.vmem %s406_s6, 32  ;;  %p7053_p10 = scmp.lt.s32.totalorder %s406_s6, %s406_s6 }
 0x12a   :  { %p7049_p9 = scmp.ne.s32.totalorder %s406_s6, %s7048_s3  ;;  %p7054_p11 = scmp.lt.s32.totalorder %s7048_s3, %s7048_s3 }
 0x12c   :  { %p7055_p12 = por %p7054_p11, %p7053_p10 }
 0x12e   :  { %p7056_p13 = pnand %p7055_p12, %p7049_p9 }
 0x130   :  { %7059 = shalt.err (!%p7056_p13)
}
 0x131   :  { %s8223_s20 = sld [smem:[#allocation86_spill]]  ;;  %s7543_s23 = smov [#allocation47]  }
 0x132   :  { %408 = dma.hbm_to_vmem [thread:$0]  %s7728_s9, 32, %s406_s6, [#allocation45]  }
 0x133   :  { %s425_s26 = sshll.u32 %s7543_s23, 4  ;;  %s7544_s27 = smov [#allocation2]   ;;  %s426_s26 = int_to_ptr.vmem [resolvable:$true] %s425_s26 }
 0x134   :  { %s106_s28 = sshll.u32 %s7544_s27, 4  ;;  %s7841_s28 = int_to_ptr.vmem [resolvable:$true] %s106_s28 }
 0x137   :  { %s7060_s17 = scalar_lea.hbm %s8223_s20, 32 }
 0x138   :  { %p7061_p0 = scmp.ne.s32.totalorder %s8223_s20, %s7060_s17  ;;  %p7064_p1 = scmp.lt.u32.totalorder %s7060_s17, %s8223_s20 }
 0x13a   :  { %p7066_p2 = pnand %p7064_p1, %p7061_p0 }
 0x13c   :  { %7069 = shalt.err (!%p7066_p2)
}
 0x13d   :  { %s7070_s4 = scalar_lea.vmem %s426_s26, 32  ;;  %p7075_p4 = scmp.lt.s32.totalorder %s426_s26, %s426_s26 }
 0x13e   :  { %p7071_p3 = scmp.ne.s32.totalorder %s426_s26, %s7070_s4  ;;  %p7076_p5 = scmp.lt.s32.totalorder %s7070_s4, %s7070_s4 }
 0x140   :  { %p7077_p6 = por %p7076_p5, %p7075_p4 }
 0x142   :  { %p7078_p7 = pnand %p7077_p6, %p7071_p3 }
 0x144   :  { %7081 = shalt.err (!%p7078_p7)
}
 0x145   :  { %s8224_s9 = sld [smem:[#allocation70_spill]] }
 0x146   :  { %428 = dma.hbm_to_vmem [thread:$0]  %s8223_s20, 32, %s426_s26, [#allocation48]  }
 0x14b   :  { %s7082_s14 = scalar_lea.hbm %s8224_s9, 512 }
 0x14c   :  { %p7083_p8 = scmp.ne.s32.totalorder %s8224_s9, %s7082_s14  ;;  %p7086_p9 = scmp.lt.u32.totalorder %s7082_s14, %s8224_s9 }
 0x14e   :  { %p7088_p10 = pnand %p7086_p9, %p7083_p8 }
 0x150   :  { %7091 = shalt.err (!%p7088_p10)
}
 0x151   :  { %s7092_s1 = scalar_lea.vmem %s7841_s28, 512  ;;  %p7097_p12 = scmp.lt.s32.totalorder %s7841_s28, %s7841_s28 }
 0x152   :  { %p7093_p11 = scmp.ne.s32.totalorder %s7841_s28, %s7092_s1  ;;  %p7098_p13 = scmp.lt.s32.totalorder %s7092_s1, %s7092_s1 }
 0x154   :  { %p7099_p0 = por %p7098_p13, %p7097_p12 }
 0x156   :  { %p7100_p1 = pnand %p7099_p0, %p7093_p11 }
 0x158   :  { %7103 = shalt.err (!%p7100_p1)
}
 0x159   :  { %s8225_s2 = sld [smem:[#allocation71_spill]]  ;;  %s7545_s5 = smov [#allocation7]  }
 0x15a   :  { %112 = dma.hbm_to_vmem [thread:$0]  %s8224_s9, 512, %s7841_s28, [#allocation3], %s7529_s18, %s7529_s18, %s7530_s22  }
 0x15b   :  { %s131_s0 = sshll.u32 %s7545_s5, 4  ;;  %s7546_s24 = smov [#allocation10]   ;;  %s132_s0 = int_to_ptr.vmem [resolvable:$true] %s131_s0 }
 0x15c   :  { %s150_s7 = sshll.u32 %s7546_s24, 4  ;;  %s7859_s7 = int_to_ptr.vmem [resolvable:$true] %s150_s7 }
 0x15f   :  { %s7104_s12 = scalar_lea.hbm %s8225_s2, 16 }
 0x160   :  { %p7105_p2 = scmp.ne.s32.totalorder %s8225_s2, %s7104_s12  ;;  %p7108_p3 = scmp.lt.u32.totalorder %s7104_s12, %s8225_s2 }
 0x162   :  { %p7110_p4 = pnand %p7108_p3, %p7105_p2 }
 0x164   :  { %7113 = shalt.err (!%p7110_p4)
}
 0x165   :  { %s7114_s10 = scalar_lea.vmem %s132_s0, 16  ;;  %s7118_s25 = scalar_lea.vmem %s132_s0, 32 }
 0x166   :  { %p7115_p5 = scmp.ne.s32.totalorder %s132_s0, %s7114_s10  ;;  %p7119_p6 = scmp.lt.s32.totalorder %s132_s0, %s132_s0 }
 0x167   :  { %p7120_p7 = scmp.lt.s32.totalorder %s7118_s25, %s7114_s10 }
 0x169   :  { %p7121_p8 = por %p7120_p7, %p7119_p6 }
 0x16b   :  { %p7122_p9 = pnand %p7121_p8, %p7115_p5 }
 0x16d   :  { %7125 = shalt.err (!%p7122_p9)
}
 0x16e   :  { %s8226_s11 = sld [smem:[#allocation72_spill]] }
 0x16f   :  { %134 = dma.hbm_to_vmem [thread:$0]  %s8225_s2, 16, %s132_s0, [#allocation6]  }
 0x174   :  { %s7126_s30 = scalar_lea.hbm %s8226_s11, 1024 }
 0x175   :  { %p7127_p10 = scmp.ne.s32.totalorder %s8226_s11, %s7126_s30  ;;  %p7130_p11 = scmp.lt.u32.totalorder %s7126_s30, %s8226_s11 }
 0x177   :  { %p7132_p12 = pnand %p7130_p11, %p7127_p10 }
 0x179   :  { %7135 = shalt.err (!%p7132_p12)
}
 0x17a   :  { %s7136_s6 = scalar_lea.vmem %s7859_s7, 1024  ;;  %p7141_p0 = scmp.lt.s32.totalorder %s7859_s7, %s7859_s7 }
 0x17b   :  { %p7137_p13 = scmp.ne.s32.totalorder %s7859_s7, %s7136_s6  ;;  %p7142_p1 = scmp.lt.s32.totalorder %s7136_s6, %s7136_s6 }
 0x17d   :  { %p7143_p2 = por %p7142_p1, %p7141_p0 }
 0x17f   :  { %p7144_p3 = pnand %p7143_p2, %p7137_p13 }
 0x181   :  { %7147 = shalt.err (!%p7144_p3)
}
 0x182   :  { %s8227_s15 = sld [smem:[#allocation73_spill]]  ;;  %s7547_s16 = smov [#allocation13]  }
 0x183   :  { %156 = dma.hbm_to_vmem [thread:$0]  %s8226_s11, 1024, %s7859_s7, [#allocation9], %s7529_s18, %s7529_s18, %s7530_s22  }
 0x184   :  { %s175_s19 = sshll.u32 %s7547_s16, 4  ;;  %s7548_s3 = smov [#allocation16]   ;;  %s176_s19 = int_to_ptr.vmem [resolvable:$true] %s175_s19 }
 0x185   :  { %s194_s20 = sshll.u32 %s7548_s3, 4  ;;  %s7877_s20 = int_to_ptr.vmem [resolvable:$true] %s194_s20 }
 0x188   :  { %s7148_s23 = scalar_lea.hbm %s8227_s15, 16 }
 0x189   :  { %p7149_p4 = scmp.ne.s32.totalorder %s8227_s15, %s7148_s23  ;;  %p7152_p5 = scmp.lt.u32.totalorder %s7148_s23, %s8227_s15 }
 0x18b   :  { %p7154_p6 = pnand %p7152_p5, %p7149_p4 }
 0x18d   :  { %7157 = shalt.err (!%p7154_p6)
}
 0x18e   :  { %s7158_s26 = scalar_lea.vmem %s176_s19, 16  ;;  %s7162_s27 = scalar_lea.vmem %s176_s19, 32 }
 0x18f   :  { %p7159_p7 = scmp.ne.s32.totalorder %s176_s19, %s7158_s26  ;;  %p7163_p8 = scmp.lt.s32.totalorder %s176_s19, %s176_s19 }
 0x190   :  { %p7164_p9 = scmp.lt.s32.totalorder %s7162_s27, %s7158_s26 }
 0x192   :  { %p7165_p10 = por %p7164_p9, %p7163_p8 }
 0x194   :  { %p7166_p11 = pnand %p7165_p10, %p7159_p7 }
 0x196   :  { %7169 = shalt.err (!%p7166_p11)
}
 0x197   :  { %s8228_s28 = sld [smem:[#allocation74_spill]] }
 0x198   :  { %178 = dma.hbm_to_vmem [thread:$0]  %s8227_s15, 16, %s176_s19, [#allocation12]  }
 0x19d   :  { %s7170_s17 = scalar_lea.hbm %s8228_s28, 1024 }
 0x19e   :  { %p7171_p12 = scmp.ne.s32.totalorder %s8228_s28, %s7170_s17  ;;  %p7174_p13 = scmp.lt.u32.totalorder %s7170_s17, %s8228_s28 }
 0x1a0   :  { %p7176_p0 = pnand %p7174_p13, %p7171_p12 }
 0x1a2   :  { %7179 = shalt.err (!%p7176_p0)
}
 0x1a3   :  { %s7180_s4 = scalar_lea.vmem %s7877_s20, 1024  ;;  %p7185_p2 = scmp.lt.s32.totalorder %s7877_s20, %s7877_s20 }
 0x1a4   :  { %p7181_p1 = scmp.ne.s32.totalorder %s7877_s20, %s7180_s4  ;;  %p7186_p3 = scmp.lt.s32.totalorder %s7180_s4, %s7180_s4 }
 0x1a6   :  { %p7187_p4 = por %p7186_p3, %p7185_p2 }
 0x1a8   :  { %p7188_p5 = pnand %p7187_p4, %p7181_p1 }
 0x1aa   :  { %7191 = shalt.err (!%p7188_p5)
}
 0x1ab   :  { %s8229_s9 = sld [smem:[#allocation75_spill]]  ;;  %s7549_s14 = smov [#allocation19]  }
 0x1ac   :  { %200 = dma.hbm_to_vmem [thread:$0]  %s8228_s28, 1024, %s7877_s20, [#allocation15], %s7529_s18, %s7529_s18, %s7530_s22  }
 0x1ad   :  { %s219_s1 = sshll.u32 %s7549_s14, 4  ;;  %s7550_s2 = smov [#allocation22]   ;;  %s220_s1 = int_to_ptr.vmem [resolvable:$true] %s219_s1 }
 0x1ae   :  { %s238_s5 = sshll.u32 %s7550_s2, 4  ;;  %s7895_s5 = int_to_ptr.vmem [resolvable:$true] %s238_s5 }
 0x1b1   :  { %s7192_s0 = scalar_lea.hbm %s8229_s9, 16 }
 0x1b2   :  { %p7193_p6 = scmp.ne.s32.totalorder %s8229_s9, %s7192_s0  ;;  %p7196_p7 = scmp.lt.u32.totalorder %s7192_s0, %s8229_s9 }
 0x1b4   :  { %p7198_p8 = pnand %p7196_p7, %p7193_p6 }
 0x1b6   :  { %7201 = shalt.err (!%p7198_p8)
}
 0x1b7   :  { %s7202_s24 = scalar_lea.vmem %s220_s1, 16  ;;  %s7206_s7 = scalar_lea.vmem %s220_s1, 32 }
 0x1b8   :  { %p7203_p9 = scmp.ne.s32.totalorder %s220_s1, %s7202_s24  ;;  %p7207_p10 = scmp.lt.s32.totalorder %s220_s1, %s220_s1 }
 0x1b9   :  { %p7208_p11 = scmp.lt.s32.totalorder %s7206_s7, %s7202_s24 }
 0x1bb   :  { %p7209_p12 = por %p7208_p11, %p7207_p10 }
 0x1bd   :  { %p7210_p13 = pnand %p7209_p12, %p7203_p9 }
 0x1bf   :  { %7213 = shalt.err (!%p7210_p13)
}
 0x1c0   :  { %s8230_s12 = sld [smem:[#allocation76_spill]] }
 0x1c1   :  { %222 = dma.hbm_to_vmem [thread:$0]  %s8229_s9, 16, %s220_s1, [#allocation18]  }
 0x1c6   :  { %s7214_s10 = scalar_lea.hbm %s8230_s12, 1024 }
 0x1c7   :  { %p7215_p0 = scmp.ne.s32.totalorder %s8230_s12, %s7214_s10  ;;  %p7218_p1 = scmp.lt.u32.totalorder %s7214_s10, %s8230_s12 }
 0x1c9   :  { %p7220_p2 = pnand %p7218_p1, %p7215_p0 }
 0x1cb   :  { %7223 = shalt.err (!%p7220_p2)
}
 0x1cc   :  { %s7224_s25 = scalar_lea.vmem %s7895_s5, 1024  ;;  %p7229_p4 = scmp.lt.s32.totalorder %s7895_s5, %s7895_s5 }
 0x1cd   :  { %p7225_p3 = scmp.ne.s32.totalorder %s7895_s5, %s7224_s25  ;;  %p7230_p5 = scmp.lt.s32.totalorder %s7224_s25, %s7224_s25 }
 0x1cf   :  { %p7231_p6 = por %p7230_p5, %p7229_p4 }
 0x1d1   :  { %p7232_p7 = pnand %p7231_p6, %p7225_p3 }
 0x1d3   :  { %7235 = shalt.err (!%p7232_p7)
}
 0x1d4   :  { %s8231_s11 = sld [smem:[#allocation77_spill]]  ;;  %s7551_s30 = smov [#allocation25]  }
 0x1d5   :  { %244 = dma.hbm_to_vmem [thread:$0]  %s8230_s12, 1024, %s7895_s5, [#allocation21], %s7529_s18, %s7529_s18, %s7530_s22  }
 0x1d6   :  { %s263_s6 = sshll.u32 %s7551_s30, 4  ;;  %s7552_s15 = smov [#allocation28]   ;;  %s264_s6 = int_to_ptr.vmem [resolvable:$true] %s263_s6 }
 0x1d7   :  { %s282_s16 = sshll.u32 %s7552_s15, 4  ;;  %s7913_s16 = int_to_ptr.vmem [resolvable:$true] %s282_s16 }
 0x1da   :  { %s7236_s19 = scalar_lea.hbm %s8231_s11, 16 }
 0x1db   :  { %p7237_p8 = scmp.ne.s32.totalorder %s8231_s11, %s7236_s19  ;;  %p7240_p9 = scmp.lt.u32.totalorder %s7236_s19, %s8231_s11 }
 0x1dd   :  { %p7242_p10 = pnand %p7240_p9, %p7237_p8 }
 0x1df   :  { %7245 = shalt.err (!%p7242_p10)
}
 0x1e0   :  { %s7246_s3 = scalar_lea.vmem %s264_s6, 16  ;;  %s7250_s20 = scalar_lea.vmem %s264_s6, 32 }
 0x1e1   :  { %p7247_p11 = scmp.ne.s32.totalorder %s264_s6, %s7246_s3  ;;  %p7251_p12 = scmp.lt.s32.totalorder %s264_s6, %s264_s6 }
 0x1e2   :  { %p7252_p13 = scmp.lt.s32.totalorder %s7250_s20, %s7246_s3 }
 0x1e4   :  { %p7253_p0 = por %p7252_p13, %p7251_p12 }
 0x1e6   :  { %p7254_p1 = pnand %p7253_p0, %p7247_p11 }
 0x1e8   :  { %7257 = shalt.err (!%p7254_p1)
}
 0x1e9   :  { %s8232_s23 = sld [smem:[#allocation78_spill]] }
 0x1ea   :  { %266 = dma.hbm_to_vmem [thread:$0]  %s8231_s11, 16, %s264_s6, [#allocation24]  }
 0x1ef   :  { %s7258_s26 = scalar_lea.hbm %s8232_s23, 6144 }
 0x1f0   :  { %p7259_p2 = scmp.ne.s32.totalorder %s8232_s23, %s7258_s26  ;;  %p7262_p3 = scmp.lt.u32.totalorder %s7258_s26, %s8232_s23 }
 0x1f2   :  { %p7264_p4 = pnand %p7262_p3, %p7259_p2 }
 0x1f4   :  { %7267 = shalt.err (!%p7264_p4)
}
 0x1f5   :  { %s7268_s27 = scalar_lea.vmem %s7913_s16, 6144  ;;  %p7273_p6 = scmp.lt.s32.totalorder %s7913_s16, %s7913_s16 }
 0x1f6   :  { %p7269_p5 = scmp.ne.s32.totalorder %s7913_s16, %s7268_s27  ;;  %p7274_p7 = scmp.lt.s32.totalorder %s7268_s27, %s7268_s27 }
 0x1f8   :  { %p7275_p8 = por %p7274_p7, %p7273_p6 }
 0x1fa   :  { %p7276_p9 = pnand %p7275_p8, %p7269_p5 }
 0x1fc   :  { %7279 = shalt.err (!%p7276_p9)
}
 0x1fd   :  { %s7553_s28 = smov 384   ;;  %s8233_s17 = sld [smem:[#allocation79_spill]] }
 0x1fe   :  { %s7554_s4 = smov 24   ;;  %s7555_s9 = smov [#allocation31]  }
 0x1ff   :  { %288 = dma.hbm_to_vmem [thread:$0]  %s8232_s23, 6144, %s7913_s16, [#allocation27], %s7553_s28, %s7553_s28, %s7554_s4  }
 0x200   :  { %s304_s14 = sshll.u32 %s7555_s9, 4  ;;  %s7556_s1 = smov [#allocation34]   ;;  %s305_s14 = int_to_ptr.vmem [resolvable:$true] %s304_s14 }
 0x201   :  { %s326_s2 = sshll.u32 %s7556_s1, 4  ;;  %s7931_s2 = int_to_ptr.vmem [resolvable:$true] %s326_s2 }
 0x203   :  { %s7280_s5 = scalar_lea.hbm %s8233_s17, 12288 }
 0x204   :  { %p7281_p10 = scmp.ne.s32.totalorder %s8233_s17, %s7280_s5  ;;  %p7284_p11 = scmp.lt.u32.totalorder %s7280_s5, %s8233_s17 }
 0x206   :  { %p7286_p12 = pnand %p7284_p11, %p7281_p10 }
 0x208   :  { %7289 = shalt.err (!%p7286_p12)
}
 0x209   :  { %s7290_s0 = scalar_lea.vmem %s305_s14, 12288  ;;  %p7295_p0 = scmp.lt.s32.totalorder %s305_s14, %s305_s14 }
 0x20a   :  { %p7291_p13 = scmp.ne.s32.totalorder %s305_s14, %s7290_s0  ;;  %p7296_p1 = scmp.lt.s32.totalorder %s7290_s0, %s7290_s0 }
 0x20c   :  { %p7297_p2 = por %p7296_p1, %p7295_p0 }
 0x20e   :  { %p7298_p3 = pnand %p7297_p2, %p7291_p13 }
 0x210   :  { %7301 = shalt.err (!%p7298_p3)
}
 0x211   :  { %s8234_s24 = sld [smem:[#allocation80_spill]] }
 0x212   :  { %310 = dma.hbm_to_vmem [thread:$0]  %s8233_s17, 12288, %s305_s14, [#allocation30], %s7553_s28, %s7553_s28, %s7554_s4  }
 0x217   :  { %s7302_s7 = scalar_lea.hbm %s8234_s24, 12288 }
 0x218   :  { %p7303_p4 = scmp.ne.s32.totalorder %s8234_s24, %s7302_s7  ;;  %p7306_p5 = scmp.lt.u32.totalorder %s7302_s7, %s8234_s24 }
 0x21a   :  { %p7308_p6 = pnand %p7306_p5, %p7303_p4 }
 0x21c   :  { %7311 = shalt.err (!%p7308_p6)
}
 0x21d   :  { %s7312_s12 = scalar_lea.vmem %s7931_s2, 12288  ;;  %p7317_p8 = scmp.lt.s32.totalorder %s7931_s2, %s7931_s2 }
 0x21e   :  { %p7313_p7 = scmp.ne.s32.totalorder %s7931_s2, %s7312_s12  ;;  %p7318_p9 = scmp.lt.s32.totalorder %s7312_s12, %s7312_s12 }
 0x220   :  { %p7319_p10 = por %p7318_p9, %p7317_p8 }
 0x222   :  { %p7320_p11 = pnand %p7319_p10, %p7313_p7 }
 0x224   :  { %7323 = shalt.err (!%p7320_p11)
}
 0x225   :  { %s8235_s10 = sld [smem:[#allocation81_spill]]  ;;  %s7557_s25 = smov [#allocation37]  }
 0x226   :  { %332 = dma.hbm_to_vmem [thread:$0]  %s8234_s24, 12288, %s7931_s2, [#allocation33], %s7553_s28, %s7553_s28, %s7554_s4  }
 0x227   :  { %s348_s11 = sshll.u32 %s7557_s25, 4  ;;  %s349_s11 = int_to_ptr.vmem [resolvable:$true] %s348_s11 }
 0x22b   :  { %s7324_s30 = scalar_lea.hbm %s8235_s10, 8192 }
 0x22c   :  { %p7325_p12 = scmp.ne.s32.totalorder %s8235_s10, %s7324_s30  ;;  %p7328_p13 = scmp.lt.u32.totalorder %s7324_s30, %s8235_s10 }
 0x22e   :  { %p7330_p0 = pnand %p7328_p13, %p7325_p12 }
 0x230   :  { %7333 = shalt.err (!%p7330_p0)
}
 0x231   :  { %s7334_s6 = scalar_lea.vmem %s349_s11, 8192  ;;  %p7339_p2 = scmp.lt.s32.totalorder %s349_s11, %s349_s11 }
 0x232   :  { %p7335_p1 = scmp.ne.s32.totalorder %s349_s11, %s7334_s6  ;;  %p7340_p3 = scmp.lt.s32.totalorder %s7334_s6, %s7334_s6 }
 0x234   :  { %p7341_p4 = por %p7340_p3, %p7339_p2 }
 0x236   :  { %p7342_p5 = pnand %p7341_p4, %p7335_p1 }
 0x238   :  { %7345 = shalt.err (!%p7342_p5)
}
 0x239   :  { %s7558_s15 = smov 256   ;;  %s8236_s16 = sld [smem:[#allocation83_spill]] }
 0x23a   :  { %s7559_s19 = smov 16   ;;  %s7560_s3 = smov [#allocation40]  }
 0x23b   :  { %354 = dma.hbm_to_vmem [thread:$0]  %s8235_s10, 8192, %s349_s11, [#allocation36], %s7558_s15, %s7558_s15, %s7559_s19  }
 0x23c   :  { %s373_s20 = sshll.u32 %s7560_s3, 4  ;;  %s7561_s23 = smov [#allocation43]   ;;  %s374_s20 = int_to_ptr.vmem [resolvable:$true] %s373_s20 }
 0x23d   :  { %s392_s26 = sshll.u32 %s7561_s23, 4  ;;  %s393_s26 = int_to_ptr.vmem [resolvable:$true] %s392_s26 }
 0x23f   :  { %s7346_s27 = scalar_lea.hbm %s8236_s16, 64 }
 0x240   :  { %p7347_p6 = scmp.ne.s32.totalorder %s8236_s16, %s7346_s27  ;;  %p7350_p7 = scmp.lt.u32.totalorder %s7346_s27, %s8236_s16 }
 0x242   :  { %p7352_p8 = pnand %p7350_p7, %p7347_p6 }
 0x244   :  { %7355 = shalt.err (!%p7352_p8)
}
 0x245   :  { %s7356_s28 = scalar_lea.vmem %s374_s20, 64  ;;  %p7361_p10 = scmp.lt.s32.totalorder %s374_s20, %s374_s20 }
 0x246   :  { %p7357_p9 = scmp.ne.s32.totalorder %s374_s20, %s7356_s28  ;;  %p7362_p11 = scmp.lt.s32.totalorder %s7356_s28, %s7356_s28 }
 0x248   :  { %p7363_p12 = por %p7362_p11, %p7361_p10 }
 0x24a   :  { %p7364_p13 = pnand %p7363_p12, %p7357_p9 }
 0x24c   :  { %7367 = shalt.err (!%p7364_p13)
}
 0x24d   :  { %s8237_s17 = sld [smem:[#allocation84_spill]] }
 0x24e   :  { %376 = dma.hbm_to_vmem [thread:$0]  %s8236_s16, 64, %s374_s20, [#allocation39]  }
 0x253   :  { %s7368_s4 = scalar_lea.hbm %s8237_s17, 8192 }
 0x254   :  { %p7369_p0 = scmp.ne.s32.totalorder %s8237_s17, %s7368_s4  ;;  %p7372_p1 = scmp.lt.u32.totalorder %s7368_s4, %s8237_s17 }
 0x256   :  { %p7374_p2 = pnand %p7372_p1, %p7369_p0 }
 0x258   :  { %7377 = shalt.err (!%p7374_p2)
}
 0x259   :  { %s7378_s9 = scalar_lea.vmem %s393_s26, 8192  ;;  %p7383_p4 = scmp.lt.s32.totalorder %s393_s26, %s393_s26 }
 0x25a   :  { %p7379_p3 = scmp.ne.s32.totalorder %s393_s26, %s7378_s9  ;;  %p7384_p5 = scmp.lt.s32.totalorder %s7378_s9, %s7378_s9 }
 0x25c   :  { %p7385_p6 = por %p7384_p5, %p7383_p4 }
 0x25e   :  { %p7386_p7 = pnand %p7385_p6, %p7379_p3 }
 0x260   :  { %7389 = shalt.err (!%p7386_p7)
}
 0x261   :  { %s7562_s14 = smov 128   ;;  %s8238_s1 = sld [smem:[#allocation85_spill]] }
 0x262   :  { %s7563_s2 = smov 8   ;;  %s7564_s5 = smov [#allocation46]  }
 0x263   :  { %398 = dma.hbm_to_vmem [thread:$0]  %s8237_s17, 8192, %s393_s26, [#allocation42], %s7562_s14, %s7562_s14, %s7563_s2  }
 0x264   :  { %s415_s0 = sshll.u32 %s7564_s5, 4  ;;  %s7565_s24 = smov [#allocation49]   ;;  %s416_s0 = int_to_ptr.vmem [resolvable:$true] %s415_s0 }
 0x265   :  { %s438_s7 = sshll.u32 %s7565_s24, 4  ;;  %s439_s7 = int_to_ptr.vmem [resolvable:$true] %s438_s7 }
 0x267   :  { %s7390_s12 = scalar_lea.hbm %s8238_s1, 32 }
 0x268   :  { %p7391_p8 = scmp.ne.s32.totalorder %s8238_s1, %s7390_s12  ;;  %p7394_p9 = scmp.lt.u32.totalorder %s7390_s12, %s8238_s1 }
 0x26a   :  { %p7396_p10 = pnand %p7394_p9, %p7391_p8 }
 0x26c   :  { %7399 = shalt.err (!%p7396_p10)
}
 0x26d   :  { %s7400_s10 = scalar_lea.vmem %s416_s0, 32  ;;  %p7405_p12 = scmp.lt.s32.totalorder %s416_s0, %s416_s0 }
 0x26e   :  { %p7401_p11 = scmp.ne.s32.totalorder %s416_s0, %s7400_s10  ;;  %p7406_p13 = scmp.lt.s32.totalorder %s7400_s10, %s7400_s10 }
 0x270   :  { %p7407_p0 = por %p7406_p13, %p7405_p12 }
 0x272   :  { %p7408_p1 = pnand %p7407_p0, %p7401_p11 }
 0x274   :  { %7411 = shalt.err (!%p7408_p1)
}
 0x275   :  { %418 = dma.hbm_to_vmem [thread:$0]  %s8238_s1, 32, %s416_s0, [#allocation45]  }
 0x276   :  { %s7412_s25 = scalar_lea.hbm %s7753_s8, 1024 }
 0x277   :  { %p7413_p2 = scmp.ne.s32.totalorder %s7753_s8, %s7412_s25  ;;  %p7416_p3 = scmp.lt.u32.totalorder %s7412_s25, %s7753_s8 }
 0x279   :  { %p7418_p4 = pnand %p7416_p3, %p7413_p2 }
 0x27b   :  { %7421 = shalt.err (!%p7418_p4)
}
 0x27c   :  { %s7422_s11 = scalar_lea.vmem %s439_s7, 1024  ;;  %p7427_p6 = scmp.lt.s32.totalorder %s439_s7, %s439_s7 }
 0x27d   :  { %p7423_p5 = scmp.ne.s32.totalorder %s439_s7, %s7422_s11  ;;  %p7428_p7 = scmp.lt.s32.totalorder %s7422_s11, %s7422_s11 }
 0x27f   :  { %p7429_p8 = por %p7428_p7, %p7427_p6 }
 0x281   :  { %p7430_p9 = pnand %p7429_p8, %p7423_p5 }
 0x283   :  { %7433 = shalt.err (!%p7430_p9)
}
 0x284   :  { %444 = dma.hbm_to_vmem [thread:$0]  %s7753_s8, 1024, %s439_s7, [#allocation48], %s7529_s18, %s7529_s18, %s7530_s22  }
 0x285   :  { %7456 = dma.done.wait [#allocation3], 512  }
 0x286   :  { %7457 = vsyncadd [#allocation3], 4294966784 }
 0x287   :  { %7458 = dma.done.wait [#allocation6], 528  }
 0x288   :  { %7459 = vsyncadd [#allocation6], 4294966768 }
 0x289   :  { %7460 = dma.done.wait [#allocation9], 1040  }
 0x28a   :  { %7461 = vsyncadd [#allocation9], 4294966256 }
 0x28b   :  { %7462 = dma.done.wait [#allocation12], 1040  }
 0x28c   :  { %7463 = vsyncadd [#allocation12], 4294966256 }
 0x28d   :  { %7464 = dma.done.wait [#allocation15], 1040  }
 0x28e   :  { %7465 = vsyncadd [#allocation15], 4294966256 }
 0x28f   :  { %7466 = dma.done.wait [#allocation18], 1040  }
 0x290   :  { %7467 = vsyncadd [#allocation18], 4294966256 }
 0x291   :  { %7468 = dma.done.wait [#allocation21], 1040  }
 0x292   :  { %7469 = vsyncadd [#allocation21], 4294966256 }
 0x293   :  { %7470 = dma.done.wait [#allocation24], 1040  }
 0x294   :  { %7471 = vsyncadd [#allocation24], 4294966256 }
 0x295   :  { %7472 = dma.done.wait [#allocation27], 6160  }
 0x296   :  { %7473 = vsyncadd [#allocation27], 4294961136 }
 0x297   :  { %7474 = dma.done.wait [#allocation30], 12384  }
 0x298   :  { %7475 = vsyncadd [#allocation30], 4294954912 }
 0x299   :  { %7476 = dma.done.wait [#allocation33], 12384  }
 0x29a   :  { %7477 = vsyncadd [#allocation33], 4294954912 }
 0x29b   :  { %7478 = dma.done.wait [#allocation36], 8288  }
 0x29c   :  { %7479 = vsyncadd [#allocation36], 4294959008 }
 0x29d   :  { %7480 = dma.done.wait [#allocation39], 320  }
 0x29e   :  { %7481 = vsyncadd [#allocation39], 4294966976 }
 0x29f   :  { %7482 = dma.done.wait [#allocation42], 8256  }
 0x2a0   :  { %7483 = vsyncadd [#allocation42], 4294959040 }
 0x2a1   :  { %7484 = dma.done.wait [#allocation45], 64  }
 0x2a2   :  { %7485 = vsyncadd [#allocation45], 4294967232 }
 0x2a3   :  { %7486 = dma.done.wait [#allocation48], 1056  }
 0x2a4   :  { %7487 = vsyncadd [#allocation48], 4294966240  ;;  %v7566_v0 = vmov 0.0   ;;  %vm7567_vm0 = vmmov 0   ;;  %s8239_s8 = sld [smem:[#allocation68_spill]]  ;;  %v5972_v1 = vld [vmem:[#allocation2] sm:$0xff]  }
 0x2a5   :  { %5712 = vmatprep.subr.bf16.mxu0 %v7566_v0  ;;  %5724 = vmatprep.subr.bf16.mxu1 %v7566_v0  ;;  %v5973_v2 = vld [vmem:[#allocation5] sm:$0xff]   ;;  %v5974_v3 = vld [vmem:[#allocation2 + $0x8] sm:$0xff]   ;;  %v5976_v5 = vld [vmem:[#allocation2 + $0x10] sm:$0xff]   ;;  %vm576_vm1 = vcmask 523264   ;;  %s8240_s18 = sld [smem:[#allocation69_spill]]  ;;  %vm3636_vm2 = vcmask 1043456  }
 0x2a6   :  { %5720 = vmatprep.mubr.msk.bf16.mxu0 %vm7567_vm0, %v7566_v0  ;;  %5732 = vmatprep.mubr.msk.bf16.mxu1 %vm7567_vm0, %v7566_v0  ;;  %v5975_v4 = vld [vmem:[#allocation5 + $0x8] sm:$0xff]   ;;  %v5977_v6 = vld [vmem:[#allocation5 + $0x10] sm:$0xff]   ;;  %v5978_v7 = vld [vmem:[#allocation2 + $0x18] sm:$0xff]   ;;  %vm3632_vm3 = vcmask 64512   ;;  %s8241_s22 = sld [smem:[#allocation87_spill]]  ;;  %s8242_s30 = sld [smem:[#allocation82_spill]] }
 0x2a7   :  { %5713 = vmatpush3.bf16.msra.mxu0 %v5972_v1  ;;  %5725 = vmatpush3.bf16.msra.mxu1 %v5973_v2  ;;  %v5979_v10 = vld [vmem:[#allocation5 + $0x18] sm:$0xff]   ;;  %v5980_v12 = vld [vmem:[#allocation10] sm:$0xff]   ;;  %v5982_v14 = vld [vmem:[#allocation10 + $0x8] sm:$0xff]   ;;  %s7569_s6 = smov [#allocation50]  }
 0x2a8   :  { %5714 = vmatprep.subr.bf16.mxu0 %v7566_v0  ;;  %5726 = vmatprep.subr.bf16.mxu1 %v7566_v0  ;;  %v5981_v13 = vld [vmem:[#allocation11] sm:$0xff]   ;;  %v5983_v15 = vld [vmem:[#allocation11 + $0x8] sm:$0xff]   ;;  %v5984_v16 = vld [vmem:[#allocation10 + $0x10] sm:$0xff]   ;;  %s5061_s15 = sshll.u32 %s7569_s6, 4  ;;  %s5062_s15 = int_to_ptr.vmem [resolvable:$true] %s5061_s15 }
 0x2a9   :  { %v5985_v17 = vld [vmem:[#allocation11 + $0x10] sm:$0xff]   ;;  %v5986_v18 = vld [vmem:[#allocation10 + $0x18] sm:$0xff]   ;;  %v5988_v20 = vld [vmem:[#allocation10 + $0x20] sm:$0xff]   ;;  %p7439_p11 = scmp.lt.s32.totalorder %s5062_s15, %s5062_s15 }
 0x2aa   :  { %v541_v8 = vld [vmem:[%s8239_s8] sm:$0xff]  ;;  %v542_v9 = vld [vmem:[%s8239_s8 + $0x8] sm:$0xff]  ;;  %v5992_v24 = vld [vmem:[#allocation10 + $0x30] sm:$0xff]  }
 0x2ab   :  { %5715 = vmatpush3.bf16.msra.mxu0 %v5974_v3  ;;  %5727 = vmatpush3.bf16.msra.mxu1 %v5975_v4  ;;  %v543_v11 = vpack.c.bf16 %v542_v9, %v541_v8  ;;  %v5987_v19 = vld [vmem:[#allocation11 + $0x18] sm:$0xff]   ;;  %v5989_v21 = vld [vmem:[#allocation11 + $0x20] sm:$0xff]   ;;  %v5990_v22 = vld [vmem:[#allocation10 + $0x28] sm:$0xff]  }
 0x2ac   :  { %5716 = vmatprep.subr.bf16.mxu0 %v7566_v0  ;;  %5728 = vmatprep.subr.bf16.mxu1 %v7566_v0  ;;  %v5991_v23 = vld [vmem:[#allocation11 + $0x28] sm:$0xff]   ;;  %v5993_v25 = vld [vmem:[#allocation11 + $0x30] sm:$0xff]   ;;  %v5994_v26 = vld [vmem:[#allocation10 + $0x38] sm:$0xff]  }
 0x2ad   :  { %v5995_v27 = vld [vmem:[#allocation11 + $0x38] sm:$0xff]   ;;  %v5996_v50 = vld [vmem:[#allocation16] sm:$0xff]   ;;  %v5998_v53 = vld [vmem:[#allocation16 + $0x8] sm:$0xff]  }
 0x2ae   :  { %v5130_v28 = vld [vmem:[#allocation7] ss:$0 sm:$0xff]  ;;  %v5131_v30 = vld [vmem:[#allocation8] ss:$0 sm:$0xff]  ;;  %v5997_v51 = vld [vmem:[#allocation17] sm:$0xff]  }
 0x2af   :  { %5717 = vmatpush3.bf16.msra.mxu0 %v5976_v5  ;;  %5729 = vmatpush3.bf16.msra.mxu1 %v5977_v6  ;;  %v5999_v54 = vld [vmem:[#allocation17 + $0x8] sm:$0xff]   ;;  %v6000_v55 = vld [vmem:[#allocation16 + $0x10] sm:$0xff]   ;;  %v6002_v57 = vld [vmem:[#allocation16 + $0x18] sm:$0xff]  }
 0x2b0   :  { %5718 = vmatprep.subr.bf16.mxu0 %v7566_v0  ;;  %5730 = vmatprep.subr.bf16.mxu1 %v7566_v0  ;;  %v6001_v56 = vld [vmem:[#allocation17 + $0x10] sm:$0xff]   ;;  %v6003_v58 = vld [vmem:[#allocation17 + $0x18] sm:$0xff]   ;;  %v6004_v59 = vld [vmem:[#allocation16 + $0x20] sm:$0xff]  }
 0x2b1   :  { %v6005_v60 = vld [vmem:[#allocation17 + $0x20] sm:$0xff]   ;;  %v6006_v61 = vld [vmem:[#allocation16 + $0x28] sm:$0xff]   ;;  %v6008_v63 = vld [vmem:[#allocation16 + $0x30] sm:$0xff]  }
 0x2b2   :  { %v6007_v62 = vld [vmem:[#allocation17 + $0x28] sm:$0xff]   ;;  %v6009_v1 = vld [vmem:[#allocation17 + $0x30] sm:$0xff]   ;;  %v6010_v2 = vld [vmem:[#allocation16 + $0x38] sm:$0xff]  }
 0x2b3   :  { %5719 = vmatpush3.bf16.msra.mxu0 %v5978_v7  ;;  %5731 = vmatpush3.bf16.msra.mxu1 %v5979_v10  ;;  %v6011_v3 = vld [vmem:[#allocation17 + $0x38] sm:$0xff]  }
 0x2b4   :  { %5736 = vmatprep.subr.bf16.mxu0 %v7566_v0  ;;  %5756 = vmatprep.subr.bf16.mxu1 %v7566_v0  ;;  %v5145_v4 = vld [vmem:[#allocation13] ss:$0 sm:$0xff]  ;;  %v5146_v6 = vld [vmem:[#allocation14] ss:$0 sm:$0xff] }
 0x2b6   :  { %5721 = vmatmul.mubr.msk.bf16.vlgmr.msra.gmra.mrb[0].mxu0 %vm576_vm1, %v543_v11  ;;  %5733 = vmatmul.mubr.msk.bf16.vlgmr.msra.gmra.mrb[0].mxu1 %vm576_vm1, %v543_v11 }
 0x2b7   :  { %5737 = vmatpush3.bf16.msra.mxu0 %v5980_v12  ;;  %5757 = vmatpush3.bf16.msra.mxu1 %v5981_v13 }
 0x2b8   :  { %5738 = vmatprep.subr.bf16.mxu0 %v7566_v0  ;;  %5758 = vmatprep.subr.bf16.mxu1 %v7566_v0 }
 0x2b9   :  { %5752 = vmatprep.mubr.msk.bf16.mxu0 %vm7567_vm0, %v7566_v0  ;;  %5772 = vmatprep.mubr.msk.bf16.mxu1 %vm7567_vm0, %v7566_v0 }
 0x2bb   :  { %5739 = vmatpush3.bf16.msra.mxu0 %v5982_v14  ;;  %5759 = vmatpush3.bf16.msra.mxu1 %v5983_v15 }
 0x2bc   :  { %5740 = vmatprep.subr.bf16.mxu0 %v7566_v0  ;;  %5760 = vmatprep.subr.bf16.mxu1 %v7566_v0 }
 0x2bf   :  { %5741 = vmatpush3.bf16.msra.mxu0 %v5984_v16  ;;  %5761 = vmatpush3.bf16.msra.mxu1 %v5985_v17 }
 0x2c0   :  { %5742 = vmatprep.subr.bf16.mxu0 %v7566_v0  ;;  %5762 = vmatprep.subr.bf16.mxu1 %v7566_v0 }
 0x2c3   :  { %5743 = vmatpush3.bf16.msra.mxu0 %v5986_v18  ;;  %5763 = vmatpush3.bf16.msra.mxu1 %v5987_v19 }
 0x2c4   :  { %5744 = vmatprep.subr.bf16.mxu0 %v7566_v0  ;;  %5764 = vmatprep.subr.bf16.mxu1 %v7566_v0 }
 0x2c7   :  { %5745 = vmatpush3.bf16.msra.mxu0 %v5988_v20  ;;  %5765 = vmatpush3.bf16.msra.mxu1 %v5989_v21 }
 0x2c8   :  { %5746 = vmatprep.subr.bf16.mxu0 %v7566_v0  ;;  %5766 = vmatprep.subr.bf16.mxu1 %v7566_v0 }
 0x2cb   :  { %5747 = vmatpush3.bf16.msra.mxu0 %v5990_v22  ;;  %5767 = vmatpush3.bf16.msra.mxu1 %v5991_v23 }
 0x2cc   :  { %5748 = vmatprep.subr.bf16.mxu0 %v7566_v0  ;;  %5768 = vmatprep.subr.bf16.mxu1 %v7566_v0 }
 0x2cf   :  { %5749 = vmatpush3.bf16.msra.mxu0 %v5992_v24  ;;  %5769 = vmatpush3.bf16.msra.mxu1 %v5993_v25 }
 0x2d0   :  { %5750 = vmatprep.subr.bf16.mxu0 %v7566_v0  ;;  %5770 = vmatprep.subr.bf16.mxu1 %v7566_v0 }
 0x2d3   :  { %5751 = vmatpush3.bf16.msra.mxu0 %v5994_v26  ;;  %5771 = vmatpush3.bf16.msra.mxu1 %v5995_v27  ;;  %v6012_v26 = vld [vmem:[#allocation22] sm:$0xff]  }
 0x2d4   :  { %5776 = vmatprep.subr.bf16.mxu0 %v7566_v0  ;;  %5796 = vmatprep.subr.bf16.mxu1 %v7566_v0  ;;  %v6013_v27 = vld [vmem:[#allocation23] sm:$0xff]  }
 0x389   :  { %v614_v29 = vpop.f32.mrb[0].mxu0  ;;  %v705_v32 = vpop.f32.mrb[0].mxu1 }
 0x38a   :  { %v628_v31 = vmul.f32 %v5130_v28, %v614_v29  ;;  %v5722_v33 = vpop.f32.mrb[1].mxu0  ;;  %v712_v34 = vmul.f32 %v5130_v28, %v705_v32  ;;  %v5734_v35 = vpop.f32.mrb[1].mxu1  ;;  %v6014_v29 = vld [vmem:[#allocation22 + $0x8] sm:$0xff]   ;;  %v6017_v32 = vld [vmem:[#allocation23 + $0x10] sm:$0xff]  }
 0x38b   :  { %v617_v36 = vpop.f32.mrb[2].mxu0  ;;  %v708_v39 = vpop.f32.mrb[2].mxu1  ;;  %v6018_v33 = vld [vmem:[#allocation22 + $0x18] sm:$0xff]   ;;  %v6020_v35 = vld [vmem:[#allocation22 + $0x20] sm:$0xff]  }
 0x38c   :  { %v637_v37 = vadd.f32 %v5131_v30, %v628_v31  ;;  %v629_v38 = vmul.f32 %v5130_v28, %v617_v36  ;;  %v5723_v40 = vpop.f32.mrb[3].mxu0  ;;  %v714_v41 = vadd.f32 %v5131_v30, %v712_v34  ;;  %v713_v42 = vmul.f32 %v5130_v28, %v708_v39  ;;  %v5735_v43 = vpop.f32.mrb[3].mxu1  ;;  %v6016_v31 = vld [vmem:[#allocation22 + $0x10] sm:$0xff]   ;;  %v6019_v34 = vld [vmem:[#allocation23 + $0x18] sm:$0xff]   ;;  %v6021_v36 = vld [vmem:[#allocation23 + $0x20] sm:$0xff]  }
 0x38d   :  { %v6024_v39 = vld [vmem:[#allocation22 + $0x30] sm:$0xff]   ;;  %v6030_v43 = vld [vmem:[#allocation28 + $0x4] ss:$24 sps:$4 sm:$0xff]  }
 0x38e   :  { %v638_v44 = vadd.f32 %v5131_v30, %v629_v38  ;;  %v716_v45 = vmax.f32 %v637_v37, %v714_v41  ;;  %v715_v46 = vadd.f32 %v5131_v30, %v713_v42  ;;  %v6015_v30 = vld [vmem:[#allocation23 + $0x8] sm:$0xff]   ;;  %v6025_v40 = vld [vmem:[#allocation23 + $0x30] sm:$0xff]   ;;  %v6026_v41 = vld [vmem:[#allocation22 + $0x38] sm:$0xff]  }
 0x38f   :  { %v6022_v37 = vld [vmem:[#allocation22 + $0x28] sm:$0xff]   ;;  %v6027_v42 = vld [vmem:[#allocation23 + $0x38] sm:$0xff]  }
 0x390   :  { %v717_v47 = vmax.f32 %v638_v44, %v715_v46  ;;  %v718_v48 = vmax.f32 %v716_v45, 0.0  ;;  %v6023_v38 = vld [vmem:[#allocation23 + $0x28] sm:$0xff]   ;;  %v5163_v45 = vld [vmem:[#allocation19] ss:$0 sm:$0xff] }
 0x391   :  { %v6033_v44 = vld [vmem:[#allocation28 + $0xc] ss:$24 sps:$4 sm:$0xff]  }
 0x392   :  { %v719_v49 = vmax.f32 %v717_v47, 0.0  ;;  %v5164_v47 = vld [vmem:[#allocation20] ss:$0 sm:$0xff] }
 0x394   :  { %v720_v52 = vpack.c.bf16 %v719_v49, %v718_v48 }
 0x396   :  { %5753 = vmatmul.mubr.bf16.vlgmr.msra.gmra.mrb[4].mxu0 %v720_v52  ;;  %5773 = vmatmul.mubr.bf16.vlgmr.msra.gmra.mrb[4].mxu1 %v720_v52 }
 0x397   :  { %5777 = vmatpush3.bf16.msra.mxu0 %v5996_v50  ;;  %5797 = vmatpush3.bf16.msra.mxu1 %v5997_v51 }
 0x398   :  { %5778 = vmatprep.subr.bf16.mxu0 %v7566_v0  ;;  %5798 = vmatprep.subr.bf16.mxu1 %v7566_v0 }
 0x399   :  { %5792 = vmatprep.mubr.msk.bf16.mxu0 %vm7567_vm0, %v7566_v0  ;;  %5812 = vmatprep.mubr.msk.bf16.mxu1 %vm7567_vm0, %v7566_v0 }
 0x39b   :  { %5779 = vmatpush3.bf16.msra.mxu0 %v5998_v53  ;;  %5799 = vmatpush3.bf16.msra.mxu1 %v5999_v54 }
 0x39c   :  { %5780 = vmatprep.subr.bf16.mxu0 %v7566_v0  ;;  %5800 = vmatprep.subr.bf16.mxu1 %v7566_v0 }
 0x39f   :  { %5781 = vmatpush3.bf16.msra.mxu0 %v6000_v55  ;;  %5801 = vmatpush3.bf16.msra.mxu1 %v6001_v56 }
 0x3a0   :  { %5782 = vmatprep.subr.bf16.mxu0 %v7566_v0  ;;  %5802 = vmatprep.subr.bf16.mxu1 %v7566_v0 }
 0x3a3   :  { %5783 = vmatpush3.bf16.msra.mxu0 %v6002_v57  ;;  %5803 = vmatpush3.bf16.msra.mxu1 %v6003_v58 }
 0x3a4   :  { %5784 = vmatprep.subr.bf16.mxu0 %v7566_v0  ;;  %5804 = vmatprep.subr.bf16.mxu1 %v7566_v0 }
 0x3a7   :  { %5785 = vmatpush3.bf16.msra.mxu0 %v6004_v59  ;;  %5805 = vmatpush3.bf16.msra.mxu1 %v6005_v60 }
 0x3a8   :  { %5786 = vmatprep.subr.bf16.mxu0 %v7566_v0  ;;  %5806 = vmatprep.subr.bf16.mxu1 %v7566_v0 }
 0x3ab   :  { %5787 = vmatpush3.bf16.msra.mxu0 %v6006_v61  ;;  %5807 = vmatpush3.bf16.msra.mxu1 %v6007_v62 }
 0x3ac   :  { %5788 = vmatprep.subr.bf16.mxu0 %v7566_v0  ;;  %5808 = vmatprep.subr.bf16.mxu1 %v7566_v0 }
 0x3af   :  { %5789 = vmatpush3.bf16.msra.mxu0 %v6008_v63  ;;  %5809 = vmatpush3.bf16.msra.mxu1 %v6009_v1 }
 0x3b0   :  { %5790 = vmatprep.subr.bf16.mxu0 %v7566_v0  ;;  %5810 = vmatprep.subr.bf16.mxu1 %v7566_v0 }
 0x3b3   :  { %5791 = vmatpush3.bf16.msra.mxu0 %v6010_v2  ;;  %5811 = vmatpush3.bf16.msra.mxu1 %v6011_v3 }
 0x3b4   :  { %5816 = vmatprep.subr.bf16.mxu0 %v7566_v0  ;;  %5836 = vmatprep.subr.bf16.mxu1 %v7566_v0 }
 0x469   :  { %v819_v5 = vpop.f32.mrb[4].mxu0  ;;  %v942_v7 = vpop.f32.mrb[4].mxu1 }
 0x46a   :  { %v833_v8 = vmul.f32 %v5145_v4, %v819_v5  ;;  %v949_v9 = vmul.f32 %v5145_v4, %v942_v7  ;;  %v5754_v10 = vpop.f32.mrb[5].mxu0  ;;  %v5774_v11 = vpop.f32.mrb[5].mxu1  ;;  %v6031_v5 = vld [vmem:[#allocation28 + $0x8] ss:$24 sps:$4 sm:$0xff]   ;;  %v6036_v7 = vld [vmem:[#allocation28 + $0x34] ss:$24 sps:$4 sm:$0xff]  }
 0x46b   :  { %v822_v12 = vpop.f32.mrb[6].mxu0  ;;  %v945_v13 = vpop.f32.mrb[6].mxu1  ;;  %v6037_v10 = vld [vmem:[#allocation28 + $0x38] ss:$24 sps:$4 sm:$0xff]   ;;  %v6042_v11 = vld [vmem:[#allocation28 + $0x64] ss:$24 sps:$4 sm:$0xff]  }
 0x46c   :  { %v842_v14 = vadd.f32 %v5146_v6, %v833_v8  ;;  %v951_v15 = vadd.f32 %v5146_v6, %v949_v9  ;;  %v834_v16 = vmul.f32 %v5145_v4, %v822_v12  ;;  %v950_v17 = vmul.f32 %v5145_v4, %v945_v13  ;;  %v5755_v18 = vpop.f32.mrb[7].mxu0  ;;  %v5775_v19 = vpop.f32.mrb[7].mxu1  ;;  %v6028_v4 = vld [vmem:[#allocation28] ss:$24 sps:$4 sm:$0xff]   ;;  %v6039_v8 = vld [vmem:[#allocation28 + $0x3c] ss:$24 sps:$4 sm:$0xff]  }
 0x46d   :  { %v6034_v9 = vld [vmem:[#allocation28 + $0x30] ss:$24 sps:$4 sm:$0xff]   ;;  %v6045_v12 = vld [vmem:[#allocation28 + $0x6c] ss:$24 sps:$4 sm:$0xff]   ;;  %v6040_v13 = vld [vmem:[#allocation28 + $0x60] ss:$24 sps:$4 sm:$0xff]  }
 0x46e   :  { %v953_v20 = vmax.f32 %v842_v14, %v951_v15  ;;  %v843_v21 = vadd.f32 %v5146_v6, %v834_v16  ;;  %v952_v22 = vadd.f32 %v5146_v6, %v950_v17  ;;  %v6043_v14 = vld [vmem:[#allocation28 + $0x68] ss:$24 sps:$4 sm:$0xff]   ;;  %v6048_v15 = vld [vmem:[#allocation28 + $0x94] ss:$24 sps:$4 sm:$0xff]   ;;  %v6049_v18 = vld [vmem:[#allocation28 + $0x98] ss:$24 sps:$4 sm:$0xff]  }
 0x46f   :  { %v6051_v16 = vld [vmem:[#allocation28 + $0x9c] ss:$24 sps:$4 sm:$0xff]   ;;  %v6046_v17 = vld [vmem:[#allocation28 + $0x90] ss:$24 sps:$4 sm:$0xff]  }
 0x470   :  { %v954_v23 = vmax.f32 %v843_v21, %v952_v22  ;;  %v955_v24 = vmax.f32 %v953_v20, 0.0  ;;  %v6054_v19 = vld [vmem:[#allocation28 + $0xc4] ss:$24 sps:$4 sm:$0xff]   ;;  %v6052_v21 = vld [vmem:[#allocation28 + $0xc0] ss:$24 sps:$4 sm:$0xff]  }
 0x471   :  { %v6057_v20 = vld [vmem:[#allocation28 + $0xcc] ss:$24 sps:$4 sm:$0xff]   ;;  %v6055_v22 = vld [vmem:[#allocation28 + $0xc8] ss:$24 sps:$4 sm:$0xff]  }
 0x472   :  { %v956_v25 = vmax.f32 %v954_v23, 0.0  ;;  %v6060_v23 = vld [vmem:[#allocation28 + $0xf4] ss:$24 sps:$4 sm:$0xff]  }
 0x474   :  { %v957_v28 = vpack.c.bf16 %v956_v25, %v955_v24  ;;  %v6058_v24 = vld [vmem:[#allocation28 + $0xf0] ss:$24 sps:$4 sm:$0xff]   ;;  %v6063_v25 = vld [vmem:[#allocation28 + $0xfc] ss:$24 sps:$4 sm:$0xff]  }
 0x476   :  { %5793 = vmatmul.mubr.bf16.vlgmr.msra.gmra.mrb[8].mxu0 %v957_v28  ;;  %5813 = vmatmul.mubr.bf16.vlgmr.msra.gmra.mrb[8].mxu1 %v957_v28  ;;  %v6064_v28 = vld [vmem:[#allocation28 + $0x120] ss:$24 sps:$4 sm:$0xff]  }
 0x477   :  { %5817 = vmatpush3.bf16.msra.mxu0 %v6012_v26  ;;  %5837 = vmatpush3.bf16.msra.mxu1 %v6013_v27  ;;  %v6061_v26 = vld [vmem:[#allocation28 + $0xf8] ss:$24 sps:$4 sm:$0xff]   ;;  %v6066_v27 = vld [vmem:[#allocation28 + $0x124] ss:$24 sps:$4 sm:$0xff]  }
 0x478   :  { %5818 = vmatprep.subr.bf16.mxu0 %v7566_v0  ;;  %5838 = vmatprep.subr.bf16.mxu1 %v7566_v0 }
 0x479   :  { %5832 = vmatprep.mubr.msk.bf16.mxu0 %vm7567_vm0, %v7566_v0  ;;  %5852 = vmatprep.mubr.msk.bf16.mxu1 %vm7567_vm0, %v7566_v0 }
 0x47b   :  { %5819 = vmatpush3.bf16.msra.mxu0 %v6014_v29  ;;  %5839 = vmatpush3.bf16.msra.mxu1 %v6015_v30  ;;  %v6069_v29 = vld [vmem:[#allocation28 + $0x12c] ss:$24 sps:$4 sm:$0xff]   ;;  %v6067_v30 = vld [vmem:[#allocation28 + $0x128] ss:$24 sps:$4 sm:$0xff]  }
 0x47c   :  { %5820 = vmatprep.subr.bf16.mxu0 %v7566_v0  ;;  %5840 = vmatprep.subr.bf16.mxu1 %v7566_v0 }
 0x47f   :  { %5821 = vmatpush3.bf16.msra.mxu0 %v6016_v31  ;;  %5841 = vmatpush3.bf16.msra.mxu1 %v6017_v32  ;;  %v6072_v31 = vld [vmem:[#allocation28 + $0x154] ss:$24 sps:$4 sm:$0xff]   ;;  %v6070_v32 = vld [vmem:[#allocation28 + $0x150] ss:$24 sps:$4 sm:$0xff]  }
 0x480   :  { %5822 = vmatprep.subr.bf16.mxu0 %v7566_v0  ;;  %5842 = vmatprep.subr.bf16.mxu1 %v7566_v0 }
 0x483   :  { %5823 = vmatpush3.bf16.msra.mxu0 %v6018_v33  ;;  %5843 = vmatpush3.bf16.msra.mxu1 %v6019_v34  ;;  %v6075_v33 = vld [vmem:[#allocation28 + $0x15c] ss:$24 sps:$4 sm:$0xff]   ;;  %v6073_v34 = vld [vmem:[#allocation28 + $0x158] ss:$24 sps:$4 sm:$0xff]  }
 0x484   :  { %5824 = vmatprep.subr.bf16.mxu0 %v7566_v0  ;;  %5844 = vmatprep.subr.bf16.mxu1 %v7566_v0 }
 0x487   :  { %5825 = vmatpush3.bf16.msra.mxu0 %v6020_v35  ;;  %5845 = vmatpush3.bf16.msra.mxu1 %v6021_v36  ;;  %v6078_v35 = vld [vmem:[#allocation28 + $0x14] ss:$24 sps:$4 sm:$0xff]   ;;  %v7568_v36 = vmov 0  }
 0x488   :  { %5826 = vmatprep.subr.bf16.mxu0 %v7566_v0  ;;  %5846 = vmatprep.subr.bf16.mxu1 %v7566_v0 }
 0x48b   :  { %5827 = vmatpush3.bf16.msra.mxu0 %v6022_v37  ;;  %5847 = vmatpush3.bf16.msra.mxu1 %v6023_v38  ;;  %v5181_v37 = vld [vmem:[#allocation25] ss:$0 sm:$0xff] }
 0x48c   :  { %5828 = vmatprep.subr.bf16.mxu0 %v7566_v0  ;;  %5848 = vmatprep.subr.bf16.mxu1 %v7566_v0 }
 0x48f   :  { %5829 = vmatpush3.bf16.msra.mxu0 %v6024_v39  ;;  %5849 = vmatpush3.bf16.msra.mxu1 %v6025_v40  ;;  %v5182_v39 = vld [vmem:[#allocation26] ss:$0 sm:$0xff] }
 0x490   :  { %5830 = vmatprep.subr.bf16.mxu0 %v7566_v0  ;;  %5850 = vmatprep.subr.bf16.mxu1 %v7566_v0 }
 0x493   :  { %5831 = vmatpush3.bf16.msra.mxu0 %v6026_v41  ;;  %5851 = vmatpush3.bf16.msra.mxu1 %v6027_v42 }
 0x494   :  { %1752 = vmatprep.subr.bf16.mxu0 %v6030_v43  ;;  %1795 = vmatprep.subr.bf16.mxu1 %v6033_v44 }
 0x549   :  { %v1056_v46 = vpop.f32.mrb[8].mxu0  ;;  %v1179_v48 = vpop.f32.mrb[8].mxu1 }
 0x54a   :  { %v1070_v49 = vmul.f32 %v5163_v45, %v1056_v46  ;;  %v1186_v50 = vmul.f32 %v5163_v45, %v1179_v48  ;;  %v5794_v51 = vpop.f32.mrb[9].mxu0  ;;  %v5814_v52 = vpop.f32.mrb[9].mxu1 }
 0x54b   :  { %v1059_v53 = vpop.f32.mrb[10].mxu0  ;;  %v1182_v54 = vpop.f32.mrb[10].mxu1 }
 0x54c   :  { %v1079_v55 = vadd.f32 %v5164_v47, %v1070_v49  ;;  %v1188_v56 = vadd.f32 %v5164_v47, %v1186_v50  ;;  %v1071_v57 = vmul.f32 %v5163_v45, %v1059_v53  ;;  %v1187_v58 = vmul.f32 %v5163_v45, %v1182_v54  ;;  %v5795_v59 = vpop.f32.mrb[11].mxu0  ;;  %v5815_v60 = vpop.f32.mrb[11].mxu1 }
 0x54d   :  { %v6076_v59 = vld [vmem:[#allocation28 + $0x10] ss:$24 sps:$4 sm:$0xff]  }
 0x54e   :  { %v1190_v61 = vmax.f32 %v1079_v55, %v1188_v56  ;;  %v1080_v62 = vadd.f32 %v5164_v47, %v1071_v57  ;;  %v1189_v63 = vadd.f32 %v5164_v47, %v1187_v58 }
 0x550   :  { %v1191_v1 = vmax.f32 %v1080_v62, %v1189_v63  ;;  %v1192_v2 = vmax.f32 %v1190_v61, 0.0  ;;  %v6081_v61 = vld [vmem:[#allocation28 + $0x44] ss:$24 sps:$4 sm:$0xff]   ;;  %v6079_v62 = vld [vmem:[#allocation28 + $0x40] ss:$24 sps:$4 sm:$0xff]  }
 0x551   :  { %v6084_v63 = vld [vmem:[#allocation28 + $0x74] ss:$24 sps:$4 sm:$0xff]  }
 0x552   :  { %v1193_v3 = vmax.f32 %v1191_v1, 0.0  ;;  %v6082_v1 = vld [vmem:[#allocation28 + $0x70] ss:$24 sps:$4 sm:$0xff]  }
 0x554   :  { %v1194_v6 = vpack.c.bf16 %v1193_v3, %v1192_v2  ;;  %v6087_v2 = vld [vmem:[#allocation28 + $0xa4] ss:$24 sps:$4 sm:$0xff]   ;;  %v6085_v3 = vld [vmem:[#allocation28 + $0xa0] ss:$24 sps:$4 sm:$0xff]  }
 0x556   :  { %5833 = vmatmul.mubr.bf16.vlgmr.msra.gmra.mrb[12].mxu0 %v1194_v6  ;;  %5853 = vmatmul.mubr.bf16.vlgmr.msra.gmra.mrb[12].mxu1 %v1194_v6  ;;  %v6093_v6 = vld [vmem:[#allocation28 + $0x104] ss:$24 sps:$4 sm:$0xff]  }
 0x557   :  { %1753 = vmatpush1.bf16.msra.mxu0 %v6028_v4  ;;  %1796 = vmatpush1.bf16.msra.mxu1 %v6031_v5  ;;  %v6090_v4 = vld [vmem:[#allocation28 + $0xd4] ss:$24 sps:$4 sm:$0xff]   ;;  %v6088_v5 = vld [vmem:[#allocation28 + $0xd0] ss:$24 sps:$4 sm:$0xff]  }
 0x558   :  { %1754 = vmatprep.subr.bf16.mxu0 %v6036_v7  ;;  %1797 = vmatprep.subr.bf16.mxu1 %v6039_v8  ;;  %v6091_v7 = vld [vmem:[#allocation28 + $0x100] ss:$24 sps:$4 sm:$0xff]   ;;  %v6096_v8 = vld [vmem:[#allocation28 + $0x134] ss:$24 sps:$4 sm:$0xff]  }
 0x559   :  { %1784 = vmatprep.mubr.bf16.mxu0 %v7568_v36  ;;  %1827 = vmatprep.mubr.bf16.mxu1 %v7568_v36 }
 0x55b   :  { %1755 = vmatpush1.bf16.msra.mxu0 %v6034_v9  ;;  %1798 = vmatpush1.bf16.msra.mxu1 %v6037_v10  ;;  %v6094_v9 = vld [vmem:[#allocation28 + $0x130] ss:$24 sps:$4 sm:$0xff]   ;;  %v6099_v10 = vld [vmem:[#allocation28 + $0x164] ss:$24 sps:$4 sm:$0xff]  }
 0x55c   :  { %1756 = vmatprep.subr.bf16.mxu0 %v6042_v11  ;;  %1799 = vmatprep.subr.bf16.mxu1 %v6045_v12  ;;  %v6097_v11 = vld [vmem:[#allocation28 + $0x160] ss:$24 sps:$4 sm:$0xff]  }
 0x55d   :  { %v6102_v12 = vld [vmem:[#allocation31 + $0x4] ss:$24 sps:$4 sm:$0xff]  }
 0x55f   :  { %1757 = vmatpush1.bf16.msra.mxu0 %v6040_v13  ;;  %1800 = vmatpush1.bf16.msra.mxu1 %v6043_v14  ;;  %v6100_v13 = vld [vmem:[#allocation31] ss:$24 sps:$4 sm:$0xff]   ;;  %v6105_v14 = vld [vmem:[#allocation31 + $0xc] ss:$24 sps:$4 sm:$0xff]  }
 0x560   :  { %1758 = vmatprep.subr.bf16.mxu0 %v6048_v15  ;;  %1801 = vmatprep.subr.bf16.mxu1 %v6051_v16  ;;  %v6103_v15 = vld [vmem:[#allocation31 + $0x8] ss:$24 sps:$4 sm:$0xff]   ;;  %v6108_v16 = vld [vmem:[#allocation31 + $0x34] ss:$24 sps:$4 sm:$0xff]  }
 0x563   :  { %1759 = vmatpush1.bf16.msra.mxu0 %v6046_v17  ;;  %1802 = vmatpush1.bf16.msra.mxu1 %v6049_v18  ;;  %v6106_v17 = vld [vmem:[#allocation31 + $0x30] ss:$24 sps:$4 sm:$0xff]   ;;  %v6111_v18 = vld [vmem:[#allocation31 + $0x3c] ss:$24 sps:$4 sm:$0xff]  }
 0x564   :  { %1760 = vmatprep.subr.bf16.mxu0 %v6054_v19  ;;  %1803 = vmatprep.subr.bf16.mxu1 %v6057_v20  ;;  %v6109_v19 = vld [vmem:[#allocation31 + $0x38] ss:$24 sps:$4 sm:$0xff]   ;;  %v6114_v20 = vld [vmem:[#allocation31 + $0x64] ss:$24 sps:$4 sm:$0xff]  }
 0x567   :  { %1761 = vmatpush1.bf16.msra.mxu0 %v6052_v21  ;;  %1804 = vmatpush1.bf16.msra.mxu1 %v6055_v22  ;;  %v6112_v21 = vld [vmem:[#allocation31 + $0x60] ss:$24 sps:$4 sm:$0xff]   ;;  %v6117_v22 = vld [vmem:[#allocation31 + $0x6c] ss:$24 sps:$4 sm:$0xff]  }
 0x568   :  { %1762 = vmatprep.subr.bf16.mxu0 %v6060_v23  ;;  %1805 = vmatprep.subr.bf16.mxu1 %v6063_v25  ;;  %v6115_v23 = vld [vmem:[#allocation31 + $0x68] ss:$24 sps:$4 sm:$0xff]  }
 0x569   :  { %v6118_v25 = vld [vmem:[#allocation31 + $0x90] ss:$24 sps:$4 sm:$0xff]  }
 0x56b   :  { %1763 = vmatpush1.bf16.msra.mxu0 %v6058_v24  ;;  %1806 = vmatpush1.bf16.msra.mxu1 %v6061_v26  ;;  %v6120_v24 = vld [vmem:[#allocation31 + $0x94] ss:$24 sps:$4 sm:$0xff]  }
 0x56c   :  { %1764 = vmatprep.subr.bf16.mxu0 %v6066_v27  ;;  %1807 = vmatprep.subr.bf16.mxu1 %v6069_v29  ;;  %v6123_v26 = vld [vmem:[#allocation31 + $0x9c] ss:$24 sps:$4 sm:$0xff]   ;;  %v6121_v27 = vld [vmem:[#allocation31 + $0x98] ss:$24 sps:$4 sm:$0xff]  }
 0x56d   :  { %v6124_v29 = vld [vmem:[#allocation31 + $0xc0] ss:$24 sps:$4 sm:$0xff]  }
 0x56f   :  { %1765 = vmatpush1.bf16.msra.mxu0 %v6064_v28  ;;  %1808 = vmatpush1.bf16.msra.mxu1 %v6067_v30  ;;  %v6126_v28 = vld [vmem:[#allocation31 + $0xc4] ss:$24 sps:$4 sm:$0xff]  }
 0x570   :  { %1766 = vmatprep.subr.bf16.mxu0 %v6072_v31  ;;  %1809 = vmatprep.subr.bf16.mxu1 %v6075_v33  ;;  %v6129_v30 = vld [vmem:[#allocation31 + $0xcc] ss:$24 sps:$4 sm:$0xff]   ;;  %v6127_v31 = vld [vmem:[#allocation31 + $0xc8] ss:$24 sps:$4 sm:$0xff]  }
 0x571   :  { %v6130_v33 = vld [vmem:[#allocation31 + $0xf0] ss:$24 sps:$4 sm:$0xff]  }
 0x573   :  { %1767 = vmatpush1.bf16.msra.mxu0 %v6070_v32  ;;  %1810 = vmatpush1.bf16.msra.mxu1 %v6073_v34  ;;  %v6132_v32 = vld [vmem:[#allocation31 + $0xf4] ss:$24 sps:$4 sm:$0xff]  }
 0x574   :  { %1838 = vmatprep.subr.bf16.mxu0 %v6078_v35  ;;  %2555 = vmatprep.subr.bf16.mxu1 %v6102_v12  ;;  %v6135_v34 = vld [vmem:[#allocation31 + $0xfc] ss:$24 sps:$4 sm:$0xff]   ;;  %v6133_v35 = vld [vmem:[#allocation31 + $0xf8] ss:$24 sps:$4 sm:$0xff]  }
 0x575   :  { %v6190_v12 = vld [vmem:[#allocation31 + $0x2d0] ss:$24 sps:$4 sm:$0xff]  }
 0x629   :  { %v1293_v38 = vpop.f32.mrb[12].mxu0  ;;  %v1416_v40 = vpop.f32.mrb[12].mxu1 }
 0x62a   :  { %v1307_v41 = vmul.f32 %v5181_v37, %v1293_v38  ;;  %v1423_v42 = vmul.f32 %v5181_v37, %v1416_v40  ;;  %v5834_v43 = vpop.f32.mrb[13].mxu0  ;;  %v5854_v44 = vpop.f32.mrb[13].mxu1  ;;  %v6136_v38 = vld [vmem:[#allocation31 + $0x120] ss:$24 sps:$4 sm:$0xff]  }
 0x62b   :  { %v1296_v45 = vpop.f32.mrb[14].mxu0  ;;  %v1419_v46 = vpop.f32.mrb[14].mxu1  ;;  %v6139_v40 = vld [vmem:[#allocation31 + $0x128] ss:$24 sps:$4 sm:$0xff]   ;;  %v6145_v44 = vld [vmem:[#allocation31 + $0x158] ss:$24 sps:$4 sm:$0xff]  }
 0x62c   :  { %v1316_v47 = vadd.f32 %v5182_v39, %v1307_v41  ;;  %v1425_v48 = vadd.f32 %v5182_v39, %v1423_v42  ;;  %v1308_v49 = vmul.f32 %v5181_v37, %v1296_v45  ;;  %v1424_v50 = vmul.f32 %v5181_v37, %v1419_v46  ;;  %v5835_v51 = vpop.f32.mrb[15].mxu0  ;;  %v5855_v52 = vpop.f32.mrb[15].mxu1  ;;  %v6138_v37 = vld [vmem:[#allocation31 + $0x124] ss:$24 sps:$4 sm:$0xff]   ;;  %v6144_v41 = vld [vmem:[#allocation31 + $0x154] ss:$24 sps:$4 sm:$0xff]  }
 0x62d   :  { %v6147_v42 = vld [vmem:[#allocation31 + $0x15c] ss:$24 sps:$4 sm:$0xff]   ;;  %v6142_v43 = vld [vmem:[#allocation31 + $0x150] ss:$24 sps:$4 sm:$0xff]   ;;  %v6148_v46 = vld [vmem:[#allocation31 + $0x180] ss:$24 sps:$4 sm:$0xff]  }
 0x62e   :  { %v1427_v53 = vmax.f32 %v1316_v47, %v1425_v48  ;;  %v1317_v54 = vadd.f32 %v5182_v39, %v1308_v49  ;;  %v1426_v55 = vadd.f32 %v5182_v39, %v1424_v50  ;;  %v6141_v39 = vld [vmem:[#allocation31 + $0x12c] ss:$24 sps:$4 sm:$0xff]   ;;  %v6151_v48 = vld [vmem:[#allocation31 + $0x188] ss:$24 sps:$4 sm:$0xff]   ;;  %v6159_v51 = vld [vmem:[#allocation31 + $0x1bc] ss:$24 sps:$4 sm:$0xff]  }
 0x62f   :  { %v6150_v45 = vld [vmem:[#allocation31 + $0x184] ss:$24 sps:$4 sm:$0xff]   ;;  %v6156_v49 = vld [vmem:[#allocation31 + $0x1b4] ss:$24 sps:$4 sm:$0xff]   ;;  %v6154_v50 = vld [vmem:[#allocation31 + $0x1b0] ss:$24 sps:$4 sm:$0xff]  }
 0x630   :  { %v1428_v56 = vmax.f32 %v1317_v54, %v1426_v55  ;;  %v1429_v57 = vmax.f32 %v1427_v53, 0.0  ;;  %v6153_v47 = vld [vmem:[#allocation31 + $0x18c] ss:$24 sps:$4 sm:$0xff]   ;;  %v6157_v52 = vld [vmem:[#allocation31 + $0x1b8] ss:$24 sps:$4 sm:$0xff]  }
 0x631   :  { %v6162_v53 = vld [vmem:[#allocation31 + $0x1e4] ss:$24 sps:$4 sm:$0xff]   ;;  %v6160_v54 = vld [vmem:[#allocation31 + $0x1e0] ss:$24 sps:$4 sm:$0xff]  }
 0x632   :  { %v1430_v58 = vmax.f32 %v1428_v56, 0.0  ;;  %v6165_v55 = vld [vmem:[#allocation31 + $0x1ec] ss:$24 sps:$4 sm:$0xff]   ;;  %v6163_v56 = vld [vmem:[#allocation31 + $0x1e8] ss:$24 sps:$4 sm:$0xff]  }
 0x634   :  { %v1431_v60 = vpack.c.bf16 %v1430_v58, %v1429_v57  ;;  %v6168_v57 = vld [vmem:[#allocation31 + $0x214] ss:$24 sps:$4 sm:$0xff]   ;;  %v6166_v58 = vld [vmem:[#allocation31 + $0x210] ss:$24 sps:$4 sm:$0xff]  }
 0x636   :  { %1785 = vmatmul.mubr.bf16.vlgmr.msra.gmra.mrb[16].mxu0 %v1431_v60  ;;  %1828 = vmatmul.mubr.bf16.vlgmr.msra.gmra.mrb[16].mxu1 %v1431_v60 }
 0x637   :  { %1839 = vmatpush1.bf16.msra.mxu0 %v6076_v59  ;;  %1870 = vmatprep.mubr.bf16.mxu0 %v7568_v36  ;;  %v6171_v59 = vld [vmem:[#allocation31 + $0x21c] ss:$24 sps:$4 sm:$0xff]  }
 0x638   :  { %1840 = vmatprep.subr.bf16.mxu0 %v6081_v61  ;;  %2556 = vmatpush1.bf16.msra.mxu1 %v6100_v13  ;;  %v6172_v61 = vld [vmem:[#allocation31 + $0x240] ss:$24 sps:$4 sm:$0xff]  }
 0x639   :  { %2557 = vmatprep.subr.bf16.mxu1 %v6108_v16  ;;  %v6193_v13 = vld [vmem:[#allocation31 + $0x2d8] ss:$24 sps:$4 sm:$0xff]  }
 0x63b   :  { %1841 = vmatpush1.bf16.msra.mxu0 %v6079_v62  ;;  %v6174_v62 = vld [vmem:[#allocation31 + $0x244] ss:$24 sps:$4 sm:$0xff]  }
 0x63c   :  { %1842 = vmatprep.subr.bf16.mxu0 %v6084_v63  ;;  %2558 = vmatpush1.bf16.msra.mxu1 %v6106_v17  ;;  %v6175_v63 = vld [vmem:[#allocation31 + $0x248] ss:$24 sps:$4 sm:$0xff]  }
 0x63d   :  { %2559 = vmatprep.subr.bf16.mxu1 %v6114_v20 }
 0x63f   :  { %1843 = vmatpush1.bf16.msra.mxu0 %v6082_v1  ;;  %v6177_v1 = vld [vmem:[#allocation31 + $0x24c] ss:$24 sps:$4 sm:$0xff]  }
 0x640   :  { %1844 = vmatprep.subr.bf16.mxu0 %v6087_v2  ;;  %2560 = vmatpush1.bf16.msra.mxu1 %v6112_v21  ;;  %v6180_v2 = vld [vmem:[#allocation31 + $0x274] ss:$24 sps:$4 sm:$0xff]  }
 0x641   :  { %2561 = vmatprep.subr.bf16.mxu1 %v6120_v24 }
 0x643   :  { %1845 = vmatpush1.bf16.msra.mxu0 %v6085_v3  ;;  %v6183_v3 = vld [vmem:[#allocation31 + $0x27c] ss:$24 sps:$4 sm:$0xff]  }
 0x644   :  { %1846 = vmatprep.subr.bf16.mxu0 %v6090_v4  ;;  %2562 = vmatpush1.bf16.msra.mxu1 %v6118_v25  ;;  %v6178_v4 = vld [vmem:[#allocation31 + $0x270] ss:$24 sps:$4 sm:$0xff]  }
 0x645   :  { %2563 = vmatprep.subr.bf16.mxu1 %v6126_v28 }
 0x647   :  { %1847 = vmatpush1.bf16.msra.mxu0 %v6088_v5  ;;  %v6181_v5 = vld [vmem:[#allocation31 + $0x278] ss:$24 sps:$4 sm:$0xff]  }
 0x648   :  { %1848 = vmatprep.subr.bf16.mxu0 %v6093_v6  ;;  %2564 = vmatpush1.bf16.msra.mxu1 %v6124_v29  ;;  %v6186_v6 = vld [vmem:[#allocation31 + $0x2a4] ss:$24 sps:$4 sm:$0xff]  }
 0x649   :  { %2565 = vmatprep.subr.bf16.mxu1 %v6132_v32 }
 0x64b   :  { %1849 = vmatpush1.bf16.msra.mxu0 %v6091_v7  ;;  %v6189_v7 = vld [vmem:[#allocation31 + $0x2ac] ss:$24 sps:$4 sm:$0xff]  }
 0x64c   :  { %1850 = vmatprep.subr.bf16.mxu0 %v6096_v8  ;;  %2566 = vmatpush1.bf16.msra.mxu1 %v6130_v33  ;;  %v6184_v8 = vld [vmem:[#allocation31 + $0x2a0] ss:$24 sps:$4 sm:$0xff]  }
 0x64d   :  { %2567 = vmatprep.subr.bf16.mxu1 %v6138_v37 }
 0x64f   :  { %1851 = vmatpush1.bf16.msra.mxu0 %v6094_v9  ;;  %v6187_v9 = vld [vmem:[#allocation31 + $0x2a8] ss:$24 sps:$4 sm:$0xff]  }
 0x650   :  { %1852 = vmatprep.subr.bf16.mxu0 %v6099_v10  ;;  %2568 = vmatpush1.bf16.msra.mxu1 %v6136_v38  ;;  %v6192_v10 = vld [vmem:[#allocation31 + $0x2d4] ss:$24 sps:$4 sm:$0xff]  }
 0x651   :  { %2569 = vmatprep.subr.bf16.mxu1 %v6144_v41 }
 0x653   :  { %1853 = vmatpush1.bf16.msra.mxu0 %v6097_v11  ;;  %v6195_v11 = vld [vmem:[#allocation31 + $0x2dc] ss:$24 sps:$4 sm:$0xff]  }
 0x654   :  { %2598 = vmatprep.subr.bf16.mxu0 %v6105_v14  ;;  %2570 = vmatpush1.bf16.msra.mxu1 %v6142_v43  ;;  %v6198_v14 = vld [vmem:[#allocation31 + $0x14] ss:$24 sps:$4 sm:$0xff]  }
 0x655   :  { %2571 = vmatprep.subr.bf16.mxu1 %v6150_v45 }
 0x656   :  { %1871 = vmatmul.mubr.bf16.vlgmr.msra.gmra.mrb[20].mxu0 %v1431_v60  ;;  %v6169_v60 = vld [vmem:[#allocation31 + $0x218] ss:$24 sps:$4 sm:$0xff]  }
 0x657   :  { %2599 = vmatpush1.bf16.msra.mxu0 %v6103_v15  ;;  %v1482_v15 = vlaneseq }
 0x658   :  { %2600 = vmatprep.subr.bf16.mxu0 %v6111_v18  ;;  %2572 = vmatpush1.bf16.msra.mxu1 %v6148_v46  ;;  %v1480_v18 = vld [vmem:[#allocation29] sm:$0x3f] }
 0x659   :  { %2573 = vmatprep.subr.bf16.mxu1 %v6156_v49  ;;  %v1483_v16 = vshrl.u32 %v1482_v15, 7 }
 0x65b   :  { %2601 = vmatpush1.bf16.msra.mxu0 %v6109_v19  ;;  %v8055_v17 = vsub.s32 0, %v1483_v16  ;;  %v8057_v19 = vsub.s32 1, %v1483_v16  ;;  %v8063_v38 = vsub.s32 3, %v1483_v16 }
 0x65c   :  { %2602 = vmatprep.subr.bf16.mxu0 %v6117_v22  ;;  %2574 = vmatpush1.bf16.msra.mxu1 %v6154_v50 }
 0x65d   :  { %2575 = vmatprep.subr.bf16.mxu1 %v6162_v53  ;;  %v1485_v24 = vrot.slane %v1480_v18, %v8055_v17 }
 0x65f   :  { %2603 = vmatpush1.bf16.msra.mxu0 %v6115_v23 }
 0x660   :  { %2604 = vmatprep.subr.bf16.mxu0 %v6123_v26  ;;  %2576 = vmatpush1.bf16.msra.mxu1 %v6160_v54 }
 0x661   :  { %2577 = vmatprep.subr.bf16.mxu1 %v6168_v57 }
 0x663   :  { %2605 = vmatpush1.bf16.msra.mxu0 %v6121_v27  ;;  %v1489_v27 = vrot.slane %v1480_v18, %v8057_v19 }
 0x664   :  { %2606 = vmatprep.subr.bf16.mxu0 %v6129_v30  ;;  %2578 = vmatpush1.bf16.msra.mxu1 %v6166_v58 }
 0x665   :  { %2579 = vmatprep.subr.bf16.mxu1 %v6174_v62 }
 0x667   :  { %2607 = vmatpush1.bf16.msra.mxu0 %v6127_v31 }
 0x668   :  { %2608 = vmatprep.subr.bf16.mxu0 %v6135_v34  ;;  %2580 = vmatpush1.bf16.msra.mxu1 %v6172_v61 }
 0x669   :  { %2581 = vmatprep.subr.bf16.mxu1 %v6180_v2 }
 0x66b   :  { %2609 = vmatpush1.bf16.msra.mxu0 %v6133_v35  ;;  %v8061_v35 = vsub.s32 2, %v1483_v16 }
 0x66c   :  { %2610 = vmatprep.subr.bf16.mxu0 %v6141_v39  ;;  %2582 = vmatpush1.bf16.msra.mxu1 %v6178_v4 }
 0x66d   :  { %2583 = vmatprep.subr.bf16.mxu1 %v6186_v6  ;;  %v1493_v41 = vrot.slane %v1480_v18, %v8061_v35 }
 0x66f   :  { %2611 = vmatpush1.bf16.msra.mxu0 %v6139_v40 }
 0x670   :  { %2612 = vmatprep.subr.bf16.mxu0 %v6147_v42  ;;  %2584 = vmatpush1.bf16.msra.mxu1 %v6184_v8  ;;  %v1497_v42 = vrot.slane %v1480_v18, %v8063_v38 }
 0x671   :  { %2585 = vmatprep.subr.bf16.mxu1 %v6192_v10 }
 0x673   :  { %2613 = vmatpush1.bf16.msra.mxu0 %v6145_v44 }
 0x674   :  { %2614 = vmatprep.subr.bf16.mxu0 %v6153_v47  ;;  %2586 = vmatpush1.bf16.msra.mxu1 %v6190_v12 }
 0x675   :  { %2641 = vmatprep.subr.bf16.mxu1 %v6198_v14 }
 0x677   :  { %2615 = vmatpush1.bf16.msra.mxu0 %v6151_v48 }
 0x678   :  { %2616 = vmatprep.subr.bf16.mxu0 %v6159_v51 }
 0x67b   :  { %2617 = vmatpush1.bf16.msra.mxu0 %v6157_v52  ;;  %v8067_v52 = vsub.s32 4, %v1483_v16 }
 0x67c   :  { %2618 = vmatprep.subr.bf16.mxu0 %v6165_v55  ;;  %v8069_v55 = vsub.s32 5, %v1483_v16 }
 0x67e   :  { %v1505_v62 = vrot.slane %v1480_v18, %v8069_v55 }
 0x67f   :  { %2619 = vmatpush1.bf16.msra.mxu0 %v6163_v56 }
 0x680   :  { %2620 = vmatprep.subr.bf16.mxu0 %v6171_v59 }
 0x683   :  { %2621 = vmatpush1.bf16.msra.mxu0 %v6169_v60  ;;  %v1501_v60 = vrot.slane %v1480_v18, %v8067_v52 }
 0x684   :  { %2622 = vmatprep.subr.bf16.mxu0 %v6177_v1 }
 0x687   :  { %2623 = vmatpush1.bf16.msra.mxu0 %v6175_v63 }
 0x688   :  { %2624 = vmatprep.subr.bf16.mxu0 %v6183_v3 }
 0x68b   :  { %2625 = vmatpush1.bf16.msra.mxu0 %v6181_v5 }
 0x68c   :  { %2626 = vmatprep.subr.bf16.mxu0 %v6189_v7 }
 0x68f   :  { %2627 = vmatpush1.bf16.msra.mxu0 %v6187_v9 }
 0x690   :  { %2628 = vmatprep.subr.bf16.mxu0 %v6195_v11 }
 0x693   :  { %2629 = vmatpush1.bf16.msra.mxu0 %v6193_v13 }
 0x709   :  { %v1786_v20 = vpop.f32.mrb[16].mxu0  ;;  %v1829_v21 = vpop.f32.mrb[16].mxu1 }
 0x70a   :  { %v1788_v22 = vpop.f32.mrb[17].mxu0  ;;  %v1831_v23 = vpop.f32.mrb[17].mxu1  ;;  %v1787_v30 = vadd.f32 %v1786_v20, %v1485_v24  ;;  %v1830_v43 = vadd.f32 %v1829_v21, %v1493_v41 }
 0x70b   :  { %v1790_v25 = vpop.f32.mrb[18].mxu0  ;;  %v1833_v26 = vpop.f32.mrb[18].mxu1  ;;  %v1789_v31 = vadd.f32 %v1788_v22, %v1489_v27  ;;  %v1832_v44 = vadd.f32 %v1831_v23, %v1497_v42 }
 0x70c   :  { %v1792_v28 = vpop.f32.mrb[19].mxu0  ;;  %v1835_v29 = vpop.f32.mrb[19].mxu1  ;;  %v1791_v32 = vadd.f32 %v1790_v25, %v1485_v24  ;;  %v5239_v34 = vmul.f32 -1.442695, %v1787_v30  ;;  %v1834_v45 = vadd.f32 %v1833_v26, %v1493_v41  ;;  %v5241_v47 = vmul.f32 -1.442695, %v1830_v43 }
 0x70d   :  { %v1793_v33 = vadd.f32 %v1792_v28, %v1489_v27  ;;  %v5240_v37 = vmul.f32 -1.442695, %v1789_v31  ;;  %v1836_v46 = vadd.f32 %v1835_v29, %v1497_v42  ;;  %v5242_v49 = vmul.f32 -1.442695, %v1832_v44 }
 0x70e   :  { %v5243_v39 = vmul.f32 -1.442695, %v1791_v32  ;;  %6608 = vpow2.f32 %v5239_v34  ;;  %v5245_v51 = vmul.f32 -1.442695, %v1834_v45 }
 0x70f   :  { %v5244_v40 = vmul.f32 -1.442695, %v1793_v33  ;;  %6610 = vpow2.f32 %v5240_v37  ;;  %v5246_v54 = vmul.f32 -1.442695, %v1836_v46 }
 0x710   :  { %6612 = vpow2.f32 %v5243_v39 }
 0x711   :  { %6614 = vpow2.f32 %v5244_v40 }
 0x712   :  { %6616 = vpow2.f32 %v5241_v47  ;;  %v6196_v47 = vld [vmem:[#allocation31 + $0x10] ss:$24 sps:$4 sm:$0xff]  }
 0x713   :  { %6618 = vpow2.f32 %v5242_v49  ;;  %v6199_v49 = vld [vmem:[#allocation31 + $0x40] ss:$24 sps:$4 sm:$0xff]  }
 0x714   :  { %6620 = vpow2.f32 %v5245_v51  ;;  %v6202_v51 = vld [vmem:[#allocation31 + $0x70] ss:$24 sps:$4 sm:$0xff]  }
 0x715   :  { %6622 = vpow2.f32 %v5246_v54  ;;  %v6205_v54 = vld [vmem:[#allocation31 + $0xa0] ss:$24 sps:$4 sm:$0xff]  }
 0x718   :  { %v6609_v48 = vpop.eup %6608 }
 0x719   :  { %v6611_v50 = vpop.eup %6610  ;;  %v1905_v57 = vadd.f32 1.0, %v6609_v48  ;;  %v6201_v48 = vld [vmem:[#allocation31 + $0x44] ss:$24 sps:$4 sm:$0xff]  }
 0x71a   :  { %v6613_v53 = vpop.eup %6612  ;;  %v1906_v58 = vadd.f32 1.0, %v6611_v50  ;;  %v6204_v50 = vld [vmem:[#allocation31 + $0x74] ss:$24 sps:$4 sm:$0xff]  }
 0x71b   :  { %v6615_v56 = vpop.eup %6614  ;;  %v1909_v59 = vadd.f32 1.0, %v6613_v53  ;;  %6624 = vrcp.f32 %v1905_v57  ;;  %v6207_v53 = vld [vmem:[#allocation31 + $0xa4] ss:$24 sps:$4 sm:$0xff]   ;;  %v6208_v57 = vld [vmem:[#allocation31 + $0xd0] ss:$24 sps:$4 sm:$0xff]  }
 0x71c   :  { %v1910_v61 = vadd.f32 1.0, %v6615_v56  ;;  %6626 = vrcp.f32 %v1906_v58  ;;  %v6617_v8 = vpop.eup %6616  ;;  %v6210_v56 = vld [vmem:[#allocation31 + $0xd4] ss:$24 sps:$4 sm:$0xff]   ;;  %v6213_v58 = vld [vmem:[#allocation31 + $0x104] ss:$24 sps:$4 sm:$0xff]  }
 0x71d   :  { %6628 = vrcp.f32 %v1909_v59  ;;  %v6619_v9 = vpop.eup %6618  ;;  %v1907_v12 = vadd.f32 1.0, %v6617_v8  ;;  %v6211_v59 = vld [vmem:[#allocation31 + $0x100] ss:$24 sps:$4 sm:$0xff]  }
 0x71e   :  { %6630 = vrcp.f32 %v1910_v61  ;;  %v6621_v10 = vpop.eup %6620  ;;  %v1908_v14 = vadd.f32 1.0, %v6619_v9  ;;  %v6214_v61 = vld [vmem:[#allocation31 + $0x130] ss:$24 sps:$4 sm:$0xff]   ;;  %v6229_v8 = vld [vmem:[#allocation31 + $0x220] ss:$24 sps:$4 sm:$0xff]  }
 0x71f   :  { %v6623_v11 = vpop.eup %6622  ;;  %v1911_v16 = vadd.f32 1.0, %v6621_v10  ;;  %v6234_v9 = vld [vmem:[#allocation31 + $0x254] ss:$24 sps:$4 sm:$0xff]   ;;  %v6232_v10 = vld [vmem:[#allocation31 + $0x250] ss:$24 sps:$4 sm:$0xff]  }
 0x720   :  { %v1912_v20 = vadd.f32 1.0, %v6623_v11  ;;  %v6237_v11 = vld [vmem:[#allocation31 + $0x284] ss:$24 sps:$4 sm:$0xff]  }
 0x725   :  { %v6625_v13 = vpop.eup %6624 }
 0x726   :  { %v6627_v15 = vpop.eup %6626 }
 0x727   :  { %v6629_v18 = vpop.eup %6628 }
 0x728   :  { %v6631_v21 = vpop.eup %6630 }
 0x729   :  { %v1872_v63 = vpop.f32.mrb[20].mxu0 }
 0x72a   :  { %v1873_v1 = vadd.f32 %v1872_v63, %v1501_v60  ;;  %v1874_v2 = vpop.f32.mrb[21].mxu0  ;;  %v6217_v63 = vld [vmem:[#allocation31 + $0x160] ss:$24 sps:$4 sm:$0xff]  }
 0x72b   :  { %v1875_v3 = vadd.f32 %v1874_v2, %v1505_v62  ;;  %v1876_v4 = vpop.f32.mrb[22].mxu0  ;;  %v6220_v2 = vld [vmem:[#allocation31 + $0x190] ss:$24 sps:$4 sm:$0xff]  }
 0x72c   :  { %6632 = vtanh.f32 %v1873_v1  ;;  %v1877_v5 = vadd.f32 %v1876_v4, %v1501_v60  ;;  %v1878_v6 = vpop.f32.mrb[23].mxu0  ;;  %v6216_v60 = vld [vmem:[#allocation31 + $0x134] ss:$24 sps:$4 sm:$0xff]   ;;  %v6223_v4 = vld [vmem:[#allocation31 + $0x1c0] ss:$24 sps:$4 sm:$0xff]  }
 0x72d   :  { %6634 = vtanh.f32 %v1875_v3  ;;  %v1879_v7 = vadd.f32 %v1878_v6, %v1505_v62  ;;  %v6219_v62 = vld [vmem:[#allocation31 + $0x164] ss:$24 sps:$4 sm:$0xff]   ;;  %v6222_v1 = vld [vmem:[#allocation31 + $0x194] ss:$24 sps:$4 sm:$0xff]   ;;  %v6226_v6 = vld [vmem:[#allocation31 + $0x1f0] ss:$24 sps:$4 sm:$0xff]  }
 0x72e   :  { %6636 = vtanh.f32 %v1877_v5  ;;  %v6225_v3 = vld [vmem:[#allocation31 + $0x1c4] ss:$24 sps:$4 sm:$0xff]   ;;  %v6228_v5 = vld [vmem:[#allocation31 + $0x1f4] ss:$24 sps:$4 sm:$0xff]  }
 0x72f   :  { %6638 = vtanh.f32 %v1879_v7  ;;  %v6231_v7 = vld [vmem:[#allocation31 + $0x224] ss:$24 sps:$4 sm:$0xff]  }
 0x730   :  { %6640 = vrcp.f32 %v1907_v12  ;;  %v6235_v12 = vld [vmem:[#allocation31 + $0x280] ss:$24 sps:$4 sm:$0xff]  }
 0x731   :  { %6642 = vrcp.f32 %v1908_v14  ;;  %v6238_v14 = vld [vmem:[#allocation31 + $0x2b0] ss:$24 sps:$4 sm:$0xff]  }
 0x732   :  { %6644 = vrcp.f32 %v1911_v16  ;;  %v6241_v16 = vld [vmem:[#allocation31 + $0x2e0] ss:$24 sps:$4 sm:$0xff]  }
 0x733   :  { %6646 = vrcp.f32 %v1912_v20  ;;  %v6246_v20 = vld [vmem:[#allocation34 + $0x4] ss:$24 sps:$4 sm:$0xff]  }
 0x734   :  { %3358 = vmatprep.subr.bf16.mxu0 %v6246_v20  ;;  %v6333_v20 = vld [vmem:[#allocation34 + $0x2ac] ss:$24 sps:$4 sm:$0xff]  }
 0x736   :  { %v6633_v22 = vpop.eup %6632 }
 0x737   :  { %v6635_v23 = vpop.eup %6634  ;;  %v1933_v24 = vmul.f32 %v6633_v22, %v6625_v13  ;;  %v6240_v13 = vld [vmem:[#allocation31 + $0x2b4] ss:$24 sps:$4 sm:$0xff]  }
 0x738   :  { %v6637_v25 = vpop.eup %6636  ;;  %v1934_v26 = vmul.f32 %v6635_v23, %v6627_v15  ;;  %v6243_v15 = vld [vmem:[#allocation31 + $0x2e4] ss:$24 sps:$4 sm:$0xff]   ;;  %v6249_v22 = vld [vmem:[#allocation34 + $0xc] ss:$24 sps:$4 sm:$0xff]  }
 0x739   :  { %v6639_v27 = vpop.eup %6638  ;;  %6648 = vtanh.f32 %v1933_v24  ;;  %v1935_v28 = vmul.f32 %v6637_v25, %v6629_v18  ;;  %v6244_v18 = vld [vmem:[#allocation34] ss:$24 sps:$4 sm:$0xff]   ;;  %v6252_v23 = vld [vmem:[#allocation34 + $0x34] ss:$24 sps:$4 sm:$0xff]   ;;  %v6250_v25 = vld [vmem:[#allocation34 + $0x30] ss:$24 sps:$4 sm:$0xff]  }
 0x73a   :  { %6650 = vtanh.f32 %v1934_v26  ;;  %v1936_v29 = vmul.f32 %v6639_v27, %v6631_v21  ;;  %v6641_v30 = vpop.eup %6640  ;;  %v6247_v21 = vld [vmem:[#allocation34 + $0x8] ss:$24 sps:$4 sm:$0xff]   ;;  %v6255_v24 = vld [vmem:[#allocation34 + $0x3c] ss:$24 sps:$4 sm:$0xff]   ;;  %v6253_v26 = vld [vmem:[#allocation34 + $0x38] ss:$24 sps:$4 sm:$0xff]  }
 0x73b   :  { %6652 = vtanh.f32 %v1935_v28  ;;  %v6643_v31 = vpop.eup %6642  ;;  %v6258_v27 = vld [vmem:[#allocation34 + $0x64] ss:$24 sps:$4 sm:$0xff]  }
 0x73c   :  { %6654 = vtanh.f32 %v1936_v29  ;;  %v6645_v32 = vpop.eup %6644  ;;  %v6261_v28 = vld [vmem:[#allocation34 + $0x6c] ss:$24 sps:$4 sm:$0xff]   ;;  %v6256_v29 = vld [vmem:[#allocation34 + $0x60] ss:$24 sps:$4 sm:$0xff]  }
 0x73d   :  { %v6647_v33 = vpop.eup %6646 }
 0x743   :  { %v6649_v34 = vpop.eup %6648 }
 0x744   :  { %v6651_v37 = vpop.eup %6650  ;;  %v1941_v39 = vmul.f32 %v6649_v34, %v6641_v30  ;;  %v6259_v30 = vld [vmem:[#allocation34 + $0x68] ss:$24 sps:$4 sm:$0xff]   ;;  %v6265_v34 = vld [vmem:[#allocation34 + $0x98] ss:$24 sps:$4 sm:$0xff]  }
 0x745   :  { %v6653_v40 = vpop.eup %6652  ;;  %v1942_v41 = vmul.f32 %v6651_v37, %v6643_v31  ;;  %v6264_v31 = vld [vmem:[#allocation34 + $0x94] ss:$24 sps:$4 sm:$0xff]   ;;  %v6270_v37 = vld [vmem:[#allocation34 + $0xc4] ss:$24 sps:$4 sm:$0xff]  }
 0x746   :  { %v6655_v42 = vpop.eup %6654  ;;  %v1943_v43 = vmul.f32 %v6653_v40, %v6645_v32  ;;  %v6267_v32 = vld [vmem:[#allocation34 + $0x9c] ss:$24 sps:$4 sm:$0xff]   ;;  %v6268_v40 = vld [vmem:[#allocation34 + $0xc0] ss:$24 sps:$4 sm:$0xff]  }
 0x747   :  { %v1944_v44 = vmul.f32 %v6655_v42, %v6647_v33  ;;  %v6262_v33 = vld [vmem:[#allocation34 + $0x90] ss:$24 sps:$4 sm:$0xff]   ;;  %v6276_v42 = vld [vmem:[#allocation34 + $0xf4] ss:$24 sps:$4 sm:$0xff]  }
 0x748   :  { %v8073_v45 = vpack.c.bf16 %v1943_v43, %v1941_v39  ;;  %v6273_v39 = vld [vmem:[#allocation34 + $0xcc] ss:$24 sps:$4 sm:$0xff]   ;;  %v6279_v43 = vld [vmem:[#allocation34 + $0xfc] ss:$24 sps:$4 sm:$0xff]  }
 0x749   :  { %v1946_v46 = vpack.c.bf16 %v1944_v44, %v1942_v41  ;;  %v6271_v41 = vld [vmem:[#allocation34 + $0xc8] ss:$24 sps:$4 sm:$0xff]  }
 0x74a   :  { %v6274_v44 = vld [vmem:[#allocation34 + $0xf0] ss:$24 sps:$4 sm:$0xff]  }
 0x74b   :  { %2587 = vmatprep.mubr.bf16.mxu1 %v1946_v46  ;;  %2630 = vmatprep.mubr.bf16.mxu0 %v1946_v46 }
 0x74c   :  { %2588 = vmatmul.mubr.bf16.vlgmr.msra.gmra.mrb[20].mxu1 %v8073_v45  ;;  %2631 = vmatmul.mubr.bf16.vlgmr.msra.gmra.mrb[24].mxu0 %v8073_v45 }
 0x74d   :  { %2642 = vmatpush1.bf16.msra.mxu1 %v6196_v47  ;;  %2673 = vmatprep.mubr.bf16.mxu1 %v1946_v46  ;;  %v6282_v46 = vld [vmem:[#allocation34 + $0x124] ss:$24 sps:$4 sm:$0xff]  }
 0x74e   :  { %2643 = vmatprep.subr.bf16.mxu1 %v6201_v48  ;;  %3359 = vmatpush1.bf16.msra.mxu0 %v6244_v18  ;;  %v6285_v47 = vld [vmem:[#allocation34 + $0x12c] ss:$24 sps:$4 sm:$0xff]   ;;  %v6280_v48 = vld [vmem:[#allocation34 + $0x120] ss:$24 sps:$4 sm:$0xff]  }
 0x74f   :  { %3360 = vmatprep.subr.bf16.mxu0 %v6252_v23  ;;  %v6330_v18 = vld [vmem:[#allocation34 + $0x2a4] ss:$24 sps:$4 sm:$0xff]   ;;  %v6336_v23 = vld [vmem:[#allocation34 + $0x2d4] ss:$24 sps:$4 sm:$0xff]  }
 0x751   :  { %2644 = vmatpush1.bf16.msra.mxu1 %v6199_v49  ;;  %v6283_v49 = vld [vmem:[#allocation34 + $0x128] ss:$24 sps:$4 sm:$0xff]  }
 0x752   :  { %2645 = vmatprep.subr.bf16.mxu1 %v6204_v50  ;;  %3361 = vmatpush1.bf16.msra.mxu0 %v6250_v25  ;;  %v6288_v50 = vld [vmem:[#allocation34 + $0x154] ss:$24 sps:$4 sm:$0xff]   ;;  %v6334_v25 = vld [vmem:[#allocation34 + $0x2d0] ss:$24 sps:$4 sm:$0xff]  }
 0x753   :  { %3362 = vmatprep.subr.bf16.mxu0 %v6258_v27  ;;  %v6342_v27 = vld [vmem:[#allocation34 + $0x14] ss:$24 sps:$4 sm:$0xff]  }
 0x755   :  { %2646 = vmatpush1.bf16.msra.mxu1 %v6202_v51  ;;  %v6291_v51 = vld [vmem:[#allocation34 + $0x15c] ss:$24 sps:$4 sm:$0xff]  }
 0x756   :  { %2647 = vmatprep.subr.bf16.mxu1 %v6207_v53  ;;  %3363 = vmatpush1.bf16.msra.mxu0 %v6256_v29  ;;  %v6286_v53 = vld [vmem:[#allocation34 + $0x150] ss:$24 sps:$4 sm:$0xff]  }
 0x757   :  { %3364 = vmatprep.subr.bf16.mxu0 %v6264_v31 }
 0x759   :  { %2648 = vmatpush1.bf16.msra.mxu1 %v6205_v54  ;;  %v6289_v54 = vld [vmem:[#allocation34 + $0x158] ss:$24 sps:$4 sm:$0xff]  }
 0x75a   :  { %2649 = vmatprep.subr.bf16.mxu1 %v6210_v56  ;;  %3365 = vmatpush1.bf16.msra.mxu0 %v6262_v33  ;;  %v6294_v56 = vld [vmem:[#allocation34 + $0x184] ss:$24 sps:$4 sm:$0xff]  }
 0x75b   :  { %3366 = vmatprep.subr.bf16.mxu0 %v6270_v37 }
 0x75d   :  { %2650 = vmatpush1.bf16.msra.mxu1 %v6208_v57  ;;  %v6292_v57 = vld [vmem:[#allocation34 + $0x180] ss:$24 sps:$4 sm:$0xff]  }
 0x75e   :  { %2651 = vmatprep.subr.bf16.mxu1 %v6213_v58  ;;  %3367 = vmatpush1.bf16.msra.mxu0 %v6268_v40  ;;  %v6297_v58 = vld [vmem:[#allocation34 + $0x18c] ss:$24 sps:$4 sm:$0xff]  }
 0x75f   :  { %3368 = vmatprep.subr.bf16.mxu0 %v6276_v42 }
 0x761   :  { %2652 = vmatpush1.bf16.msra.mxu1 %v6211_v59  ;;  %v6295_v59 = vld [vmem:[#allocation34 + $0x188] ss:$24 sps:$4 sm:$0xff]  }
 0x762   :  { %2653 = vmatprep.subr.bf16.mxu1 %v6216_v60  ;;  %3369 = vmatpush1.bf16.msra.mxu0 %v6274_v44  ;;  %v6300_v60 = vld [vmem:[#allocation34 + $0x1b4] ss:$24 sps:$4 sm:$0xff]  }
 0x763   :  { %3370 = vmatprep.subr.bf16.mxu0 %v6282_v46 }
 0x765   :  { %2654 = vmatpush1.bf16.msra.mxu1 %v6214_v61  ;;  %v6298_v61 = vld [vmem:[#allocation34 + $0x1b0] ss:$24 sps:$4 sm:$0xff]  }
 0x766   :  { %2655 = vmatprep.subr.bf16.mxu1 %v6219_v62  ;;  %3371 = vmatpush1.bf16.msra.mxu0 %v6280_v48  ;;  %v6303_v62 = vld [vmem:[#allocation34 + $0x1bc] ss:$24 sps:$4 sm:$0xff]  }
 0x767   :  { %3372 = vmatprep.subr.bf16.mxu0 %v6288_v50 }
 0x769   :  { %2656 = vmatpush1.bf16.msra.mxu1 %v6217_v63  ;;  %v6301_v63 = vld [vmem:[#allocation34 + $0x1b8] ss:$24 sps:$4 sm:$0xff]  }
 0x76a   :  { %2657 = vmatprep.subr.bf16.mxu1 %v6222_v1  ;;  %3373 = vmatpush1.bf16.msra.mxu0 %v6286_v53  ;;  %v6306_v1 = vld [vmem:[#allocation34 + $0x1e4] ss:$24 sps:$4 sm:$0xff]  }
 0x76b   :  { %3374 = vmatprep.subr.bf16.mxu0 %v6294_v56 }
 0x76d   :  { %2658 = vmatpush1.bf16.msra.mxu1 %v6220_v2  ;;  %v6304_v2 = vld [vmem:[#allocation34 + $0x1e0] ss:$24 sps:$4 sm:$0xff]  }
 0x76e   :  { %2659 = vmatprep.subr.bf16.mxu1 %v6225_v3  ;;  %3375 = vmatpush1.bf16.msra.mxu0 %v6292_v57  ;;  %v6309_v3 = vld [vmem:[#allocation34 + $0x1ec] ss:$24 sps:$4 sm:$0xff]  }
 0x76f   :  { %3376 = vmatprep.subr.bf16.mxu0 %v6300_v60 }
 0x771   :  { %2660 = vmatpush1.bf16.msra.mxu1 %v6223_v4  ;;  %v6307_v4 = vld [vmem:[#allocation34 + $0x1e8] ss:$24 sps:$4 sm:$0xff]  }
 0x772   :  { %2661 = vmatprep.subr.bf16.mxu1 %v6228_v5  ;;  %3377 = vmatpush1.bf16.msra.mxu0 %v6298_v61  ;;  %v6312_v5 = vld [vmem:[#allocation34 + $0x214] ss:$24 sps:$4 sm:$0xff]  }
 0x773   :  { %3378 = vmatprep.subr.bf16.mxu0 %v6306_v1 }
 0x775   :  { %2662 = vmatpush1.bf16.msra.mxu1 %v6226_v6  ;;  %v6310_v6 = vld [vmem:[#allocation34 + $0x210] ss:$24 sps:$4 sm:$0xff]  }
 0x776   :  { %2663 = vmatprep.subr.bf16.mxu1 %v6231_v7  ;;  %3379 = vmatpush1.bf16.msra.mxu0 %v6304_v2  ;;  %v6315_v7 = vld [vmem:[#allocation34 + $0x21c] ss:$24 sps:$4 sm:$0xff]  }
 0x777   :  { %3380 = vmatprep.subr.bf16.mxu0 %v6312_v5 }
 0x779   :  { %2664 = vmatpush1.bf16.msra.mxu1 %v6229_v8  ;;  %v6313_v8 = vld [vmem:[#allocation34 + $0x218] ss:$24 sps:$4 sm:$0xff]  }
 0x77a   :  { %2665 = vmatprep.subr.bf16.mxu1 %v6234_v9  ;;  %3381 = vmatpush1.bf16.msra.mxu0 %v6310_v6  ;;  %v6316_v9 = vld [vmem:[#allocation34 + $0x240] ss:$24 sps:$4 sm:$0xff]  }
 0x77d   :  { %2666 = vmatpush1.bf16.msra.mxu1 %v6232_v10  ;;  %v6318_v10 = vld [vmem:[#allocation34 + $0x244] ss:$24 sps:$4 sm:$0xff]  }
 0x77e   :  { %2667 = vmatprep.subr.bf16.mxu1 %v6237_v11  ;;  %v6319_v11 = vld [vmem:[#allocation34 + $0x248] ss:$24 sps:$4 sm:$0xff]   ;;  %3382 = vmatprep.subr.bf16.mxu0 %v6318_v10 }
 0x77f   :  { %3383 = vmatpush1.bf16.msra.mxu0 %v6316_v9 }
 0x781   :  { %2668 = vmatpush1.bf16.msra.mxu1 %v6235_v12  ;;  %v6321_v12 = vld [vmem:[#allocation34 + $0x24c] ss:$24 sps:$4 sm:$0xff]  }
 0x782   :  { %2669 = vmatprep.subr.bf16.mxu1 %v6240_v13  ;;  %v6324_v13 = vld [vmem:[#allocation34 + $0x274] ss:$24 sps:$4 sm:$0xff]  }
 0x783   :  { %3384 = vmatprep.subr.bf16.mxu0 %v6324_v13 }
 0x785   :  { %2670 = vmatpush1.bf16.msra.mxu1 %v6238_v14  ;;  %v6327_v14 = vld [vmem:[#allocation34 + $0x27c] ss:$24 sps:$4 sm:$0xff]  }
 0x786   :  { %2671 = vmatprep.subr.bf16.mxu1 %v6243_v15  ;;  %v6322_v15 = vld [vmem:[#allocation34 + $0x270] ss:$24 sps:$4 sm:$0xff]  }
 0x787   :  { %3385 = vmatpush1.bf16.msra.mxu0 %v6322_v15 }
 0x788   :  { %3386 = vmatprep.subr.bf16.mxu0 %v6330_v18 }
 0x789   :  { %2672 = vmatpush1.bf16.msra.mxu1 %v6241_v16  ;;  %v6325_v16 = vld [vmem:[#allocation34 + $0x278] ss:$24 sps:$4 sm:$0xff]  }
 0x78a   :  { %3401 = vmatprep.subr.bf16.mxu1 %v6249_v22  ;;  %v6331_v22 = vld [vmem:[#allocation34 + $0x2a8] ss:$24 sps:$4 sm:$0xff]  }
 0x78c   :  { %2674 = vmatmul.mubr.bf16.vlgmr.msra.gmra.mrb[24].mxu1 %v8073_v45  ;;  %v6277_v45 = vld [vmem:[#allocation34 + $0xf8] ss:$24 sps:$4 sm:$0xff]  }
 0x78d   :  { %3402 = vmatpush1.bf16.msra.mxu1 %v6247_v21  ;;  %v6328_v21 = vld [vmem:[#allocation34 + $0x2a0] ss:$24 sps:$4 sm:$0xff]  }
 0x78e   :  { %3403 = vmatprep.subr.bf16.mxu1 %v6255_v24  ;;  %v6339_v24 = vld [vmem:[#allocation34 + $0x2dc] ss:$24 sps:$4 sm:$0xff]   ;;  %3387 = vmatpush1.bf16.msra.mxu0 %v6328_v21 }
 0x78f   :  { %3388 = vmatprep.subr.bf16.mxu0 %v6336_v23 }
 0x791   :  { %3404 = vmatpush1.bf16.msra.mxu1 %v6253_v26  ;;  %v6337_v26 = vld [vmem:[#allocation34 + $0x2d8] ss:$24 sps:$4 sm:$0xff]  }
 0x792   :  { %3405 = vmatprep.subr.bf16.mxu1 %v6261_v28  ;;  %3389 = vmatpush1.bf16.msra.mxu0 %v6334_v25 }
 0x793   :  { %3444 = vmatprep.subr.bf16.mxu0 %v6342_v27 }
 0x795   :  { %3406 = vmatpush1.bf16.msra.mxu1 %v6259_v30 }
 0x796   :  { %3407 = vmatprep.subr.bf16.mxu1 %v6267_v32 }
 0x799   :  { %3408 = vmatpush1.bf16.msra.mxu1 %v6265_v34 }
 0x79a   :  { %3409 = vmatprep.subr.bf16.mxu1 %v6273_v39  ;;  %v2043_v39 = vld [vmem:[#allocation32] sm:$0x3f] }
 0x79b   :  { %v2048_v40 = vrot.slane %v2043_v39, %v8055_v17  ;;  %v2056_v50 = vrot.slane %v2043_v39, %v8061_v35  ;;  %v2064_v6 = vrot.slane %v2043_v39, %v8067_v52 }
 0x79d   :  { %3410 = vmatpush1.bf16.msra.mxu1 %v6271_v41  ;;  %v2052_v41 = vrot.slane %v2043_v39, %v8057_v19 }
 0x79e   :  { %3411 = vmatprep.subr.bf16.mxu1 %v6279_v43 }
 0x7a1   :  { %3412 = vmatpush1.bf16.msra.mxu1 %v6277_v45 }
 0x7a2   :  { %3413 = vmatprep.subr.bf16.mxu1 %v6285_v47 }
 0x7a5   :  { %3414 = vmatpush1.bf16.msra.mxu1 %v6283_v49 }
 0x7a6   :  { %3415 = vmatprep.subr.bf16.mxu1 %v6291_v51  ;;  %v2060_v51 = vrot.slane %v2043_v39, %v8063_v38 }
 0x7a9   :  { %3416 = vmatpush1.bf16.msra.mxu1 %v6289_v54 }
 0x7aa   :  { %3417 = vmatprep.subr.bf16.mxu1 %v6297_v58 }
 0x7ad   :  { %3418 = vmatpush1.bf16.msra.mxu1 %v6295_v59 }
 0x7ae   :  { %3419 = vmatprep.subr.bf16.mxu1 %v6303_v62 }
 0x7b1   :  { %3420 = vmatpush1.bf16.msra.mxu1 %v6301_v63 }
 0x7b2   :  { %3421 = vmatprep.subr.bf16.mxu1 %v6309_v3 }
 0x7b5   :  { %3422 = vmatpush1.bf16.msra.mxu1 %v6307_v4 }
 0x7b6   :  { %3423 = vmatprep.subr.bf16.mxu1 %v6315_v7 }
 0x7b9   :  { %3424 = vmatpush1.bf16.msra.mxu1 %v6313_v8  ;;  %v2068_v8 = vrot.slane %v2043_v39, %v8069_v55 }
 0x7ba   :  { %3425 = vmatprep.subr.bf16.mxu1 %v6321_v12 }
 0x7bd   :  { %3426 = vmatpush1.bf16.msra.mxu1 %v6319_v11 }
 0x7be   :  { %3427 = vmatprep.subr.bf16.mxu1 %v6327_v14 }
 0x7c1   :  { %3428 = vmatpush1.bf16.msra.mxu1 %v6325_v16 }
 0x7c2   :  { %3429 = vmatprep.subr.bf16.mxu1 %v6333_v20 }
 0x7c5   :  { %3430 = vmatpush1.bf16.msra.mxu1 %v6331_v22 }
 0x7c6   :  { %3431 = vmatprep.subr.bf16.mxu1 %v6339_v24 }
 0x7c9   :  { %3432 = vmatpush1.bf16.msra.mxu1 %v6337_v26 }
 0x81f   :  { %v2589_v28 = vpop.f32.mrb[20].mxu1  ;;  %v2632_v29 = vpop.f32.mrb[24].mxu0 }
 0x820   :  { %v2591_v30 = vpop.f32.mrb[21].mxu1  ;;  %v2634_v31 = vpop.f32.mrb[25].mxu0  ;;  %v2590_v42 = vadd.f32 %v2589_v28, %v2048_v40  ;;  %v2633_v53 = vadd.f32 %v2632_v29, %v2056_v50 }
 0x821   :  { %v2593_v32 = vpop.f32.mrb[22].mxu1  ;;  %v2636_v33 = vpop.f32.mrb[26].mxu0  ;;  %v2592_v43 = vadd.f32 %v2591_v30, %v2052_v41  ;;  %v2635_v54 = vadd.f32 %v2634_v31, %v2060_v51 }
 0x822   :  { %v2595_v34 = vpop.f32.mrb[23].mxu1  ;;  %v2638_v37 = vpop.f32.mrb[27].mxu0  ;;  %v2594_v44 = vadd.f32 %v2593_v32, %v2048_v40  ;;  %v5343_v46 = vmul.f32 -1.442695, %v2590_v42  ;;  %v2637_v56 = vadd.f32 %v2636_v33, %v2056_v50  ;;  %v5345_v58 = vmul.f32 -1.442695, %v2633_v53 }
 0x823   :  { %v2596_v45 = vadd.f32 %v2595_v34, %v2052_v41  ;;  %v5344_v47 = vmul.f32 -1.442695, %v2592_v43  ;;  %v2639_v57 = vadd.f32 %v2638_v37, %v2060_v51  ;;  %v5346_v60 = vmul.f32 -1.442695, %v2635_v54 }
 0x824   :  { %v5347_v48 = vmul.f32 -1.442695, %v2594_v44  ;;  %6656 = vpow2.f32 %v5343_v46  ;;  %v5349_v62 = vmul.f32 -1.442695, %v2637_v56 }
 0x825   :  { %v5348_v49 = vmul.f32 -1.442695, %v2596_v45  ;;  %6658 = vpow2.f32 %v5344_v47  ;;  %v5350_v1 = vmul.f32 -1.442695, %v2639_v57 }
 0x826   :  { %6660 = vpow2.f32 %v5347_v48 }
 0x827   :  { %6662 = vpow2.f32 %v5348_v49 }
 0x828   :  { %6664 = vpow2.f32 %v5345_v58  ;;  %v6340_v58 = vld [vmem:[#allocation34 + $0x10] ss:$24 sps:$4 sm:$0xff]  }
 0x829   :  { %6666 = vpow2.f32 %v5346_v60  ;;  %v6343_v60 = vld [vmem:[#allocation34 + $0x40] ss:$24 sps:$4 sm:$0xff]  }
 0x82a   :  { %6668 = vpow2.f32 %v5349_v62  ;;  %v6346_v62 = vld [vmem:[#allocation34 + $0x70] ss:$24 sps:$4 sm:$0xff]  }
 0x82b   :  { %6670 = vpow2.f32 %v5350_v1  ;;  %v6349_v1 = vld [vmem:[#allocation34 + $0xa0] ss:$24 sps:$4 sm:$0xff]  }
 0x82e   :  { %v6657_v59 = vpop.eup %6656 }
 0x82f   :  { %v6659_v61 = vpop.eup %6658  ;;  %v2708_v3 = vadd.f32 1.0, %v6657_v59  ;;  %v6345_v59 = vld [vmem:[#allocation34 + $0x44] ss:$24 sps:$4 sm:$0xff]  }
 0x830   :  { %v6661_v63 = vpop.eup %6660  ;;  %v2709_v4 = vadd.f32 1.0, %v6659_v61  ;;  %v6348_v61 = vld [vmem:[#allocation34 + $0x74] ss:$24 sps:$4 sm:$0xff]  }
 0x831   :  { %v6663_v2 = vpop.eup %6662  ;;  %v2712_v5 = vadd.f32 1.0, %v6661_v63  ;;  %6672 = vrcp.f32 %v2708_v3  ;;  %v6351_v63 = vld [vmem:[#allocation34 + $0xa4] ss:$24 sps:$4 sm:$0xff]   ;;  %v6352_v3 = vld [vmem:[#allocation34 + $0xd0] ss:$24 sps:$4 sm:$0xff]  }
 0x832   :  { %v2713_v7 = vadd.f32 1.0, %v6663_v2  ;;  %6674 = vrcp.f32 %v2709_v4  ;;  %v6665_v18 = vpop.eup %6664  ;;  %v6354_v2 = vld [vmem:[#allocation34 + $0xd4] ss:$24 sps:$4 sm:$0xff]   ;;  %v6357_v4 = vld [vmem:[#allocation34 + $0x104] ss:$24 sps:$4 sm:$0xff]  }
 0x833   :  { %6676 = vrcp.f32 %v2712_v5  ;;  %v6667_v20 = vpop.eup %6666  ;;  %v2710_v23 = vadd.f32 1.0, %v6665_v18  ;;  %v6355_v5 = vld [vmem:[#allocation34 + $0x100] ss:$24 sps:$4 sm:$0xff]  }
 0x834   :  { %6678 = vrcp.f32 %v2713_v7  ;;  %v6669_v21 = vpop.eup %6668  ;;  %v2711_v25 = vadd.f32 1.0, %v6667_v20  ;;  %v6358_v7 = vld [vmem:[#allocation34 + $0x130] ss:$24 sps:$4 sm:$0xff]   ;;  %v6373_v18 = vld [vmem:[#allocation34 + $0x220] ss:$24 sps:$4 sm:$0xff]  }
 0x835   :  { %v6671_v22 = vpop.eup %6670  ;;  %v2714_v27 = vadd.f32 1.0, %v6669_v21  ;;  %v6378_v20 = vld [vmem:[#allocation34 + $0x254] ss:$24 sps:$4 sm:$0xff]   ;;  %v6376_v21 = vld [vmem:[#allocation34 + $0x250] ss:$24 sps:$4 sm:$0xff]  }
 0x836   :  { %v2715_v29 = vadd.f32 1.0, %v6671_v22  ;;  %v6381_v22 = vld [vmem:[#allocation34 + $0x284] ss:$24 sps:$4 sm:$0xff]  }
 0x83b   :  { %v6673_v24 = vpop.eup %6672 }
 0x83c   :  { %v6675_v26 = vpop.eup %6674 }
 0x83d   :  { %v6677_v28 = vpop.eup %6676 }
 0x83e   :  { %v6679_v30 = vpop.eup %6678 }
 0x85f   :  { %v2675_v9 = vpop.f32.mrb[24].mxu1 }
 0x860   :  { %v2676_v10 = vadd.f32 %v2675_v9, %v2064_v6  ;;  %v2677_v11 = vpop.f32.mrb[25].mxu1  ;;  %v6361_v9 = vld [vmem:[#allocation34 + $0x160] ss:$24 sps:$4 sm:$0xff]  }
 0x861   :  { %v2678_v12 = vadd.f32 %v2677_v11, %v2068_v8  ;;  %v2679_v13 = vpop.f32.mrb[26].mxu1  ;;  %v6364_v11 = vld [vmem:[#allocation34 + $0x190] ss:$24 sps:$4 sm:$0xff]  }
 0x862   :  { %6680 = vtanh.f32 %v2676_v10  ;;  %v2680_v14 = vadd.f32 %v2679_v13, %v2064_v6  ;;  %v2681_v15 = vpop.f32.mrb[27].mxu1  ;;  %v6360_v6 = vld [vmem:[#allocation34 + $0x134] ss:$24 sps:$4 sm:$0xff]   ;;  %v6367_v13 = vld [vmem:[#allocation34 + $0x1c0] ss:$24 sps:$4 sm:$0xff]  }
 0x863   :  { %6682 = vtanh.f32 %v2678_v12  ;;  %v2682_v16 = vadd.f32 %v2681_v15, %v2068_v8  ;;  %v6363_v8 = vld [vmem:[#allocation34 + $0x164] ss:$24 sps:$4 sm:$0xff]   ;;  %v6366_v10 = vld [vmem:[#allocation34 + $0x194] ss:$24 sps:$4 sm:$0xff]   ;;  %v6370_v15 = vld [vmem:[#allocation34 + $0x1f0] ss:$24 sps:$4 sm:$0xff]  }
 0x864   :  { %6684 = vtanh.f32 %v2680_v14  ;;  %v6369_v12 = vld [vmem:[#allocation34 + $0x1c4] ss:$24 sps:$4 sm:$0xff]   ;;  %v6372_v14 = vld [vmem:[#allocation34 + $0x1f4] ss:$24 sps:$4 sm:$0xff]  }
 0x865   :  { %6686 = vtanh.f32 %v2682_v16  ;;  %v6375_v16 = vld [vmem:[#allocation34 + $0x224] ss:$24 sps:$4 sm:$0xff]  }
 0x866   :  { %6688 = vrcp.f32 %v2710_v23  ;;  %v6379_v23 = vld [vmem:[#allocation34 + $0x280] ss:$24 sps:$4 sm:$0xff]  }
 0x867   :  { %6690 = vrcp.f32 %v2711_v25  ;;  %v6382_v25 = vld [vmem:[#allocation34 + $0x2b0] ss:$24 sps:$4 sm:$0xff]  }
 0x868   :  { %6692 = vrcp.f32 %v2714_v27  ;;  %v6385_v27 = vld [vmem:[#allocation34 + $0x2e0] ss:$24 sps:$4 sm:$0xff]  }
 0x869   :  { %6694 = vrcp.f32 %v2715_v29 }
 0x86c   :  { %v6681_v31 = vpop.eup %6680 }
 0x86d   :  { %v6683_v32 = vpop.eup %6682  ;;  %v2736_v33 = vmul.f32 %v6681_v31, %v6673_v24  ;;  %v6384_v24 = vld [vmem:[#allocation34 + $0x2b4] ss:$24 sps:$4 sm:$0xff]  }
 0x86e   :  { %v6685_v34 = vpop.eup %6684  ;;  %v2737_v37 = vmul.f32 %v6683_v32, %v6675_v26  ;;  %v6387_v26 = vld [vmem:[#allocation34 + $0x2e4] ss:$24 sps:$4 sm:$0xff]   ;;  %v3621_v31 = vld [vmem:[#allocation38 + $0x8] sm:$0xff] }
 0x86f   :  { %v6687_v39 = vpop.eup %6686  ;;  %6696 = vtanh.f32 %v2736_v33  ;;  %v2738_v40 = vmul.f32 %v6685_v34, %v6677_v28  ;;  %v3620_v28 = vld [vmem:[#allocation38] sm:$0xff] }
 0x870   :  { %6698 = vtanh.f32 %v2737_v37  ;;  %v2739_v41 = vmul.f32 %v6687_v39, %v6679_v30  ;;  %v6689_v42 = vpop.eup %6688  ;;  %v5456_v29 = vcombine.high %v3620_v28, %v3620_v28  ;;  %v5455_v30 = vcombine.low %v3620_v28, %v3620_v28  ;;  %v3617_v32 = vld [vmem:[%s8240_s18] sm:$0xff]  ;;  %v3618_v33 = vld [vmem:[%s8240_s18 + $0x8] sm:$0xff] }
 0x871   :  { %6700 = vtanh.f32 %v2738_v40  ;;  %v6691_v43 = vpop.eup %6690  ;;  %v5458_v37 = vcombine.high %v3621_v31, %v3621_v31  ;;  %v3619_v39 = vpack.c.bf16 %v3618_v33, %v3617_v32  ;;  %v5457_v40 = vcombine.low %v3621_v31, %v3621_v31  ;;  %v6493_v28 = vld [vmem:[#allocation43 + $0x14] ss:$8 sps:$4 sm:$0xff]   ;;  %v6496_v32 = vld [vmem:[#allocation43 + $0x24] ss:$8 sps:$4 sm:$0xff]  }
 0x872   :  { %6702 = vtanh.f32 %v2739_v41  ;;  %v6693_v44 = vpop.eup %6692  ;;  %5459 = vmatprep.subr.msk.bf16.mxu1 %vm3636_vm2, %v5456_v29  ;;  %v3638_v34 = vsel %vm3636_vm2, %v5455_v30, 0  ;;  %v6491_v30 = vld [vmem:[#allocation43 + $0x10] ss:$8 sps:$4 sm:$0xff]  }
 0x873   :  { %v6695_v45 = vpop.eup %6694  ;;  %v3644_v41 = vsel %vm3636_vm2, %v5457_v40, 0 }
 0x879   :  { %v6697_v46 = vpop.eup %6696 }
 0x87a   :  { %v6699_v47 = vpop.eup %6698  ;;  %v2744_v48 = vmul.f32 %v6697_v46, %v6689_v42  ;;  %v6394_v42 = vld [vmem:[#allocation37 + $0x4] ss:$16 sps:$4 sm:$0xff]  }
 0x87b   :  { %v6701_v49 = vpop.eup %6700  ;;  %v2745_v50 = vmul.f32 %v6699_v47, %v6691_v43  ;;  %v6392_v43 = vld [vmem:[#allocation37] ss:$16 sps:$4 sm:$0xff]   ;;  %v6400_v46 = vld [vmem:[#allocation37 + $0x44] ss:$16 sps:$4 sm:$0xff]  }
 0x87c   :  { %v6703_v51 = vpop.eup %6702  ;;  %v2746_v53 = vmul.f32 %v6701_v49, %v6693_v44  ;;  %v6397_v44 = vld [vmem:[#allocation37 + $0x24] ss:$16 sps:$4 sm:$0xff]   ;;  %v6398_v47 = vld [vmem:[#allocation37 + $0x40] ss:$16 sps:$4 sm:$0xff]  }
 0x87d   :  { %v2747_v54 = vmul.f32 %v6703_v51, %v6695_v45  ;;  %v6395_v45 = vld [vmem:[#allocation37 + $0x20] ss:$16 sps:$4 sm:$0xff]  }
 0x87e   :  { %v8084_v56 = vpack.c.bf16 %v2746_v53, %v2744_v48  ;;  %v6403_v48 = vld [vmem:[#allocation37 + $0x64] ss:$16 sps:$4 sm:$0xff]   ;;  %v6401_v49 = vld [vmem:[#allocation37 + $0x60] ss:$16 sps:$4 sm:$0xff]  }
 0x87f   :  { %v2749_v57 = vpack.c.bf16 %v2747_v54, %v2745_v50  ;;  %v6406_v50 = vld [vmem:[#allocation37 + $0x84] ss:$16 sps:$4 sm:$0xff]   ;;  %v6404_v51 = vld [vmem:[#allocation37 + $0x80] ss:$16 sps:$4 sm:$0xff]  }
 0x880   :  { %v6407_v53 = vld [vmem:[#allocation37 + $0xa0] ss:$16 sps:$4 sm:$0xff]   ;;  %v6412_v54 = vld [vmem:[#allocation37 + $0xc4] ss:$16 sps:$4 sm:$0xff]  }
 0x881   :  { %3390 = vmatprep.mubr.bf16.mxu0 %v2749_v57  ;;  %3433 = vmatprep.mubr.bf16.mxu1 %v2749_v57 }
 0x882   :  { %3391 = vmatmul.mubr.bf16.vlgmr.msra.gmra.mrb[28].mxu0 %v8084_v56  ;;  %3434 = vmatmul.mubr.bf16.vlgmr.msra.gmra.mrb[28].mxu1 %v8084_v56 }
 0x883   :  { %3445 = vmatpush1.bf16.msra.mxu0 %v6340_v58  ;;  %3476 = vmatprep.mubr.bf16.mxu0 %v2749_v57  ;;  %v6415_v57 = vld [vmem:[#allocation37 + $0xe4] ss:$16 sps:$4 sm:$0xff]   ;;  %v6413_v58 = vld [vmem:[#allocation37 + $0xe0] ss:$16 sps:$4 sm:$0xff]  }
 0x884   :  { %3446 = vmatprep.subr.bf16.mxu0 %v6345_v59  ;;  %3681 = vmatprep.mubr.bf16.mxu1 %v7568_v36  ;;  %v6418_v59 = vld [vmem:[#allocation37 + $0x104] ss:$16 sps:$4 sm:$0xff]  }
 0x885   :  { %3650 = vmatpush1.bf16.msra.mxu1 %v3638_v34 }
 0x886   :  { %5461 = vmatprep.subr.msk.bf16.mxu1 %vm3636_vm2, %v5458_v37 }
 0x887   :  { %3447 = vmatpush1.bf16.msra.mxu0 %v6343_v60  ;;  %v6416_v60 = vld [vmem:[#allocation37 + $0x100] ss:$16 sps:$4 sm:$0xff]  }
 0x888   :  { %3448 = vmatprep.subr.bf16.mxu0 %v6348_v61  ;;  %v6421_v61 = vld [vmem:[#allocation37 + $0x124] ss:$16 sps:$4 sm:$0xff]  }
 0x88a   :  { %5460 = vmatmul.mubr.msk.bf16.vlgmr.msra.gmra.mrb[32].mxu1 %vm3632_vm3, %v3619_v39 }
 0x88b   :  { %3449 = vmatpush1.bf16.msra.mxu0 %v6346_v62  ;;  %3693 = vmatpush1.bf16.msra.mxu1 %v3644_v41  ;;  %v6419_v62 = vld [vmem:[#allocation37 + $0x120] ss:$16 sps:$4 sm:$0xff]   ;;  %v6499_v41 = vld [vmem:[#allocation43 + $0x34] ss:$8 sps:$4 sm:$0xff]  }
 0x88c   :  { %3450 = vmatprep.subr.bf16.mxu0 %v6351_v63  ;;  %3724 = vmatprep.mubr.bf16.mxu1 %v7568_v36  ;;  %v6409_v36 = vld [vmem:[#allocation37 + $0xa4] ss:$16 sps:$4 sm:$0xff]  }
 0x88d   :  { %4055 = vmatprep.subr.bf16.mxu1 %v6394_v42  ;;  %v6424_v63 = vld [vmem:[#allocation37 + $0x144] ss:$16 sps:$4 sm:$0xff]  }
 0x88f   :  { %3451 = vmatpush1.bf16.msra.mxu0 %v6349_v1  ;;  %v6422_v1 = vld [vmem:[#allocation37 + $0x140] ss:$16 sps:$4 sm:$0xff]  }
 0x890   :  { %3452 = vmatprep.subr.bf16.mxu0 %v6354_v2  ;;  %v6427_v2 = vld [vmem:[#allocation37 + $0x164] ss:$16 sps:$4 sm:$0xff]  }
 0x892   :  { %5462 = vmatmul.mubr.msk.bf16.vlgmr.msra.gmra.mrb[36].mxu1 %vm3632_vm3, %v3619_v39  ;;  %v6494_v39 = vld [vmem:[#allocation43 + $0x20] ss:$8 sps:$4 sm:$0xff]  }
 0x893   :  { %3453 = vmatpush1.bf16.msra.mxu0 %v6352_v3  ;;  %4056 = vmatpush1.bf16.msra.mxu1 %v6392_v43  ;;  %v6425_v3 = vld [vmem:[#allocation37 + $0x160] ss:$16 sps:$4 sm:$0xff]  }
 0x894   :  { %3454 = vmatprep.subr.bf16.mxu0 %v6357_v4  ;;  %4057 = vmatprep.subr.bf16.mxu1 %v6397_v44  ;;  %v6428_v4 = vld [vmem:[#allocation37 + $0x180] ss:$16 sps:$4 sm:$0xff]  }
 0x895   :  { %v6497_v44 = vld [vmem:[#allocation43 + $0x30] ss:$8 sps:$4 sm:$0xff]  }
 0x897   :  { %3455 = vmatpush1.bf16.msra.mxu0 %v6355_v5  ;;  %4058 = vmatpush1.bf16.msra.mxu1 %v6395_v45  ;;  %v6430_v5 = vld [vmem:[#allocation37 + $0x184] ss:$16 sps:$4 sm:$0xff]  }
 0x898   :  { %3456 = vmatprep.subr.bf16.mxu0 %v6360_v6  ;;  %4059 = vmatprep.subr.bf16.mxu1 %v6400_v46  ;;  %v6433_v6 = vld [vmem:[#allocation37 + $0x1a4] ss:$16 sps:$4 sm:$0xff]  }
 0x899   :  { %v6502_v46 = vld [vmem:[#allocation43 + $0x44] ss:$8 sps:$4 sm:$0xff]  }
 0x89b   :  { %3457 = vmatpush1.bf16.msra.mxu0 %v6358_v7  ;;  %4060 = vmatpush1.bf16.msra.mxu1 %v6398_v47  ;;  %v6431_v7 = vld [vmem:[#allocation37 + $0x1a0] ss:$16 sps:$4 sm:$0xff]  }
 0x89c   :  { %3458 = vmatprep.subr.bf16.mxu0 %v6363_v8  ;;  %4061 = vmatprep.subr.bf16.mxu1 %v6403_v48  ;;  %v6436_v8 = vld [vmem:[#allocation37 + $0x1c4] ss:$16 sps:$4 sm:$0xff]   ;;  %v6500_v48 = vld [vmem:[#allocation43 + $0x40] ss:$8 sps:$4 sm:$0xff]  }
 0x89f   :  { %3459 = vmatpush1.bf16.msra.mxu0 %v6361_v9  ;;  %4062 = vmatpush1.bf16.msra.mxu1 %v6401_v49  ;;  %v6434_v9 = vld [vmem:[#allocation37 + $0x1c0] ss:$16 sps:$4 sm:$0xff]  }
 0x8a0   :  { %3460 = vmatprep.subr.bf16.mxu0 %v6366_v10  ;;  %4063 = vmatprep.subr.bf16.mxu1 %v6406_v50  ;;  %v6439_v10 = vld [vmem:[#allocation37 + $0x1e4] ss:$16 sps:$4 sm:$0xff]  }
 0x8a1   :  { %v6505_v50 = vld [vmem:[#allocation43 + $0x54] ss:$8 sps:$4 sm:$0xff]  }
 0x8a3   :  { %3461 = vmatpush1.bf16.msra.mxu0 %v6364_v11  ;;  %4064 = vmatpush1.bf16.msra.mxu1 %v6404_v51  ;;  %v6437_v11 = vld [vmem:[#allocation37 + $0x1e0] ss:$16 sps:$4 sm:$0xff]  }
 0x8a4   :  { %3462 = vmatprep.subr.bf16.mxu0 %v6369_v12  ;;  %4065 = vmatprep.subr.bf16.mxu1 %v6409_v36  ;;  %v6442_v12 = vld [vmem:[#allocation37 + $0xc] ss:$16 sps:$4 sm:$0xff]  }
 0x8a7   :  { %3463 = vmatpush1.bf16.msra.mxu0 %v6367_v13  ;;  %4066 = vmatpush1.bf16.msra.mxu1 %v6407_v53 }
 0x8a8   :  { %3464 = vmatprep.subr.bf16.mxu0 %v6372_v14  ;;  %4067 = vmatprep.subr.bf16.mxu1 %v6412_v54  ;;  %v6503_v54 = vld [vmem:[#allocation43 + $0x50] ss:$8 sps:$4 sm:$0xff]  }
 0x8ab   :  { %3465 = vmatpush1.bf16.msra.mxu0 %v6370_v15 }
 0x8ac   :  { %3466 = vmatprep.subr.bf16.mxu0 %v6375_v16 }
 0x8af   :  { %3467 = vmatpush1.bf16.msra.mxu0 %v6373_v18 }
 0x8b0   :  { %3468 = vmatprep.subr.bf16.mxu0 %v6378_v20 }
 0x8b3   :  { %3469 = vmatpush1.bf16.msra.mxu0 %v6376_v21 }
 0x8b4   :  { %3470 = vmatprep.subr.bf16.mxu0 %v6381_v22 }
 0x8b7   :  { %3471 = vmatpush1.bf16.msra.mxu0 %v6379_v23  ;;  %v8093_v23 = vld [vmem:[#allocation35] sm:$0x3f] }
 0x8b8   :  { %3472 = vmatprep.subr.bf16.mxu0 %v6384_v24  ;;  %v2851_v24 = vrot.slane %v8093_v23, %v8055_v17  ;;  %v2859_v45 = vrot.slane %v8093_v23, %v8061_v35  ;;  %v2863_v47 = vrot.slane %v8093_v23, %v8063_v38 }
 0x8bb   :  { %3473 = vmatpush1.bf16.msra.mxu0 %v6382_v25  ;;  %v2855_v25 = vrot.slane %v8093_v23, %v8057_v19 }
 0x8bc   :  { %3474 = vmatprep.subr.bf16.mxu0 %v6387_v26  ;;  %v6488_v26 = vld [vmem:[#allocation43] ss:$8 sps:$4 sm:$0xff]  }
 0x8bf   :  { %3475 = vmatpush1.bf16.msra.mxu0 %v6385_v27  ;;  %v6490_v27 = vld [vmem:[#allocation43 + $0x4] ss:$8 sps:$4 sm:$0xff]  }
 0x8c0   :  { %4639 = vmatprep.subr.bf16.mxu0 %v6490_v27 }
 0x8c2   :  { %3477 = vmatmul.mubr.bf16.vlgmr.msra.gmra.mrb[32].mxu0 %v8084_v56  ;;  %v6410_v56 = vld [vmem:[#allocation37 + $0xc0] ss:$16 sps:$4 sm:$0xff]  }
 0x8c3   :  { %4068 = vmatpush1.bf16.msra.mxu1 %v6410_v56  ;;  %4640 = vmatpush1.bf16.msra.mxu0 %v6488_v26  ;;  %v6520_v26 = vld [vmem:[#allocation43 + $0xa4] ss:$8 sps:$4 sm:$0xff]  }
 0x8c4   :  { %4069 = vmatprep.subr.bf16.mxu1 %v6415_v57  ;;  %4641 = vmatprep.subr.bf16.mxu0 %v6493_v28  ;;  %v6508_v57 = vld [vmem:[#allocation43 + $0x64] ss:$8 sps:$4 sm:$0xff]  }
 0x8c7   :  { %4070 = vmatpush1.bf16.msra.mxu1 %v6413_v58  ;;  %4642 = vmatpush1.bf16.msra.mxu0 %v6491_v30 }
 0x8c8   :  { %4071 = vmatprep.subr.bf16.mxu1 %v6418_v59  ;;  %4643 = vmatprep.subr.bf16.mxu0 %v6496_v32 }
 0x8cb   :  { %4072 = vmatpush1.bf16.msra.mxu1 %v6416_v60  ;;  %4644 = vmatpush1.bf16.msra.mxu0 %v6494_v39  ;;  %v6523_v39 = vld [vmem:[#allocation43 + $0xb4] ss:$8 sps:$4 sm:$0xff]  }
 0x8cc   :  { %4073 = vmatprep.subr.bf16.mxu1 %v6421_v61  ;;  %4645 = vmatprep.subr.bf16.mxu0 %v6499_v41 }
 0x8cf   :  { %4074 = vmatpush1.bf16.msra.mxu1 %v6419_v62  ;;  %4646 = vmatpush1.bf16.msra.mxu0 %v6497_v44  ;;  %v6521_v44 = vld [vmem:[#allocation43 + $0xb0] ss:$8 sps:$4 sm:$0xff]  }
 0x8d0   :  { %4075 = vmatprep.subr.bf16.mxu1 %v6424_v63  ;;  %4647 = vmatprep.subr.bf16.mxu0 %v6502_v46 }
 0x8d3   :  { %4076 = vmatpush1.bf16.msra.mxu1 %v6422_v1  ;;  %4648 = vmatpush1.bf16.msra.mxu0 %v6500_v48  ;;  %v6506_v1 = vld [vmem:[#allocation43 + $0x60] ss:$8 sps:$4 sm:$0xff]  }
 0x8d4   :  { %4077 = vmatprep.subr.bf16.mxu1 %v6427_v2  ;;  %4649 = vmatprep.subr.bf16.mxu0 %v6505_v50 }
 0x8d7   :  { %4078 = vmatpush1.bf16.msra.mxu1 %v6425_v3  ;;  %4650 = vmatpush1.bf16.msra.mxu0 %v6503_v54 }
 0x8d8   :  { %4079 = vmatprep.subr.bf16.mxu1 %v6430_v5  ;;  %4651 = vmatprep.subr.bf16.mxu0 %v6508_v57 }
 0x8db   :  { %4080 = vmatpush1.bf16.msra.mxu1 %v6428_v4  ;;  %v6511_v4 = vld [vmem:[#allocation43 + $0x74] ss:$8 sps:$4 sm:$0xff]   ;;  %4652 = vmatpush1.bf16.msra.mxu0 %v6506_v1 }
 0x8dc   :  { %4081 = vmatprep.subr.bf16.mxu1 %v6433_v6  ;;  %4653 = vmatprep.subr.bf16.mxu0 %v6511_v4  ;;  %v6440_v4 = vld [vmem:[#allocation37 + $0x8] ss:$16 sps:$4 sm:$0xff]  }
 0x8df   :  { %4082 = vmatpush1.bf16.msra.mxu1 %v6431_v7  ;;  %v2867_v7 = vrot.slane %v8093_v23, %v8067_v52  ;;  %v6512_v52 = vld [vmem:[#allocation43 + $0x80] ss:$8 sps:$4 sm:$0xff]  }
 0x8e0   :  { %4083 = vmatprep.subr.bf16.mxu1 %v6436_v8 }
 0x8e3   :  { %4084 = vmatpush1.bf16.msra.mxu1 %v6434_v9  ;;  %v2871_v9 = vrot.slane %v8093_v23, %v8069_v55  ;;  %v6517_v55 = vld [vmem:[#allocation43 + $0x94] ss:$8 sps:$4 sm:$0xff]  }
 0x8e4   :  { %4085 = vmatprep.subr.bf16.mxu1 %v6439_v10  ;;  %v6509_v10 = vld [vmem:[#allocation43 + $0x70] ss:$8 sps:$4 sm:$0xff]  }
 0x8e5   :  { %4654 = vmatpush1.bf16.msra.mxu0 %v6509_v10  ;;  %v6449_v10 = vld [vmem:[#allocation37 + $0x68] ss:$16 sps:$4 sm:$0xff]  }
 0x8e7   :  { %4086 = vmatpush1.bf16.msra.mxu1 %v6437_v11  ;;  %v6514_v11 = vld [vmem:[#allocation43 + $0x84] ss:$8 sps:$4 sm:$0xff]  }
 0x8e8   :  { %4098 = vmatprep.subr.bf16.mxu1 %v6442_v12  ;;  %4655 = vmatprep.subr.bf16.mxu0 %v6514_v11  ;;  %v6454_v11 = vld [vmem:[#allocation37 + $0x8c] ss:$16 sps:$4 sm:$0xff]  }
 0x8e9   :  { %4656 = vmatpush1.bf16.msra.mxu0 %v6512_v52  ;;  %v6463_v52 = vld [vmem:[#allocation37 + $0xec] ss:$16 sps:$4 sm:$0xff]  }
 0x8ea   :  { %4657 = vmatprep.subr.bf16.mxu0 %v6517_v55  ;;  %v6464_v55 = vld [vmem:[#allocation37 + $0x108] ss:$16 sps:$4 sm:$0xff]  }
 0x955   :  { %v3392_v13 = vpop.f32.mrb[28].mxu0  ;;  %v3435_v14 = vpop.f32.mrb[28].mxu1 }
 0x956   :  { %v3394_v15 = vpop.f32.mrb[29].mxu0  ;;  %v3437_v16 = vpop.f32.mrb[29].mxu1  ;;  %v3393_v29 = vadd.f32 %v3392_v13, %v2851_v24  ;;  %v3436_v49 = vadd.f32 %v3435_v14, %v2859_v45 }
 0x957   :  { %v3396_v18 = vpop.f32.mrb[30].mxu0  ;;  %v3439_v20 = vpop.f32.mrb[30].mxu1  ;;  %v3395_v31 = vadd.f32 %v3394_v15, %v2855_v25  ;;  %v3438_v51 = vadd.f32 %v3437_v16, %v2863_v47 }
 0x958   :  { %v3398_v21 = vpop.f32.mrb[31].mxu0  ;;  %v3441_v22 = vpop.f32.mrb[31].mxu1  ;;  %v3397_v33 = vadd.f32 %v3396_v18, %v2851_v24  ;;  %v5447_v37 = vmul.f32 -1.442695, %v3393_v29  ;;  %v3440_v36 = vadd.f32 %v3439_v20, %v2859_v45  ;;  %v5449_v56 = vmul.f32 -1.442695, %v3436_v49 }
 0x959   :  { %v3399_v34 = vadd.f32 %v3398_v21, %v2855_v25  ;;  %v5448_v40 = vmul.f32 -1.442695, %v3395_v31  ;;  %v3442_v53 = vadd.f32 %v3441_v22, %v2863_v47  ;;  %v5450_v59 = vmul.f32 -1.442695, %v3438_v51  ;;  %v6515_v24 = vld [vmem:[#allocation43 + $0x90] ss:$8 sps:$4 sm:$0xff]  }
 0x95a   :  { %v5451_v42 = vmul.f32 -1.442695, %v3397_v33  ;;  %6704 = vpow2.f32 %v5447_v37  ;;  %v5453_v61 = vmul.f32 -1.442695, %v3440_v36  ;;  %4658 = vmatpush1.bf16.msra.mxu0 %v6515_v24  ;;  %v6518_v33 = vld [vmem:[#allocation43 + $0xa0] ss:$8 sps:$4 sm:$0xff]  }
 0x95b   :  { %v5452_v43 = vmul.f32 -1.442695, %v3399_v34  ;;  %6706 = vpow2.f32 %v5448_v40  ;;  %v5454_v63 = vmul.f32 -1.442695, %v3442_v53  ;;  %4659 = vmatprep.subr.bf16.mxu0 %v6520_v26  ;;  %v6526_v47 = vld [vmem:[#allocation43 + $0xc4] ss:$8 sps:$4 sm:$0xff]  }
 0x95c   :  { %6708 = vpow2.f32 %v5451_v42  ;;  %v6524_v51 = vld [vmem:[#allocation43 + $0xc0] ss:$8 sps:$4 sm:$0xff]  }
 0x95d   :  { %6710 = vpow2.f32 %v5452_v43  ;;  %v6470_v24 = vld [vmem:[#allocation37 + $0x148] ss:$16 sps:$4 sm:$0xff]  }
 0x95e   :  { %6712 = vpow2.f32 %v5449_v56  ;;  %4660 = vmatpush1.bf16.msra.mxu0 %v6518_v33  ;;  %v6473_v26 = vld [vmem:[#allocation37 + $0x168] ss:$16 sps:$4 sm:$0xff]   ;;  %v6487_v33 = vld [vmem:[#allocation37 + $0x1ec] ss:$16 sps:$4 sm:$0xff]  }
 0x95f   :  { %6714 = vpow2.f32 %v5450_v59  ;;  %4661 = vmatprep.subr.bf16.mxu0 %v6523_v39  ;;  %v6527_v39 = vld [vmem:[#allocation43 + $0xd0] ss:$8 sps:$4 sm:$0xff]  }
 0x960   :  { %6716 = vpow2.f32 %v5453_v61 }
 0x961   :  { %6718 = vpow2.f32 %v5454_v63 }
 0x962   :  { %4662 = vmatpush1.bf16.msra.mxu0 %v6521_v44  ;;  %v6538_v44 = vld [vmem:[#allocation43 + $0x104] ss:$8 sps:$4 sm:$0xff]  }
 0x963   :  { %4663 = vmatprep.subr.bf16.mxu0 %v6526_v47  ;;  %v6586_v47 = vld [vmem:[%s8241_s22 + $0x48] sm:$0xff]  }
 0x964   :  { %v6705_v58 = vpop.eup %6704 }
 0x965   :  { %v6707_v60 = vpop.eup %6706  ;;  %v3511_v3 = vadd.f32 1.0, %v6705_v58 }
 0x966   :  { %v6709_v62 = vpop.eup %6708  ;;  %v3512_v5 = vadd.f32 1.0, %v6707_v60  ;;  %4664 = vmatpush1.bf16.msra.mxu0 %v6524_v51  ;;  %v6590_v51 = vld [vmem:[%s8241_s22 + $0x58] sm:$0xff]  }
 0x967   :  { %v6711_v2 = vpop.eup %6710  ;;  %v3515_v6 = vadd.f32 1.0, %v6709_v62  ;;  %6720 = vrcp.f32 %v3511_v3 }
 0x968   :  { %v3516_v8 = vadd.f32 1.0, %v6711_v2  ;;  %6722 = vrcp.f32 %v3512_v5  ;;  %v6713_v22 = vpop.eup %6712  ;;  %v6445_v5 = vld [vmem:[#allocation37 + $0x2c] ss:$16 sps:$4 sm:$0xff]  }
 0x969   :  { %6724 = vrcp.f32 %v3515_v6  ;;  %v6715_v23 = vpop.eup %6714  ;;  %v3513_v28 = vadd.f32 1.0, %v6713_v22  ;;  %v6443_v6 = vld [vmem:[#allocation37 + $0x28] ss:$16 sps:$4 sm:$0xff]  }
 0x96a   :  { %6726 = vrcp.f32 %v3516_v8  ;;  %v6717_v25 = vpop.eup %6716  ;;  %v3514_v30 = vadd.f32 1.0, %v6715_v23  ;;  %v6446_v8 = vld [vmem:[#allocation37 + $0x48] ss:$16 sps:$4 sm:$0xff]   ;;  %v6472_v23 = vld [vmem:[#allocation37 + $0x14c] ss:$16 sps:$4 sm:$0xff]  }
 0x96b   :  { %v6719_v27 = vpop.eup %6718  ;;  %v3517_v32 = vadd.f32 1.0, %v6717_v25  ;;  %v6467_v22 = vld [vmem:[#allocation37 + $0x128] ss:$16 sps:$4 sm:$0xff]   ;;  %v6475_v25 = vld [vmem:[#allocation37 + $0x16c] ss:$16 sps:$4 sm:$0xff]  }
 0x96c   :  { %v3518_v37 = vadd.f32 1.0, %v6719_v27  ;;  %v6478_v27 = vld [vmem:[#allocation37 + $0x18c] ss:$16 sps:$4 sm:$0xff]  }
 0x971   :  { %v6721_v29 = vpop.eup %6720 }
 0x972   :  { %v6723_v31 = vpop.eup %6722 }
 0x973   :  { %v6725_v34 = vpop.eup %6724 }
 0x974   :  { %v6727_v40 = vpop.eup %6726 }
 0x995   :  { %v3478_v12 = vpop.f32.mrb[32].mxu0 }
 0x996   :  { %v3479_v13 = vadd.f32 %v3478_v12, %v2867_v7  ;;  %v3480_v14 = vpop.f32.mrb[33].mxu0  ;;  %v6452_v12 = vld [vmem:[#allocation37 + $0x88] ss:$16 sps:$4 sm:$0xff]  }
 0x997   :  { %v3481_v15 = vadd.f32 %v3480_v14, %v2871_v9  ;;  %v3482_v16 = vpop.f32.mrb[34].mxu0  ;;  %v6455_v14 = vld [vmem:[#allocation37 + $0xa8] ss:$16 sps:$4 sm:$0xff]  }
 0x998   :  { %6728 = vtanh.f32 %v3479_v13  ;;  %v3483_v18 = vadd.f32 %v3482_v16, %v2867_v7  ;;  %v3484_v20 = vpop.f32.mrb[35].mxu0  ;;  %v6448_v7 = vld [vmem:[#allocation37 + $0x4c] ss:$16 sps:$4 sm:$0xff]   ;;  %v6458_v16 = vld [vmem:[#allocation37 + $0xc8] ss:$16 sps:$4 sm:$0xff]  }
 0x999   :  { %6730 = vtanh.f32 %v3481_v15  ;;  %v3485_v21 = vadd.f32 %v3484_v20, %v2871_v9  ;;  %v6451_v9 = vld [vmem:[#allocation37 + $0x6c] ss:$16 sps:$4 sm:$0xff]  }
 0x99a   :  { %6732 = vtanh.f32 %v3483_v18  ;;  %v6457_v13 = vld [vmem:[#allocation37 + $0xac] ss:$16 sps:$4 sm:$0xff]   ;;  %v6461_v18 = vld [vmem:[#allocation37 + $0xe8] ss:$16 sps:$4 sm:$0xff]  }
 0x99b   :  { %6734 = vtanh.f32 %v3485_v21  ;;  %v6460_v15 = vld [vmem:[#allocation37 + $0xcc] ss:$16 sps:$4 sm:$0xff]  }
 0x99c   :  { %6736 = vrcp.f32 %v3513_v28  ;;  %v6466_v20 = vld [vmem:[#allocation37 + $0x10c] ss:$16 sps:$4 sm:$0xff]   ;;  %v6476_v28 = vld [vmem:[#allocation37 + $0x188] ss:$16 sps:$4 sm:$0xff]  }
 0x99d   :  { %6738 = vrcp.f32 %v3514_v30  ;;  %v6469_v21 = vld [vmem:[#allocation37 + $0x12c] ss:$16 sps:$4 sm:$0xff]   ;;  %v6479_v30 = vld [vmem:[#allocation37 + $0x1a8] ss:$16 sps:$4 sm:$0xff]  }
 0x99e   :  { %6740 = vrcp.f32 %v3517_v32  ;;  %v6482_v32 = vld [vmem:[#allocation37 + $0x1c8] ss:$16 sps:$4 sm:$0xff]  }
 0x99f   :  { %6742 = vrcp.f32 %v3518_v37  ;;  %v6529_v37 = vld [vmem:[#allocation43 + $0xd4] ss:$8 sps:$4 sm:$0xff]  }
 0x9a0   :  { %4665 = vmatprep.subr.bf16.mxu0 %v6529_v37  ;;  %v6554_v37 = vld [vmem:[#allocation43 + $0x160] ss:$8 sps:$4 sm:$0xff]  }
 0x9a1   :  { %4666 = vmatpush1.bf16.msra.mxu0 %v6527_v39  ;;  %v6559_v39 = vld [vmem:[#allocation43 + $0x174] ss:$8 sps:$4 sm:$0xff]  }
 0x9a2   :  { %v6729_v41 = vpop.eup %6728 }
 0x9a3   :  { %v6731_v42 = vpop.eup %6730  ;;  %v3539_v43 = vmul.f32 %v6729_v41, %v6721_v29  ;;  %v6481_v29 = vld [vmem:[#allocation37 + $0x1ac] ss:$16 sps:$4 sm:$0xff]   ;;  %v6530_v41 = vld [vmem:[#allocation43 + $0xe0] ss:$8 sps:$4 sm:$0xff]  }
 0x9a4   :  { %v6733_v45 = vpop.eup %6732  ;;  %v3540_v46 = vmul.f32 %v6731_v42, %v6723_v31  ;;  %v6484_v31 = vld [vmem:[#allocation37 + $0x1cc] ss:$16 sps:$4 sm:$0xff]   ;;  %v6533_v42 = vld [vmem:[#allocation43 + $0xf0] ss:$8 sps:$4 sm:$0xff]  }
 0x9a5   :  { %v6735_v48 = vpop.eup %6734  ;;  %6744 = vtanh.f32 %v3539_v43  ;;  %v3541_v49 = vmul.f32 %v6733_v45, %v6725_v34  ;;  %v6485_v34 = vld [vmem:[#allocation37 + $0x1e8] ss:$16 sps:$4 sm:$0xff]   ;;  %v6535_v43 = vld [vmem:[#allocation43 + $0xf4] ss:$8 sps:$4 sm:$0xff]   ;;  %v6584_v45 = vld [vmem:[%s8241_s22 + $0x40] sm:$0xff]  }
 0x9a6   :  { %6746 = vtanh.f32 %v3540_v46  ;;  %v3542_v50 = vmul.f32 %v6735_v48, %v6727_v40  ;;  %v6737_v36 = vpop.eup %6736  ;;  %v6532_v40 = vld [vmem:[#allocation43 + $0xe4] ss:$8 sps:$4 sm:$0xff]  }
 0x9a7   :  { %6748 = vtanh.f32 %v3541_v49  ;;  %v6739_v53 = vpop.eup %6738  ;;  %4667 = vmatprep.subr.bf16.mxu0 %v6532_v40  ;;  %v6585_v46 = vld [vmem:[%s8241_s22] sm:$0xff]   ;;  %v6587_v48 = vld [vmem:[%s8241_s22 + $0x8] sm:$0xff]   ;;  %v6588_v49 = vld [vmem:[%s8241_s22 + $0x50] sm:$0xff]  }
 0x9a8   :  { %6750 = vtanh.f32 %v3542_v50  ;;  %v6741_v54 = vpop.eup %6740  ;;  %4668 = vmatpush1.bf16.msra.mxu0 %v6530_v41  ;;  %v6589_v50 = vld [vmem:[%s8241_s22 + $0x10] sm:$0xff]   ;;  %v6562_v41 = vld [vmem:[#allocation43 + $0x184] ss:$8 sps:$4 sm:$0xff]  }
 0x9a9   :  { %v6743_v56 = vpop.eup %6742  ;;  %4669 = vmatprep.subr.bf16.mxu0 %v6535_v43  ;;  %v6557_v40 = vld [vmem:[#allocation43 + $0x170] ss:$8 sps:$4 sm:$0xff]   ;;  %v6565_v43 = vld [vmem:[#allocation43 + $0x194] ss:$8 sps:$4 sm:$0xff]  }
 0x9ac   :  { %4670 = vmatpush1.bf16.msra.mxu0 %v6533_v42  ;;  %v6560_v42 = vld [vmem:[#allocation43 + $0x180] ss:$8 sps:$4 sm:$0xff]  }
 0x9ad   :  { %4682 = vmatprep.subr.bf16.mxu0 %v6538_v44  ;;  %v6563_v44 = vld [vmem:[#allocation43 + $0x190] ss:$8 sps:$4 sm:$0xff]  }
 0x9af   :  { %v6745_v57 = vpop.eup %6744 }
 0x9b0   :  { %v6747_v58 = vpop.eup %6746  ;;  %v3547_v59 = vmul.f32 %v6745_v57, %v6737_v36  ;;  %v6591_v36 = vld [vmem:[%s8241_s22 + $0x18] sm:$0xff]  }
 0x9b1   :  { %v6749_v60 = vpop.eup %6748  ;;  %v3548_v61 = vmul.f32 %v6747_v58, %v6739_v53  ;;  %v6592_v53 = vld [vmem:[%s8241_s22 + $0x60] sm:$0xff]   ;;  %v8127_v58 = vld [vmem:[#allocation41] sm:$0xf] }
 0x9b2   :  { %v6751_v62 = vpop.eup %6750  ;;  %v3549_v63 = vmul.f32 %v6749_v60, %v6741_v54  ;;  %v8121_v54 = vld [vmem:[%s8242_s30] sm:$0xf] }
 0x9b3   :  { %v3550_v1 = vmul.f32 %v6751_v62, %v6743_v56  ;;  %v8123_v56 = vld [vmem:[#allocation40] sm:$0xf]  ;;  %v4146_v57 = vrot.slane %v8121_v54, %v8055_v17 }
 0x9b4   :  { %v8107_v2 = vpack.c.bf16 %v3549_v63, %v3547_v59  ;;  %v4150_v59 = vrot.slane %v8121_v54, %v8057_v19  ;;  %v4176_v60 = vrot.slane %v8123_v56, %v8055_v17  ;;  %v4180_v62 = vrot.slane %v8123_v56, %v8057_v19 }
 0x9b5   :  { %v3552_v3 = vpack.c.bf16 %v3550_v1, %v3548_v61  ;;  %v4206_v1 = vrot.slane %v8127_v58, %v8055_v17 }
 0x9b7   :  { %4087 = vmatprep.mubr.bf16.mxu1 %v3552_v3 }
 0x9b8   :  { %4088 = vmatmul.mubr.bf16.vlgmr.msra.gmra.mrb[32].mxu1 %v8107_v2 }
 0x9b9   :  { %4099 = vmatpush1.bf16.msra.mxu1 %v6440_v4  ;;  %4130 = vmatprep.mubr.bf16.mxu1 %v3552_v3  ;;  %v4210_v4 = vrot.slane %v8127_v58, %v8057_v19 }
 0x9ba   :  { %4100 = vmatprep.subr.bf16.mxu1 %v6445_v5 }
 0x9bd   :  { %4101 = vmatpush1.bf16.msra.mxu1 %v6443_v6 }
 0x9be   :  { %4102 = vmatprep.subr.bf16.mxu1 %v6448_v7 }
 0x9c1   :  { %4103 = vmatpush1.bf16.msra.mxu1 %v6446_v8 }
 0x9c2   :  { %4104 = vmatprep.subr.bf16.mxu1 %v6451_v9 }
 0x9c5   :  { %4105 = vmatpush1.bf16.msra.mxu1 %v6449_v10 }
 0x9c6   :  { %4106 = vmatprep.subr.bf16.mxu1 %v6454_v11 }
 0x9c9   :  { %4107 = vmatpush1.bf16.msra.mxu1 %v6452_v12 }
 0x9ca   :  { %4108 = vmatprep.subr.bf16.mxu1 %v6457_v13 }
 0x9cd   :  { %4109 = vmatpush1.bf16.msra.mxu1 %v6455_v14 }
 0x9ce   :  { %4110 = vmatprep.subr.bf16.mxu1 %v6460_v15 }
 0x9d1   :  { %4111 = vmatpush1.bf16.msra.mxu1 %v6458_v16 }
 0x9d2   :  { %4112 = vmatprep.subr.bf16.mxu1 %v6463_v52 }
 0x9d5   :  { %4113 = vmatpush1.bf16.msra.mxu1 %v6461_v18 }
 0x9d6   :  { %4114 = vmatprep.subr.bf16.mxu1 %v6466_v20 }
 0x9d9   :  { %4115 = vmatpush1.bf16.msra.mxu1 %v6464_v55 }
 0x9da   :  { %4116 = vmatprep.subr.bf16.mxu1 %v6469_v21 }
 0x9dd   :  { %4117 = vmatpush1.bf16.msra.mxu1 %v6467_v22 }
 0x9de   :  { %4118 = vmatprep.subr.bf16.mxu1 %v6472_v23  ;;  %v6536_v23 = vld [vmem:[#allocation43 + $0x100] ss:$8 sps:$4 sm:$0xff]  }
 0x9e1   :  { %4119 = vmatpush1.bf16.msra.mxu1 %v6470_v24  ;;  %v6541_v24 = vld [vmem:[#allocation43 + $0x114] ss:$8 sps:$4 sm:$0xff]  }
 0x9e2   :  { %4120 = vmatprep.subr.bf16.mxu1 %v6475_v25  ;;  %v6539_v25 = vld [vmem:[#allocation43 + $0x110] ss:$8 sps:$4 sm:$0xff]  }
 0x9e5   :  { %4121 = vmatpush1.bf16.msra.mxu1 %v6473_v26  ;;  %v6544_v26 = vld [vmem:[#allocation43 + $0x124] ss:$8 sps:$4 sm:$0xff]  }
 0x9e6   :  { %4122 = vmatprep.subr.bf16.mxu1 %v6478_v27  ;;  %v6542_v27 = vld [vmem:[#allocation43 + $0x120] ss:$8 sps:$4 sm:$0xff]  }
 0x9e9   :  { %4123 = vmatpush1.bf16.msra.mxu1 %v6476_v28  ;;  %v6547_v28 = vld [vmem:[#allocation43 + $0x134] ss:$8 sps:$4 sm:$0xff]  }
 0x9ea   :  { %4124 = vmatprep.subr.bf16.mxu1 %v6481_v29  ;;  %v6545_v29 = vld [vmem:[#allocation43 + $0x130] ss:$8 sps:$4 sm:$0xff]  }
 0x9ed   :  { %4125 = vmatpush1.bf16.msra.mxu1 %v6479_v30  ;;  %v6550_v30 = vld [vmem:[#allocation43 + $0x144] ss:$8 sps:$4 sm:$0xff]  }
 0x9ee   :  { %4126 = vmatprep.subr.bf16.mxu1 %v6484_v31  ;;  %v6548_v31 = vld [vmem:[#allocation43 + $0x140] ss:$8 sps:$4 sm:$0xff]  }
 0x9f1   :  { %4127 = vmatpush1.bf16.msra.mxu1 %v6482_v32  ;;  %v6553_v32 = vld [vmem:[#allocation43 + $0x154] ss:$8 sps:$4 sm:$0xff]  }
 0x9f2   :  { %4128 = vmatprep.subr.bf16.mxu1 %v6487_v33  ;;  %v6551_v33 = vld [vmem:[#allocation43 + $0x150] ss:$8 sps:$4 sm:$0xff]  }
 0x9f5   :  { %4129 = vmatpush1.bf16.msra.mxu1 %v6485_v34  ;;  %v6556_v34 = vld [vmem:[#allocation43 + $0x164] ss:$8 sps:$4 sm:$0xff]  }
 0x9f6   :  { %5681 = vmatprep.subr.bf16.mxu1 %v6584_v45  ;;  %v6568_v45 = vld [vmem:[#allocation43 + $0x1a4] ss:$8 sps:$4 sm:$0xff]  }
 0x9f8   :  { %4131 = vmatmul.mubr.bf16.vlgmr.msra.gmra.mrb[36].mxu1 %v8107_v2 }
 0x9f9   :  { %5682 = vmatpush3.bf16.msra.mxu1 %v6585_v46  ;;  %v6566_v46 = vld [vmem:[#allocation43 + $0x1a0] ss:$8 sps:$4 sm:$0xff]  }
 0x9fa   :  { %5683 = vmatprep.subr.bf16.mxu1 %v6586_v47  ;;  %v6571_v47 = vld [vmem:[#allocation43 + $0x1b4] ss:$8 sps:$4 sm:$0xff]  }
 0x9fd   :  { %5684 = vmatpush3.bf16.msra.mxu1 %v6587_v48  ;;  %v6569_v48 = vld [vmem:[#allocation43 + $0x1b0] ss:$8 sps:$4 sm:$0xff]  }
 0x9fe   :  { %5685 = vmatprep.subr.bf16.mxu1 %v6588_v49  ;;  %v6574_v49 = vld [vmem:[#allocation43 + $0x1c4] ss:$8 sps:$4 sm:$0xff]  }
 0xa01   :  { %5686 = vmatpush3.bf16.msra.mxu1 %v6589_v50  ;;  %v6572_v50 = vld [vmem:[#allocation43 + $0x1c0] ss:$8 sps:$4 sm:$0xff]  }
 0xa02   :  { %5687 = vmatprep.subr.bf16.mxu1 %v6590_v51  ;;  %v4154_v51 = vrot.slane %v8121_v54, %v8061_v35 }
 0xa05   :  { %5688 = vmatpush3.bf16.msra.mxu1 %v6591_v36  ;;  %v6577_v36 = vld [vmem:[#allocation43 + $0x1d4] ss:$8 sps:$4 sm:$0xff]  }
 0xa06   :  { %5689 = vmatprep.subr.bf16.mxu1 %v6592_v53  ;;  %v4158_v53 = vrot.slane %v8121_v54, %v8063_v38  ;;  %v4218_v54 = vrot.slane %v8127_v58, %v8063_v38 }
 0xa8b   :  { %v4089_v61 = vpop.f32.mrb[32].mxu1 }
 0xa8c   :  { %v4163_v63 = vadd.f32 %v4146_v57, %v4089_v61  ;;  %v4091_v2 = vpop.f32.mrb[33].mxu1  ;;  %v6575_v61 = vld [vmem:[#allocation43 + $0x1d0] ss:$8 sps:$4 sm:$0xff]  }
 0xa8d   :  { %v4164_v3 = vadd.f32 %v4150_v59, %v4091_v2  ;;  %v4093_v5 = vpop.f32.mrb[34].mxu1  ;;  %v6580_v2 = vld [vmem:[#allocation43 + $0x1e4] ss:$8 sps:$4 sm:$0xff]  }
 0xa8e   :  { %v4193_v6 = vmul.f32 %v4176_v60, %v4163_v63  ;;  %v4167_v7 = vadd.f32 %v4146_v57, %v4093_v5  ;;  %v4095_v8 = vpop.f32.mrb[35].mxu1  ;;  %v4184_v57 = vrot.slane %v8123_v56, %v8061_v35  ;;  %v4214_v63 = vrot.slane %v8127_v58, %v8061_v35 }
 0xa8f   :  { %v4194_v9 = vmul.f32 %v4180_v62, %v4164_v3  ;;  %v4168_v10 = vadd.f32 %v4150_v59, %v4095_v8 }
 0xa90   :  { %v4223_v11 = vadd.f32 %v4206_v1, %v4193_v6  ;;  %v4197_v12 = vmul.f32 %v4176_v60, %v4167_v7  ;;  %v4188_v60 = vrot.slane %v8123_v56, %v8063_v38  ;;  %v6578_v56 = vld [vmem:[#allocation43 + $0x1e0] ss:$8 sps:$4 sm:$0xff]   ;;  %v6581_v38 = vld [vmem:[#allocation43 + $0x1f0] ss:$8 sps:$4 sm:$0xff]  }
 0xa91   :  { %v4224_v13 = vadd.f32 %v4210_v4, %v4194_v9  ;;  %v4198_v14 = vmul.f32 %v4180_v62, %v4168_v10 }
 0xa92   :  { %v4227_v15 = vadd.f32 %v4206_v1, %v4197_v12  ;;  %v4231_v52 = vmax.f32 %v4223_v11, 0.0  ;;  %v6583_v12 = vld [vmem:[#allocation43 + $0x1f4] ss:$8 sps:$4 sm:$0xff]  }
 0xa93   :  { %v4228_v16 = vadd.f32 %v4210_v4, %v4198_v14  ;;  %v4232_v20 = vmax.f32 %v4224_v13, 0.0 }
 0xa94   :  { %v4235_v18 = vmax.f32 %v4227_v15, 0.0 }
 0xa95   :  { %v4236_v55 = vmax.f32 %v4228_v16, 0.0 }
 0xa96   :  { %v4239_v21 = vpack.c.bf16 %v4235_v18, %v4231_v52 }
 0xa97   :  { %v4240_v22 = vpack.c.bf16 %v4236_v55, %v4232_v20 }
 0xa99   :  { %4671 = vmatprep.mubr.bf16.mxu0 %v4240_v22  ;;  %v6594_v22 = vld [vmem:[%s8241_s22 + $0x68] sm:$0xff]  }
 0xa9a   :  { %4672 = vmatmul.mubr.bf16.vlgmr.msra.gmra.mrb[36].mxu0 %v4239_v21  ;;  %v6593_v21 = vld [vmem:[%s8241_s22 + $0x20] sm:$0xff]  }
 0xa9b   :  { %4683 = vmatpush1.bf16.msra.mxu0 %v6536_v23  ;;  %5690 = vmatpush3.bf16.msra.mxu1 %v6593_v21  ;;  %v6595_v23 = vld [vmem:[%s8241_s22 + $0x28] sm:$0xff]  }
 0xa9c   :  { %4684 = vmatprep.subr.bf16.mxu0 %v6541_v24  ;;  %5691 = vmatprep.subr.bf16.mxu1 %v6594_v22  ;;  %v6596_v24 = vld [vmem:[%s8241_s22 + $0x70] sm:$0xff]  }
 0xa9f   :  { %4685 = vmatpush1.bf16.msra.mxu0 %v6539_v25  ;;  %5692 = vmatpush3.bf16.msra.mxu1 %v6595_v23  ;;  %v6597_v25 = vld [vmem:[%s8241_s22 + $0x30] sm:$0xff]  }
 0xaa0   :  { %4686 = vmatprep.subr.bf16.mxu0 %v6544_v26  ;;  %5693 = vmatprep.subr.bf16.mxu1 %v6596_v24  ;;  %v6598_v26 = vld [vmem:[%s8241_s22 + $0x78] sm:$0xff]  }
 0xaa3   :  { %4687 = vmatpush1.bf16.msra.mxu0 %v6542_v27  ;;  %5694 = vmatpush3.bf16.msra.mxu1 %v6597_v25  ;;  %v6599_v27 = vld [vmem:[%s8241_s22 + $0x38] sm:$0xff]  }
 0xaa4   :  { %4688 = vmatprep.subr.bf16.mxu0 %v6547_v28  ;;  %5695 = vmatprep.subr.bf16.mxu1 %v6598_v26  ;;  %v6600_v28 = vld [vmem:[#allocation49] sm:$0xff]  }
 0xaa7   :  { %4689 = vmatpush1.bf16.msra.mxu0 %v6545_v29  ;;  %5696 = vmatpush3.bf16.msra.mxu1 %v6599_v27  ;;  %v6601_v29 = vld [vmem:[#allocation49 + $0x8] sm:$0xff]  }
 0xaa8   :  { %4690 = vmatprep.subr.bf16.mxu0 %v6550_v30  ;;  %v6602_v30 = vld [vmem:[#allocation49 + $0x10] sm:$0xff]  }
 0xaab   :  { %4691 = vmatpush1.bf16.msra.mxu0 %v6548_v31  ;;  %v6603_v31 = vld [vmem:[#allocation49 + $0x18] sm:$0xff]  }
 0xaac   :  { %4692 = vmatprep.subr.bf16.mxu0 %v6553_v32  ;;  %v6604_v32 = vld [vmem:[#allocation49 + $0x20] sm:$0xff]  }
 0xaaf   :  { %4693 = vmatpush1.bf16.msra.mxu0 %v6551_v33  ;;  %v4307_v33 = vld [vmem:[#allocation44] sm:$0x3] }
 0xab0   :  { %4694 = vmatprep.subr.bf16.mxu0 %v6556_v34  ;;  %v4725_v34 = vld [vmem:[#allocation46] sm:$0x3] }
 0xab3   :  { %4695 = vmatpush1.bf16.msra.mxu0 %v6554_v37  ;;  %v4312_v37 = vrot.slane %v4307_v33, %v8055_v17 }
 0xab4   :  { %4696 = vmatprep.subr.bf16.mxu0 %v6559_v39  ;;  %v4741_v39 = vld [vmem:[#allocation47] sm:$0x3] }
 0xab7   :  { %4697 = vmatpush1.bf16.msra.mxu0 %v6557_v40  ;;  %v4316_v40 = vrot.slane %v4307_v33, %v8057_v19 }
 0xab8   :  { %4698 = vmatprep.subr.bf16.mxu0 %v6562_v41  ;;  %v4730_v41 = vrot.slane %v4725_v34, %v8055_v17 }
 0xabb   :  { %4699 = vmatpush1.bf16.msra.mxu0 %v6560_v42 }
 0xabc   :  { %4700 = vmatprep.subr.bf16.mxu0 %v6565_v43  ;;  %v4734_v43 = vrot.slane %v4725_v34, %v8057_v19 }
 0xabf   :  { %4701 = vmatpush1.bf16.msra.mxu0 %v6563_v44 }
 0xac0   :  { %4702 = vmatprep.subr.bf16.mxu0 %v6568_v45  ;;  %v4746_v45 = vrot.slane %v4741_v39, %v8055_v17 }
 0xac3   :  { %4703 = vmatpush1.bf16.msra.mxu0 %v6566_v46 }
 0xac4   :  { %4704 = vmatprep.subr.bf16.mxu0 %v6571_v47 }
 0xac7   :  { %4705 = vmatpush1.bf16.msra.mxu0 %v6569_v48  ;;  %v4750_v48 = vrot.slane %v4741_v39, %v8057_v19  ;;  %v6605_v19 = vld [vmem:[#allocation49 + $0x28] sm:$0xff]  }
 0xac8   :  { %4706 = vmatprep.subr.bf16.mxu0 %v6574_v49 }
 0xacb   :  { %v4132_v59 = vpop.f32.mrb[36].mxu1  ;;  %4707 = vmatpush1.bf16.msra.mxu0 %v6572_v50 }
 0xacc   :  { %v4165_v62 = vadd.f32 %v4154_v51, %v4132_v59  ;;  %v4134_v1 = vpop.f32.mrb[37].mxu1  ;;  %4708 = vmatprep.subr.bf16.mxu0 %v6577_v36 }
 0xacd   :  { %v4166_v3 = vadd.f32 %v4158_v53, %v4134_v1  ;;  %v4136_v4 = vpop.f32.mrb[38].mxu1 }
 0xace   :  { %v4195_v5 = vmul.f32 %v4184_v57, %v4165_v62  ;;  %v4169_v6 = vadd.f32 %v4154_v51, %v4136_v4  ;;  %v4138_v7 = vpop.f32.mrb[39].mxu1 }
 0xacf   :  { %v4196_v8 = vmul.f32 %v4188_v60, %v4166_v3  ;;  %v4170_v9 = vadd.f32 %v4158_v53, %v4138_v7  ;;  %4709 = vmatpush1.bf16.msra.mxu0 %v6575_v61  ;;  %v6607_v7 = vld [vmem:[#allocation49 + $0x38] sm:$0xff]  }
 0xad0   :  { %v4225_v10 = vadd.f32 %v4214_v63, %v4195_v5  ;;  %v4199_v11 = vmul.f32 %v4184_v57, %v4169_v6  ;;  %4710 = vmatprep.subr.bf16.mxu0 %v6580_v2  ;;  %v6606_v6 = vld [vmem:[#allocation49 + $0x30] sm:$0xff]  }
 0xad1   :  { %v4226_v35 = vadd.f32 %v4218_v54, %v4196_v8  ;;  %v4200_v13 = vmul.f32 %v4188_v60, %v4170_v9  ;;  %v5591_v9 = vld [vmem:[%s7748_s13] ss:$0 sm:$0xff]  ;;  %s7434_s13 = scalar_lea.vmem %s5062_s15, 256 }
 0xad2   :  { %v4229_v14 = vadd.f32 %v4214_v63, %v4199_v11  ;;  %v4233_v58 = vmax.f32 %v4225_v10, 0.0  ;;  %p7435_p10 = scmp.ne.s32.totalorder %s5062_s15, %s7434_s13  ;;  %p7440_p12 = scmp.lt.s32.totalorder %s7434_s13, %s7434_s13 }
 0xad3   :  { %v4230_v15 = vadd.f32 %v4218_v54, %v4200_v13  ;;  %4711 = vmatpush1.bf16.msra.mxu0 %v6578_v56  ;;  %v4234_v52 = vmax.f32 %v4226_v35, 0.0 }
 0xad4   :  { %v4237_v16 = vmax.f32 %v4229_v14, 0.0  ;;  %4712 = vmatprep.subr.bf16.mxu0 %v6583_v12  ;;  %p7441_p13 = por %p7440_p12, %p7439_p11 }
 0xad5   :  { %v4238_v18 = vmax.f32 %v4230_v15, 0.0 }
 0xad6   :  { %v4241_v20 = vpack.c.bf16 %v4237_v16, %v4233_v58  ;;  %v5608_v16 = vld [vmem:[%s7758_s21] ss:$0 sm:$0xff]  ;;  %p7442_p0 = pnand %p7441_p13, %p7435_p10 }
 0xad7   :  { %4713 = vmatpush1.bf16.msra.mxu0 %v6581_v38  ;;  %v4242_v55 = vpack.c.bf16 %v4238_v18, %v4234_v52 }
 0xad8   :  { %5856 = vmatprep.subr.bf16.mxu0 %v7566_v0 }
 0xad9   :  { %4714 = vmatprep.mubr.bf16.mxu0 %v4242_v55 }
 0xada   :  { %4715 = vmatmul.mubr.bf16.vlgmr.msra.gmra.mrb[36].mxu0 %v4241_v20 }
 0xadb   :  { %5872 = vmatprep.mubr.msk.bf16.mxu0 %vm7567_vm0, %v7566_v0  ;;  %5857 = vmatpush3.bf16.msra.mxu0 %v6600_v28 }
 0xadc   :  { %5858 = vmatprep.subr.bf16.mxu0 %v7566_v0 }
 0xadf   :  { %5859 = vmatpush3.bf16.msra.mxu0 %v6601_v29 }
 0xae0   :  { %5860 = vmatprep.subr.bf16.mxu0 %v7566_v0 }
 0xae3   :  { %5861 = vmatpush3.bf16.msra.mxu0 %v6602_v30 }
 0xae4   :  { %5862 = vmatprep.subr.bf16.mxu0 %v7566_v0 }
 0xae7   :  { %5863 = vmatpush3.bf16.msra.mxu0 %v6603_v31 }
 0xae8   :  { %5864 = vmatprep.subr.bf16.mxu0 %v7566_v0 }
 0xaeb   :  { %5865 = vmatpush3.bf16.msra.mxu0 %v6604_v32 }
 0xaec   :  { %5866 = vmatprep.subr.bf16.mxu0 %v7566_v0 }
 0xaef   :  { %5867 = vmatpush3.bf16.msra.mxu0 %v6605_v19 }
 0xaf0   :  { %5868 = vmatprep.subr.bf16.mxu0 %v7566_v0 }
 0xaf3   :  { %5869 = vmatpush3.bf16.msra.mxu0 %v6606_v6 }
 0xaf4   :  { %5870 = vmatprep.subr.bf16.mxu0 %v7566_v0 }
 0xaf7   :  { %5871 = vmatpush3.bf16.msra.mxu0 %v6607_v7 }
 0xbad   :  { %v4716_v42 = vpop.f32.mrb[36].mxu0 }
 0xbae   :  { %v5876_v44 = vadd.f32 %v4716_v42, %v4312_v37  ;;  %v4718_v46 = vpop.f32.mrb[37].mxu0 }
 0xbaf   :  { %v5877_v47 = vadd.f32 %v4718_v46, %v4316_v40  ;;  %v4720_v49 = vpop.f32.mrb[38].mxu0 }
 0xbb0   :  { %v4737_v50 = vmul.f32 %v5876_v44, %v4730_v41  ;;  %v5878_v51 = vadd.f32 %v4720_v49, %v4312_v37  ;;  %v4722_v36 = vpop.f32.mrb[39].mxu0 }
 0xbb1   :  { %v4738_v53 = vmul.f32 %v5877_v47, %v4734_v43  ;;  %v5879_v57 = vadd.f32 %v4722_v36, %v4316_v40 }
 0xbb2   :  { %v4753_v59 = vadd.f32 %v4746_v45, %v4737_v50  ;;  %v4739_v60 = vmul.f32 %v5878_v51, %v4730_v41 }
 0xbb3   :  { %v4754_v61 = vadd.f32 %v4750_v48, %v4738_v53  ;;  %v4740_v62 = vmul.f32 %v5879_v57, %v4734_v43 }
 0xbb4   :  { %v4755_v63 = vadd.f32 %v4746_v45, %v4739_v60  ;;  %v4757_v2 = vmax.f32 %v4753_v59, 0.0 }
 0xbb5   :  { %v4756_v1 = vadd.f32 %v4750_v48, %v4740_v62  ;;  %v4758_v17 = vmax.f32 %v4754_v61, 0.0 }
 0xbb6   :  { %v4759_v3 = vmax.f32 %v4755_v63, 0.0 }
 0xbb7   :  { %v4760_v54 = vmax.f32 %v4756_v1, 0.0 }
 0xbb8   :  { %v4761_v4 = vpack.c.bf16 %v4759_v3, %v4757_v2 }
 0xbb9   :  { %v4762_v5 = vpack.c.bf16 %v4760_v54, %v4758_v17 }
 0xbbb   :  { %4930 = vmatprep.mubr.bf16.mxu1 %v4762_v5 }
 0xbbc   :  { %4931 = vmatmul.mubr.bf16.vlgmr.msra.gmra.mrb[40].mxu1 %v4761_v4 }
 0xc8f   :  { %v5697_v8 = vpop.f32.mrb[40].mxu1 }
 0xc90   :  { %v5698_v56 = vpop.f32.mrb[41].mxu1 }
 0xc91   :  { %v5699_v10 = vadd.f32 %v5698_v56, %v5697_v8  ;;  %v5700_v11 = vpop.f32.mrb[42].mxu1 }
 0xc92   :  { %v5701_v12 = vpop.f32.mrb[43].mxu1 }
 0xc93   :  { %v4933_v35 = vadd.f32 %v5699_v10, %v5591_v9  ;;  %v5702_v13 = vadd.f32 %v5701_v12, %v5700_v11 }
 0xc95   :  { %v4936_v14 = vadd.f32 %v5702_v13, %v5591_v9  ;;  %v4939_v15 = vmax.f32 %v4933_v35, 0.0 }
 0xc97   :  { %v4940_v38 = vmax.f32 %v4936_v14, 0.0 }
 0xc99   :  { %v4941_v58 = vpack.c.bf16 %v4940_v38, %v4939_v15 }
 0xc9b   :  { %5873 = vmatmul.mubr.bf16.vlgmr.msra.gmra.mrb[40].mxu0 %v4941_v58 }
 0xd6e   :  { %v5047_v52 = vpop.f32.mrb[40].mxu0 }
 0xd6f   :  { %v5048_v0 = vadd.f32 %v5608_v16, %v5047_v52  ;;  %v5874_v18 = vpop.f32.mrb[41].mxu0 }
 0xd70   :  { %v5050_v20 = vpop.f32.mrb[42].mxu0 }
 0xd71   :  { %5054 = vst [vmem:[#allocation50] sm:$0xff] %v5048_v0  ;;  %v5051_v55 = vadd.f32 %v5608_v16, %v5050_v20  ;;  %v5875_v21 = vpop.f32.mrb[43].mxu0 }
 0xd73   :  { %5055 = vst [vmem:[#allocation50 + $0x8] sm:$0xff] %v5051_v55 }
 0xd74   :  { %7445 = shalt.err (!%p7442_p0)
}
 0xd75   :  { %s7446_s21 = scalar_lea.hbm %s7763_s29, 256 }
 0xd76   :  { %p7447_p1 = scmp.ne.s32.totalorder %s7763_s29, %s7446_s21  ;;  %p7450_p2 = scmp.lt.u32.totalorder %s7446_s21, %s7763_s29 }
 0xd78   :  { %p7452_p3 = pnand %p7450_p2, %p7447_p1 }
 0xd7a   :  { %7455 = shalt.err (!%p7452_p3)
}
 0xd7b   :  { %5067 = dma.vmem_to_hbm [thread:$0]  %s5062_s15, 256, %s7763_s29, [#allocation4], %s7562_s14, %s7562_s14, %s7563_s2  }
 0xd7c   :  { %7488 = dma.done.wait [#allocation4], 256  }
 0xd7d   :  { %7489 = vsyncadd [#allocation4], 4294967040 }
 0xd7e   :  { %5071 = vsyncpa [#allocation3], 1 }
 0xd7f   :  { %5072 = vsyncpa [#allocation6], 1 }
 0xd80   :  { %5073 = vsyncpa [#allocation9], 1 }
 0xd81   :  { %5074 = vsyncpa [#allocation12], 1 }
 0xd82   :  { %5075 = vsyncpa [#allocation15], 1 }
 0xd83   :  { %5076 = vsyncpa [#allocation18], 1 }
 0xd84   :  { %5077 = vsyncpa [#allocation21], 1 }
 0xd85   :  { %5078 = vsyncpa [#allocation24], 1 }
 0xd86   :  { %5079 = vsyncpa [#allocation27], 1 }
 0xd87   :  { %5080 = vsyncpa [#allocation30], 1 }
 0xd88   :  { %5081 = vsyncpa [#allocation33], 1 }
 0xd89   :  { %5082 = vsyncpa [#allocation36], 1 }
 0xd8a   :  { %5083 = vsyncpa [#allocation39], 1 }
 0xd8b   :  { %5084 = vsyncpa [#allocation42], 1 }
 0xd8c   :  { %5085 = vsyncpa [#allocation45], 1 }
 0xd8d   :  { %5086 = vsyncpa [#allocation48], 1 }
 0xd8e   :  { %5087 = vsyncpa [#allocation4], 1 }

</bundles_post_ra>
